<compile_context>
chip_gen: v7x
topology: tpu7x:2x2x1
jax: 0.10.0
libtpu: 0.0.40
codegen_flags: <defaults>
</compile_context>

<pallas_src>
import functools

import jax
import jax.numpy as jnp
from jax.experimental import pallas as pl
from jax.experimental.pallas import tpu as pltpu


def _round_up(v, m):
    return ((v + m - 1) // m) * m


def _vmem_capacity_bytes():
    try:
        info = pltpu.get_tpu_info()
        cap = int(getattr(info, "vmem_capacity_bytes", 0) or 0)
        if cap > 0:
            return cap
    except Exception:
        pass
    return 64 * 2 ** 20            # conservative fallback (v7x-sized VMEM)


# ----------------------------------------------------------------------------
# Fused kernel: conv3x3+BN+ReLU -> conv3x3+BN -> +residual -> ReLU (one tile)
# ----------------------------------------------------------------------------
def _fused_basic_block_kernel(xc_ref, xh_ref, w1_ref, w2_ref,
                              s1_ref, b1_ref, s2_ref, b2_ref,
                              o_ref, y_ref, *, img_h, img_w, hp):
    # xc_ref : (1, Th, W8+2, Cp)   bf16  padded-input rows [i*Th, i*Th+Th)
    # xh_ref : (1, 4,  W8+2, Cp)   bf16  4-row bottom halo [(i+1)*Th, +4)
    # w*_ref : (3, 3*Cp, Cp)       bf16  kh-major weights, (kw,cin) folded in K
    # s*/b*  : (1, Cp)             f32   folded BatchNorm scale / bias
    # o_ref  : (1, Th, W8, Cp)     f32
    # y_ref  : (Th+2, W8+16, Cp)   bf16  conv1-output scratch; image columns
    #          live at offset 8 (sublane aligned); cols 7 / [8+W, 9+W8) serve
    #          as conv2's zero padding.
    i = pl.program_id(1)
    n_tiles = pl.num_programs(1)
    _, Th, Wp2, Cp = xc_ref.shape
    W8 = Wp2 - 2
    Wy = W8 + 16

    def conv3x3(xpad, col0, wf_ref):
        # xpad: (R, *, Cp) bf16 with the 3 kw taps at cols col0+{0,1,2}..+W8.
        # Returns (R-2, W8, Cp) f32 via 3 MXU dots with K = 3*Cp.
        R = xpad.shape[0]
        Ro = R - 2
        patch = jnp.concatenate(
            [xpad[:, col0 + d:col0 + d + W8, :] for d in range(3)],
            axis=-1)                                      # (R, W8, 3*Cp) bf16
        acc = jnp.zeros((Ro * W8, Cp), jnp.float32)
        for kh in range(3):                               # 3 dots, K = 3*Cp
            lhs = patch[kh:kh + Ro].reshape(Ro * W8, 3 * Cp)
            acc = acc + jnp.dot(lhs, wf_ref[kh],
                                preferred_element_type=jnp.float32)
        return acc.reshape(Ro, W8, Cp)

    # Haloed input tile: image rows [i*Th-2, i*Th+Th+2), cols [-1, W8+1).
    xt = jnp.concatenate([xc_ref[0], xh_ref[0]], axis=0)   # (Th+4, Wp2, Cp)

    # ---- conv1 -> bn1 -> relu on the Th+2 rows conv2 needs -----------------
    y = conv3x3(xt, 0, w1_ref)                             # (Th+2, W8, Cp) f32
    y = jnp.maximum(y * s1_ref[0] + b1_ref[0], 0.0)
    y_ref[:, 8:8 + W8, :] = y.astype(y_ref.dtype)          # aligned big store

    # conv2 must see *zeros* outside the image (PyTorch zero padding):
    # left/right padding columns every step (tiny), out-of-image rows only on
    # the first/last row tile via static slices under pl.when.
    y_ref[:, 7:8, :] = jnp.zeros((Th + 2, 1, Cp), y_ref.dtype)
    y_ref[:, 8 + img_w:9 + W8, :] = jnp.zeros(
        (Th + 2, 1 + W8 - img_w, Cp), y_ref.dtype)

    @pl.when(i == 0)
    def _():                                               # image row -1
        y_ref[0:1, :, :] = jnp.zeros((1, Wy, Cp), y_ref.dtype)

    n_bot = hp + 1 - img_h                                 # static, >= 1
    @pl.when(i == n_tiles - 1)
    def _():                                               # image rows >= H
        y_ref[Th + 2 - n_bot:Th + 2, :, :] = jnp.zeros(
            (n_bot, Wy, Cp), y_ref.dtype)

    # ---- conv2 -> bn2 -> + residual -> relu ---------------------------------
    out = conv3x3(y_ref, 7, w2_ref)                        # (Th, W8, Cp) f32
    out = out * s2_ref[0] + b2_ref[0]
    out = out + xt[2:2 + Th, 1:1 + W8, :].astype(jnp.float32)   # resident x
    o_ref[0] = jnp.maximum(out, 0.0).astype(o_ref.dtype)


# ----------------------------------------------------------------------------
# Tile-size / VMEM-budget selection (per TPU generation)
# ----------------------------------------------------------------------------
def _pick_tile_h(H, W8, Cp, vmem_cap):
    Wp2 = W8 + 2
    h4 = _round_up(H, 4)
    cands = sorted({min(t, h4) for t in (64, 48, 32, 16, 8, 4)}, reverse=True)
    budget = int(vmem_cap * 0.8)          # leave headroom for Mosaic scratch

    def estimate(th):
        bf, f32 = 2, 4
        return (2 * th * Wp2 * Cp * bf            # xc block, double buffered
                + 2 * 4 * Wp2 * Cp * bf           # halo block, double buffered
                + 2 * th * W8 * Cp * f32          # out block, double buffered
                + 2 * 2 * 9 * Cp * Cp * bf        # two folded weights
                + (th + 2) * (W8 + 16) * Cp * bf  # y scratch
                + (th + 4) * Wp2 * Cp * bf        # assembled input tile
                + (th + 4) * W8 * 3 * Cp * bf     # conv1 patch
                + (th + 2) * W8 * 3 * Cp * bf     # conv2 patch
                + (th + 2) * W8 * Cp * f32        # conv1 f32 accumulator
                + th * W8 * Cp * f32)             # conv2 f32 accumulator

    best = cands[-1]
    for th in cands:                              # biggest tile that fits
        if int(estimate(th) * 1.3) <= budget:
            best = th
            break
    limit = int(min(max(budget, estimate(best) * 1.4), vmem_cap * 0.9))
    return best, limit


# ----------------------------------------------------------------------------
# BasicBlock wrapper (NCHW in / NCHW out, like the PyTorch module)
# ----------------------------------------------------------------------------
def init_basic_block_params(key, inplanes, planes):
    k1, k2, k3, k4 = jax.random.split(key, 4)
    # conv weights in PyTorch layout (Cout, Cin, 3, 3), bias=False
    w1 = 0.1 * jax.random.normal(k1, (planes, inplanes, 3, 3), jnp.float32)
    w2 = 0.1 * jax.random.normal(k2, (planes, planes, 3, 3), jnp.float32)

    def bn_params(k):   # eval-mode BatchNorm parameters / running stats
        kg, kb, km, kv = jax.random.split(k, 4)
        return {
            "gamma": 1.0 + 0.1 * jax.random.normal(kg, (planes,), jnp.float32),
            "beta": 0.1 * jax.random.normal(kb, (planes,), jnp.float32),
            "mean": 0.1 * jax.random.normal(km, (planes,), jnp.float32),
            "var": 1.0 + 0.1 * jnp.abs(
                jax.random.normal(kv, (planes,), jnp.float32)),
        }

    return {"w1": w1, "w2": w2, "bn1": bn_params(k3), "bn2": bn_params(k4)}


@functools.partial(jax.jit, static_argnames=("tile_h",))
def basic_block_forward(x_nchw, params, tile_h=None):
    eps = 1e-5
    x = jnp.transpose(x_nchw, (0, 2, 3, 1)).astype(jnp.float32)  # NCHW -> NHWC
    N, H, W, C = x.shape
    assert params["w1"].shape[0] == C and params["w1"].shape[1] == C, (
        "BasicBlock with downsample=None requires inplanes == planes")

    Cp = _round_up(C, 128)            # lane-dense channel axis
    W8 = _round_up(W, 8)              # sublane-aligned width
    vmem_cap = _vmem_capacity_bytes()
    auto_th, vmem_limit = _pick_tile_h(H, W8, Cp, vmem_cap)
    if tile_h is None:
        Th = auto_th
    else:
        Th = max(4, (min(int(tile_h), _round_up(H, 4)) // 4) * 4)
    Hp = _round_up(H, Th)
    n_tiles = Hp // Th
    Wp2 = W8 + 2

    # One-time HBM padding (bf16): 2-row halo ring (conv o conv), 1 col each
    # side, channels zero-padded to Cp (padded lanes stay zero end-to-end).
    xp = jnp.pad(x.astype(jnp.bfloat16),
                 ((0, 0), (2, 2 + Hp - H), (1, 1 + W8 - W), (0, Cp - C)))

    def prep_w(w_pt):                 # (Cout,Cin,3,3) -> (3, 3*Cp, Cp) bf16
        w = jnp.transpose(w_pt, (2, 3, 1, 0)).astype(jnp.float32)
        w = jnp.pad(w, ((0, 0), (0, 0), (0, Cp - C), (0, Cp - C)))
        return w.reshape(3, 3 * Cp, Cp).astype(jnp.bfloat16)

    def prep_bn(bn):                  # fold eval-mode BN into scale / bias
        scale = bn["gamma"] * jax.lax.rsqrt(bn["var"] + eps)
        bias = bn["beta"] - bn["mean"] * scale
        return (jnp.pad(scale, (0, Cp - C)).reshape(1, Cp),
                jnp.pad(bias, (0, Cp - C)).reshape(1, Cp))

    w1f, w2f = prep_w(params["w1"]), prep_w(params["w2"])
    s1, b1 = prep_bn(params["bn1"])
    s2, b2 = prep_bn(params["bn2"])

    grid = (N, n_tiles)
    in_specs = [
        # Th-row body of the padded input.
        pl.BlockSpec((1, Th, Wp2, Cp), lambda n, i: (n, i, 0, 0)),
        # 4-row bottom halo (Th % 4 == 0 so this is a plain blocked index).
        pl.BlockSpec((1, 4, Wp2, Cp),
                     lambda n, i: (n, (i + 1) * (Th // 4), 0, 0)),
        pl.BlockSpec((3, 3 * Cp, Cp), lambda n, i: (0, 0, 0)),
        pl.BlockSpec((3, 3 * Cp, Cp), lambda n, i: (0, 0, 0)),
        pl.BlockSpec((1, Cp), lambda n, i: (0, 0)),
        pl.BlockSpec((1, Cp), lambda n, i: (0, 0)),
        pl.BlockSpec((1, Cp), lambda n, i: (0, 0)),
        pl.BlockSpec((1, Cp), lambda n, i: (0, 0)),
    ]
    out_specs = pl.BlockSpec((1, Th, W8, Cp), lambda n, i: (n, i, 0, 0))

    flops = 2 * 2 * 9 * N * Hp * W8 * Cp * Cp
    bytes_accessed = (2 * N * n_tiles * (Th + 4) * Wp2 * Cp     # bf16 input
                      + 2 * 2 * 9 * Cp * Cp                     # bf16 weights
                      + 4 * N * Hp * W8 * Cp)                   # f32 output

    out_padded = pl.pallas_call(
        functools.partial(_fused_basic_block_kernel,
                          img_h=H, img_w=W, hp=Hp),
        out_shape=jax.ShapeDtypeStruct((N, Hp, W8, Cp), jnp.float32),
        grid=grid,
        in_specs=in_specs,
        out_specs=out_specs,
        scratch_shapes=[pltpu.VMEM((Th + 2, W8 + 16, Cp), jnp.bfloat16)],
        compiler_params=pltpu.CompilerParams(
            dimension_semantics=("parallel", "parallel"),
            vmem_limit_bytes=vmem_limit),
        cost_estimate=pl.CostEstimate(flops=flops, transcendentals=0,
                                      bytes_accessed=bytes_accessed),
    )(xp, xp, w1f, w2f, s1, b1, s2, b2)

    out = out_padded[:, :H, :W, :C]
    return jnp.transpose(out, (0, 3, 1, 2))                 # NHWC -> NCHW


# ----------------------------------------------------------------------------
# Pure-JAX reference for sanity checking
# ----------------------------------------------------------------------------
def _ref_forward(x_nchw, params, eps=1e-5):
    def conv(x, w_pt):   # x NHWC, PyTorch weight (Cout,Cin,3,3)
        w = jnp.transpose(w_pt, (2, 3, 1, 0)).astype(jnp.float32)
        return jax.lax.conv_general_dilated(
            x, w, window_strides=(1, 1), padding="SAME",
            dimension_numbers=("NHWC", "HWIO", "NHWC"))

    def bn(x, p):
        return ((x - p["mean"]) * jax.lax.rsqrt(p["var"] + eps) * p["gamma"]
                + p["beta"])

    x = jnp.transpose(x_nchw, (0, 2, 3, 1)).astype(jnp.float32)
    out = jnp.maximum(bn(conv(x, params["w1"]), params["bn1"]), 0.0)
    out = bn(conv(out, params["w2"]), params["bn2"])
    out = jnp.maximum(out + x, 0.0)
    return jnp.transpose(out, (0, 3, 1, 2))


if __name__ == "__main__":
    key = jax.random.PRNGKey(0)
    kx, kp = jax.random.split(key)

    N, C, H, W = 2, 4, 16, 16          # inplanes = planes = 4, stride = 1
    x = jax.random.normal(kx, (N, C, H, W), jnp.float32)
    params = init_basic_block_params(kp, inplanes=C, planes=C)

    out = jax.block_until_ready(basic_block_forward(x, params))
    ref = _ref_forward(x, params)

    assert out.shape == (N, C, H, W)
    max_err = float(jnp.max(jnp.abs(out - ref)))
    # bf16 activations/weights on the MXU path -> small, bounded rounding.
    assert jnp.allclose(out, ref, atol=3e-2, rtol=3e-2), (
        f"mismatch vs reference (max abs err {max_err})")

    print("KERNEL_OK")
</pallas_src>

<mosaic_0001>
module attributes {stable_mosaic.version = 11 : i64} {
  func.func @_fused_basic_block_kernel(%arg0: i32, %arg1: i32, %arg2: memref<1x16x18x128xbf16, #tpu.memory_space<vmem>>, %arg3: memref<1x4x18x128xbf16, #tpu.memory_space<vmem>>, %arg4: memref<3x384x128xbf16, #tpu.memory_space<vmem>>, %arg5: memref<3x384x128xbf16, #tpu.memory_space<vmem>>, %arg6: memref<1x128xf32, #tpu.memory_space<vmem>>, %arg7: memref<1x128xf32, #tpu.memory_space<vmem>>, %arg8: memref<1x128xf32, #tpu.memory_space<vmem>>, %arg9: memref<1x128xf32, #tpu.memory_space<vmem>>, %arg10: memref<1x16x16x128xf32, #tpu.memory_space<vmem>>, %arg11: memref<18x32x128xbf16, #tpu.memory_space<vmem>>) attributes {dimension_semantics = [#tpu.dimension_semantics<parallel>, #tpu.dimension_semantics<parallel>], iteration_bounds = array<i64: 2, 1>, scalar_prefetch = 0 : i64, scratch_operands = 1 : i64, tpu.core_type = #tpu.core_type<tc>, window_params = [{transform_indices = @transform_0, window_bounds = array<i64: 1, 16, 18, 128>}, {transform_indices = @transform_1, window_bounds = array<i64: 1, 4, 18, 128>}, {pipeline_mode = #tpu.pipeline_mode<synchronous>, transform_indices = @transform_2, window_bounds = array<i64: 3, 384, 128>}, {pipeline_mode = #tpu.pipeline_mode<synchronous>, transform_indices = @transform_3, window_bounds = array<i64: 3, 384, 128>}, {pipeline_mode = #tpu.pipeline_mode<synchronous>, transform_indices = @transform_4, window_bounds = array<i64: 1, 128>}, {pipeline_mode = #tpu.pipeline_mode<synchronous>, transform_indices = @transform_5, window_bounds = array<i64: 1, 128>}, {pipeline_mode = #tpu.pipeline_mode<synchronous>, transform_indices = @transform_6, window_bounds = array<i64: 1, 128>}, {pipeline_mode = #tpu.pipeline_mode<synchronous>, transform_indices = @transform_7, window_bounds = array<i64: 1, 128>}, {transform_indices = @transform_8, window_bounds = array<i64: 1, 16, 16, 128>}]} {
    %c0 = arith.constant 0 : index
    %c0_0 = arith.constant 0 : index
    %c0_1 = arith.constant 0 : index
    %c0_2 = arith.constant 0 : index
    %0 = vector.load %arg2[%c0, %c0_0, %c0_1, %c0_2] : memref<1x16x18x128xbf16, #tpu.memory_space<vmem>>, vector<1x16x18x128xbf16>
    %1 = vector.shape_cast %0 : vector<1x16x18x128xbf16> to vector<16x18x128xbf16>
    %c0_3 = arith.constant 0 : index
    %c0_4 = arith.constant 0 : index
    %c0_5 = arith.constant 0 : index
    %c0_6 = arith.constant 0 : index
    %2 = vector.load %arg3[%c0_3, %c0_4, %c0_5, %c0_6] : memref<1x4x18x128xbf16, #tpu.memory_space<vmem>>, vector<1x4x18x128xbf16>
    %3 = vector.shape_cast %2 : vector<1x4x18x128xbf16> to vector<4x18x128xbf16>
    %4 = tpu.concatenate %1, %3 in 0 : vector<16x18x128xbf16>, vector<4x18x128xbf16> -> vector<20x18x128xbf16>
    %5 = vector.extract_strided_slice %4 {offsets = [0, 0, 0], sizes = [20, 16, 128], strides = [1, 1, 1]} : vector<20x18x128xbf16> to vector<20x16x128xbf16>
    %6 = vector.extract_strided_slice %4 {offsets = [0, 1, 0], sizes = [20, 16, 128], strides = [1, 1, 1]} : vector<20x18x128xbf16> to vector<20x16x128xbf16>
    %7 = vector.extract_strided_slice %4 {offsets = [0, 2, 0], sizes = [20, 16, 128], strides = [1, 1, 1]} : vector<20x18x128xbf16> to vector<20x16x128xbf16>
    %8 = tpu.concatenate %5, %6, %7 in 2 : vector<20x16x128xbf16>, vector<20x16x128xbf16>, vector<20x16x128xbf16> -> vector<20x16x384xbf16>
    %cst = arith.constant 0.000000e+00 : f32
    %9 = vector.broadcast %cst : f32 to vector<288x128xf32>
    %10 = vector.extract_strided_slice %8 {offsets = [0, 0, 0], sizes = [18, 16, 384], strides = [1, 1, 1]} : vector<20x16x384xbf16> to vector<18x16x384xbf16>
    %11 = vector.shape_cast %10 : vector<18x16x384xbf16> to vector<288x384xbf16>
    %c0_7 = arith.constant 0 : index
    %c0_8 = arith.constant 0 : index
    %c0_9 = arith.constant 0 : index
    %12 = vector.load %arg4[%c0_7, %c0_8, %c0_9] : memref<3x384x128xbf16, #tpu.memory_space<vmem>>, vector<1x384x128xbf16>
    %13 = vector.shape_cast %12 : vector<1x384x128xbf16> to vector<384x128xbf16>
    %cst_10 = arith.constant dense<0.000000e+00> : vector<288x128xf32>
    %14 = tpu.matmul %11, %13, %cst_10 {dimension_numbers = #tpu.dot_dimension_numbers<[1], [0], [0], [1], [0, 0, 1, 1], [], []>} : vector<288x384xbf16>, vector<384x128xbf16>, vector<288x128xf32> -> vector<288x128xf32>
    %15 = arith.addf %9, %14 : vector<288x128xf32>
    %16 = vector.extract_strided_slice %8 {offsets = [1, 0, 0], sizes = [18, 16, 384], strides = [1, 1, 1]} : vector<20x16x384xbf16> to vector<18x16x384xbf16>
    %17 = vector.shape_cast %16 : vector<18x16x384xbf16> to vector<288x384xbf16>
    %c1 = arith.constant 1 : index
    %c0_11 = arith.constant 0 : index
    %c0_12 = arith.constant 0 : index
    %18 = vector.load %arg4[%c1, %c0_11, %c0_12] : memref<3x384x128xbf16, #tpu.memory_space<vmem>>, vector<1x384x128xbf16>
    %19 = vector.shape_cast %18 : vector<1x384x128xbf16> to vector<384x128xbf16>
    %cst_13 = arith.constant dense<0.000000e+00> : vector<288x128xf32>
    %20 = tpu.matmul %17, %19, %cst_13 {dimension_numbers = #tpu.dot_dimension_numbers<[1], [0], [0], [1], [0, 0, 1, 1], [], []>} : vector<288x384xbf16>, vector<384x128xbf16>, vector<288x128xf32> -> vector<288x128xf32>
    %21 = arith.addf %15, %20 : vector<288x128xf32>
    %22 = vector.extract_strided_slice %8 {offsets = [2, 0, 0], sizes = [18, 16, 384], strides = [1, 1, 1]} : vector<20x16x384xbf16> to vector<18x16x384xbf16>
    %23 = vector.shape_cast %22 : vector<18x16x384xbf16> to vector<288x384xbf16>
    %c2 = arith.constant 2 : index
    %c0_14 = arith.constant 0 : index
    %c0_15 = arith.constant 0 : index
    %24 = vector.load %arg4[%c2, %c0_14, %c0_15] : memref<3x384x128xbf16, #tpu.memory_space<vmem>>, vector<1x384x128xbf16>
    %25 = vector.shape_cast %24 : vector<1x384x128xbf16> to vector<384x128xbf16>
    %cst_16 = arith.constant dense<0.000000e+00> : vector<288x128xf32>
    %26 = tpu.matmul %23, %25, %cst_16 {dimension_numbers = #tpu.dot_dimension_numbers<[1], [0], [0], [1], [0, 0, 1, 1], [], []>} : vector<288x384xbf16>, vector<384x128xbf16>, vector<288x128xf32> -> vector<288x128xf32>
    %27 = arith.addf %21, %26 : vector<288x128xf32>
    %28 = vector.shape_cast %27 : vector<288x128xf32> to vector<18x16x128xf32>
    %c0_17 = arith.constant 0 : index
    %c0_18 = arith.constant 0 : index
    %29 = vector.load %arg6[%c0_17, %c0_18] : memref<1x128xf32, #tpu.memory_space<vmem>>, vector<1x128xf32>
    %30 = vector.shape_cast %29 : vector<1x128xf32> to vector<128xf32>
    %31 = vector.shape_cast %30 : vector<128xf32> to vector<1x1x128xf32>
    %32 = vector.broadcast %31 : vector<1x1x128xf32> to vector<18x16x128xf32>
    %33 = arith.mulf %28, %32 : vector<18x16x128xf32>
    %c0_19 = arith.constant 0 : index
    %c0_20 = arith.constant 0 : index
    %34 = vector.load %arg7[%c0_19, %c0_20] : memref<1x128xf32, #tpu.memory_space<vmem>>, vector<1x128xf32>
    %35 = vector.shape_cast %34 : vector<1x128xf32> to vector<128xf32>
    %36 = vector.shape_cast %35 : vector<128xf32> to vector<1x1x128xf32>
    %37 = vector.broadcast %36 : vector<1x1x128xf32> to vector<18x16x128xf32>
    %38 = arith.addf %33, %37 : vector<18x16x128xf32>
    %cst_21 = arith.constant 0.000000e+00 : f32
    %39 = vector.broadcast %cst_21 : f32 to vector<18x16x128xf32>
    %40 = arith.maximumf %38, %39 : vector<18x16x128xf32>
    %41 = arith.truncf %40 : vector<18x16x128xf32> to vector<18x16x128xbf16>
    %c0_22 = arith.constant 0 : index
    %c8 = arith.constant 8 : index
    %c0_23 = arith.constant 0 : index
    %42 = vector.load %arg11[%c0_22, %c8, %c0_23] : memref<18x32x128xbf16, #tpu.memory_space<vmem>>, vector<18x16x128xbf16>
    tpu.vector_store %arg11[%c0_22, %c8, %c0_23], %41 {strides = array<i32>} : memref<18x32x128xbf16, #tpu.memory_space<vmem>>, vector<18x16x128xbf16>,
    %cst_24 = arith.constant 0.000000e+00 : bf16
    %43 = vector.broadcast %cst_24 : bf16 to vector<18x1x128xbf16>
    %c0_25 = arith.constant 0 : index
    %c7 = arith.constant 7 : index
    %c0_26 = arith.constant 0 : index
    %44 = vector.load %arg11[%c0_25, %c7, %c0_26] : memref<18x32x128xbf16, #tpu.memory_space<vmem>>, vector<18x1x128xbf16>
    tpu.vector_store %arg11[%c0_25, %c7, %c0_26], %43 {strides = array<i32>} : memref<18x32x128xbf16, #tpu.memory_space<vmem>>, vector<18x1x128xbf16>,
    %cst_27 = arith.constant 0.000000e+00 : bf16
    %45 = vector.broadcast %cst_27 : bf16 to vector<18x1x128xbf16>
    %c0_28 = arith.constant 0 : index
    %c24 = arith.constant 24 : index
    %c0_29 = arith.constant 0 : index
    %46 = vector.load %arg11[%c0_28, %c24, %c0_29] : memref<18x32x128xbf16, #tpu.memory_space<vmem>>, vector<18x1x128xbf16>
    tpu.vector_store %arg11[%c0_28, %c24, %c0_29], %45 {strides = array<i32>} : memref<18x32x128xbf16, #tpu.memory_space<vmem>>, vector<18x1x128xbf16>,
    %c0_i32 = arith.constant 0 : i32
    %47 = arith.cmpi eq, %arg1, %c0_i32 : i32
    %48 = arith.extui %47 : i1 to i32
    %c0_i32_30 = arith.constant 0 : i32
    %49 = arith.cmpi ne, %48, %c0_i32_30 : i32
    scf.if %49 {
      %cst_63 = arith.constant 0.000000e+00 : bf16
      %95 = vector.broadcast %cst_63 : bf16 to vector<1x32x128xbf16>
      %c0_64 = arith.constant 0 : index
      %c0_65 = arith.constant 0 : index
      %c0_66 = arith.constant 0 : index
      %96 = vector.load %arg11[%c0_64, %c0_65, %c0_66] : memref<18x32x128xbf16, #tpu.memory_space<vmem>>, vector<1x32x128xbf16>
      tpu.vector_store %arg11[%c0_64, %c0_65, %c0_66], %95 {strides = array<i32>} : memref<18x32x128xbf16, #tpu.memory_space<vmem>>, vector<1x32x128xbf16>,
    } else {
    }
    %c0_i32_31 = arith.constant 0 : i32
    %50 = arith.cmpi eq, %arg1, %c0_i32_31 : i32
    %51 = arith.extui %50 : i1 to i32
    %c0_i32_32 = arith.constant 0 : i32
    %52 = arith.cmpi ne, %51, %c0_i32_32 : i32
    scf.if %52 {
      %cst_63 = arith.constant 0.000000e+00 : bf16
      %95 = vector.broadcast %cst_63 : bf16 to vector<1x32x128xbf16>
      %c17 = arith.constant 17 : index
      %c0_64 = arith.constant 0 : index
      %c0_65 = arith.constant 0 : index
      %96 = vector.load %arg11[%c17, %c0_64, %c0_65] : memref<18x32x128xbf16, #tpu.memory_space<vmem>>, vector<1x32x128xbf16>
      tpu.vector_store %arg11[%c17, %c0_64, %c0_65], %95 {strides = array<i32>} : memref<18x32x128xbf16, #tpu.memory_space<vmem>>, vector<1x32x128xbf16>,
    } else {
    }
    %c0_33 = arith.constant 0 : index
    %c7_34 = arith.constant 7 : index
    %c0_35 = arith.constant 0 : index
    %53 = vector.load %arg11[%c0_33, %c7_34, %c0_35] : memref<18x32x128xbf16, #tpu.memory_space<vmem>>, vector<18x16x128xbf16>
    %c0_36 = arith.constant 0 : index
    %c8_37 = arith.constant 8 : index
    %c0_38 = arith.constant 0 : index
    %54 = vector.load %arg11[%c0_36, %c8_37, %c0_38] : memref<18x32x128xbf16, #tpu.memory_space<vmem>>, vector<18x16x128xbf16>
    %c0_39 = arith.constant 0 : index
    %c9 = arith.constant 9 : index
    %c0_40 = arith.constant 0 : index
    %55 = vector.load %arg11[%c0_39, %c9, %c0_40] : memref<18x32x128xbf16, #tpu.memory_space<vmem>>, vector<18x16x128xbf16>
    %56 = tpu.concatenate %53, %54, %55 in 2 : vector<18x16x128xbf16>, vector<18x16x128xbf16>, vector<18x16x128xbf16> -> vector<18x16x384xbf16>
    %cst_41 = arith.constant 0.000000e+00 : f32
    %57 = vector.broadcast %cst_41 : f32 to vector<256x128xf32>
    %58 = vector.extract_strided_slice %56 {offsets = [0, 0, 0], sizes = [16, 16, 384], strides = [1, 1, 1]} : vector<18x16x384xbf16> to vector<16x16x384xbf16>
    %59 = vector.shape_cast %58 : vector<16x16x384xbf16> to vector<256x384xbf16>
    %c0_42 = arith.constant 0 : index
    %c0_43 = arith.constant 0 : index
    %c0_44 = arith.constant 0 : index
    %60 = vector.load %arg5[%c0_42, %c0_43, %c0_44] : memref<3x384x128xbf16, #tpu.memory_space<vmem>>, vector<1x384x128xbf16>
    %61 = vector.shape_cast %60 : vector<1x384x128xbf16> to vector<384x128xbf16>
    %cst_45 = arith.constant dense<0.000000e+00> : vector<256x128xf32>
    %62 = tpu.matmul %59, %61, %cst_45 {dimension_numbers = #tpu.dot_dimension_numbers<[1], [0], [0], [1], [0, 0, 1, 1], [], []>} : vector<256x384xbf16>, vector<384x128xbf16>, vector<256x128xf32> -> vector<256x128xf32>
    %63 = arith.addf %57, %62 : vector<256x128xf32>
    %64 = vector.extract_strided_slice %56 {offsets = [1, 0, 0], sizes = [16, 16, 384], strides = [1, 1, 1]} : vector<18x16x384xbf16> to vector<16x16x384xbf16>
    %65 = vector.shape_cast %64 : vector<16x16x384xbf16> to vector<256x384xbf16>
    %c1_46 = arith.constant 1 : index
    %c0_47 = arith.constant 0 : index
    %c0_48 = arith.constant 0 : index
    %66 = vector.load %arg5[%c1_46, %c0_47, %c0_48] : memref<3x384x128xbf16, #tpu.memory_space<vmem>>, vector<1x384x128xbf16>
    %67 = vector.shape_cast %66 : vector<1x384x128xbf16> to vector<384x128xbf16>
    %cst_49 = arith.constant dense<0.000000e+00> : vector<256x128xf32>
    %68 = tpu.matmul %65, %67, %cst_49 {dimension_numbers = #tpu.dot_dimension_numbers<[1], [0], [0], [1], [0, 0, 1, 1], [], []>} : vector<256x384xbf16>, vector<384x128xbf16>, vector<256x128xf32> -> vector<256x128xf32>
    %69 = arith.addf %63, %68 : vector<256x128xf32>
    %70 = vector.extract_strided_slice %56 {offsets = [2, 0, 0], sizes = [16, 16, 384], strides = [1, 1, 1]} : vector<18x16x384xbf16> to vector<16x16x384xbf16>
    %71 = vector.shape_cast %70 : vector<16x16x384xbf16> to vector<256x384xbf16>
    %c2_50 = arith.constant 2 : index
    %c0_51 = arith.constant 0 : index
    %c0_52 = arith.constant 0 : index
    %72 = vector.load %arg5[%c2_50, %c0_51, %c0_52] : memref<3x384x128xbf16, #tpu.memory_space<vmem>>, vector<1x384x128xbf16>
    %73 = vector.shape_cast %72 : vector<1x384x128xbf16> to vector<384x128xbf16>
    %cst_53 = arith.constant dense<0.000000e+00> : vector<256x128xf32>
    %74 = tpu.matmul %71, %73, %cst_53 {dimension_numbers = #tpu.dot_dimension_numbers<[1], [0], [0], [1], [0, 0, 1, 1], [], []>} : vector<256x384xbf16>, vector<384x128xbf16>, vector<256x128xf32> -> vector<256x128xf32>
    %75 = arith.addf %69, %74 : vector<256x128xf32>
    %76 = vector.shape_cast %75 : vector<256x128xf32> to vector<16x16x128xf32>
    %c0_54 = arith.constant 0 : index
    %c0_55 = arith.constant 0 : index
    %77 = vector.load %arg8[%c0_54, %c0_55] : memref<1x128xf32, #tpu.memory_space<vmem>>, vector<1x128xf32>
    %78 = vector.shape_cast %77 : vector<1x128xf32> to vector<128xf32>
    %79 = vector.shape_cast %78 : vector<128xf32> to vector<1x1x128xf32>
    %80 = vector.broadcast %79 : vector<1x1x128xf32> to vector<16x16x128xf32>
    %81 = arith.mulf %76, %80 : vector<16x16x128xf32>
    %c0_56 = arith.constant 0 : index
    %c0_57 = arith.constant 0 : index
    %82 = vector.load %arg9[%c0_56, %c0_57] : memref<1x128xf32, #tpu.memory_space<vmem>>, vector<1x128xf32>
    %83 = vector.shape_cast %82 : vector<1x128xf32> to vector<128xf32>
    %84 = vector.shape_cast %83 : vector<128xf32> to vector<1x1x128xf32>
    %85 = vector.broadcast %84 : vector<1x1x128xf32> to vector<16x16x128xf32>
    %86 = arith.addf %81, %85 : vector<16x16x128xf32>
    %87 = vector.extract_strided_slice %4 {offsets = [2, 1, 0], sizes = [16, 16, 128], strides = [1, 1, 1]} : vector<20x18x128xbf16> to vector<16x16x128xbf16>
    %88 = arith.extf %87 : vector<16x16x128xbf16> to vector<16x16x128xf32>
    %89 = arith.addf %86, %88 : vector<16x16x128xf32>
    %cst_58 = arith.constant 0.000000e+00 : f32
    %90 = vector.broadcast %cst_58 : f32 to vector<16x16x128xf32>
    %91 = arith.maximumf %89, %90 : vector<16x16x128xf32>
    %c0_59 = arith.constant 0 : index
    %c0_60 = arith.constant 0 : index
    %c0_61 = arith.constant 0 : index
    %c0_62 = arith.constant 0 : index
    %92 = vector.load %arg10[%c0_59, %c0_60, %c0_61, %c0_62] : memref<1x16x16x128xf32, #tpu.memory_space<vmem>>, vector<1x16x16x128xf32>
    %93 = vector.shape_cast %92 : vector<1x16x16x128xf32> to vector<16x16x128xf32>
    %94 = vector.shape_cast %91 : vector<16x16x128xf32> to vector<1x16x16x128xf32>
    tpu.vector_store %arg10[%c0_59, %c0_60, %c0_61, %c0_62], %94 {strides = array<i32>} : memref<1x16x16x128xf32, #tpu.memory_space<vmem>>, vector<1x16x16x128xf32>,
    return
  }
  func.func @transform_0(%arg0: i32, %arg1: i32) -> (i32, i32, i32, i32) {
    %c0_i32 = arith.constant 0 : i32
    %c0_i32_0 = arith.constant 0 : i32
    %c0_i32_1 = arith.constant 0 : i32
    return %arg0, %arg1, %c0_i32, %c0_i32_0 : i32, i32, i32, i32
  }
  func.func @transform_1(%arg0: i32, %arg1: i32) -> (i32, i32, i32, i32) {
    %c1_i32 = arith.constant 1 : i32
    %0 = arith.addi %arg1, %c1_i32 : i32
    %c4_i32 = arith.constant 4 : i32
    %1 = arith.muli %0, %c4_i32 : i32
    %c0_i32 = arith.constant 0 : i32
    %c0_i32_0 = arith.constant 0 : i32
    %c0_i32_1 = arith.constant 0 : i32
    return %arg0, %1, %c0_i32, %c0_i32_0 : i32, i32, i32, i32
  }
  func.func @transform_2(%arg0: i32, %arg1: i32) -> (i32, i32, i32) {
    %c0_i32 = arith.constant 0 : i32
    %c0_i32_0 = arith.constant 0 : i32
    %c0_i32_1 = arith.constant 0 : i32
    %c0_i32_2 = arith.constant 0 : i32
    return %c0_i32, %c0_i32_0, %c0_i32_1 : i32, i32, i32
  }
  func.func @transform_3(%arg0: i32, %arg1: i32) -> (i32, i32, i32) {
    %c0_i32 = arith.constant 0 : i32
    %c0_i32_0 = arith.constant 0 : i32
    %c0_i32_1 = arith.constant 0 : i32
    %c0_i32_2 = arith.constant 0 : i32
    return %c0_i32, %c0_i32_0, %c0_i32_1 : i32, i32, i32
  }
  func.func @transform_4(%arg0: i32, %arg1: i32) -> (i32, i32) {
    %c0_i32 = arith.constant 0 : i32
    %c0_i32_0 = arith.constant 0 : i32
    %c0_i32_1 = arith.constant 0 : i32
    return %c0_i32, %c0_i32_0 : i32, i32
  }
  func.func @transform_5(%arg0: i32, %arg1: i32) -> (i32, i32) {
    %c0_i32 = arith.constant 0 : i32
    %c0_i32_0 = arith.constant 0 : i32
    %c0_i32_1 = arith.constant 0 : i32
    return %c0_i32, %c0_i32_0 : i32, i32
  }
  func.func @transform_6(%arg0: i32, %arg1: i32) -> (i32, i32) {
    %c0_i32 = arith.constant 0 : i32
    %c0_i32_0 = arith.constant 0 : i32
    %c0_i32_1 = arith.constant 0 : i32
    return %c0_i32, %c0_i32_0 : i32, i32
  }
  func.func @transform_7(%arg0: i32, %arg1: i32) -> (i32, i32) {
    %c0_i32 = arith.constant 0 : i32
    %c0_i32_0 = arith.constant 0 : i32
    %c0_i32_1 = arith.constant 0 : i32
    return %c0_i32, %c0_i32_0 : i32, i32
  }
  func.func @transform_8(%arg0: i32, %arg1: i32) -> (i32, i32, i32, i32) {
    %c0_i32 = arith.constant 0 : i32
    %c0_i32_0 = arith.constant 0 : i32
    %c0_i32_1 = arith.constant 0 : i32
    return %arg0, %arg1, %c0_i32, %c0_i32_0 : i32, i32, i32, i32
  }
}

</mosaic_0001>

<bundles_post_ra>
// kernel: basic_block_forward.1
= control target key start
LH: loop header
LB: loop body
LE: loop exit
PB: predicated region body
PF: predicated region fallthrough
CT: control target
= control target key end

     0   :  { %s8138_s27 = smov 0   ;;  %s8140_s28 = smov 0   ;;  %s10951_s0 = inlined_call_operand.vmem [shape: bf16[2,20,18,128], index: 0, kind: input, shape index: {}, may-alias: {0,1}]   ;;  %s10952_s1 = inlined_call_operand.vmem [shape: bf16[2,20,18,128], index: 1, kind: input, shape index: {}, may-alias: {0,1}]   ;;  %s10953_s2 = inlined_call_operand.vmem [shape: bf16[3,384,128], index: 2, kind: input, shape index: {}]   ;;  %s10954_s3 = inlined_call_operand.vmem [shape: bf16[3,384,128], index: 3, kind: input, shape index: {}]   ;;  %s10955_s4 = inlined_call_operand.vmem [shape: f32[1,128], index: 4, kind: input, shape index: {}]   ;;  %s10956_s5 = inlined_call_operand.vmem [shape: f32[1,128], index: 5, kind: input, shape index: {}]   ;;  %s10957_s6 = inlined_call_operand.vmem [shape: f32[1,128], index: 6, kind: input, shape index: {}]   ;;  %s10958_s7 = inlined_call_operand.vmem [shape: f32[1,128], index: 7, kind: input, shape index: {}]   ;;  %s10959_s8 = inlined_call_operand.vmem [shape: f32[2,16,16,128], index: 8, kind: output, shape index: {}]  }
   0x1   :  { %s8142_s29 = smov 0  }
   0x2 LB: > { %s30_s30 = sadd.s32 1, %s8086_s28  ;;  %p6434_p0 = scmp.ge.s32.totalorder %s8090_s29, 1  ;;  %s8090_s29 = sphi %s8142_s29, %s18_s29   ;;  %s8086_s28 = sphi %s8140_s28, %s11159_s28   ;;  %s8082_s27 = sphi %s8138_s27, %s11158_s27  }
   0x3   : > { %p32_p1 = scmp.ge.s32.totalorder %s30_s30, 2  ;;  %p320_p2 = scmp.lt.s32.totalorder %s8090_s29, 3 }
   0x5   : > { %s11161_s30 = smov (%p32_p1, %s30_s30), 0  ;;  %p321_p3 = pnand %p6434_p0, %p320_p2 }
   0x7   : > { %324 = sbr.rel (%p321_p3) target bundleno = 1231 (0x4cf), region = 52 }
   0xe   : > { %v7830_v0 = vld [vmem:[%s10953_s2 + $0xc0] sm:$0xff]   ;;  %v10960_v1 = vmov 0   ;;  %p387_p4 = scmp.lt.s32.totalorder %s8082_s27, 1  ;;  %v7831_v2 = vld [vmem:[%s10953_s2 + $0xc8] sm:$0xff]   ;;  %v7832_v5 = vld [vmem:[%s10953_s2 + $0xd0] sm:$0xff]   ;;  %vm930_vm0 = vcmask 1046528  }
   0xf   : > { %1252 = vmatprep.subr.bf16.mxu0 %v10960_v1  ;;  %v7833_v3 = vld [vmem:[%s10953_s2 + $0x140] sm:$0xff]   ;;  %v7835_v4 = vld [vmem:[%s10953_s2 + $0x148] sm:$0xff]   ;;  %v7837_v6 = vld [vmem:[%s10953_s2 + $0x150] sm:$0xff]   ;;  %vm669_vm1 = vsmask.f32 7424  ;;  %vm2917_vm2 = vcmask 1043459  }
  0x10   : > { %1253 = vmatpush1.bf16.msra.mxu0 %v7830_v0  ;;  %s11163_s27 = smov (!%p387_p4, %s8082_s27), 1  ;;  %7310 = vmatprep.subr.bf16.mxu1 %v7833_v3  ;;  %v7834_v7 = vld [vmem:[%s10953_s2 + $0xd8] sm:$0xff]   ;;  %v7836_v9 = vld [vmem:[%s10953_s2 + $0xe0] sm:$0xff]   ;;  %v7838_v11 = vld [vmem:[%s10953_s2 + $0xe8] sm:$0xff]   ;;  %vm2918_vm3 = vsmask.f32 7950 }
  0x11   : > { %1254 = vmatprep.subr.bf16.mxu0 %v10960_v1  ;;  %7311 = vmatpush3.bf16.msra.mxu1 %v7833_v3  ;;  %v7839_v8 = vld [vmem:[%s10953_s2 + $0x158] sm:$0xff]   ;;  %s7802_s25 = smul.u32 240, %s11163_s27  ;;  %v7841_v10 = vld [vmem:[%s10953_s2 + $0x160] sm:$0xff]   ;;  %v7843_v12 = vld [vmem:[%s10953_s2 + $0x168] sm:$0xff]   ;;  %vm2974_vm4 = vcmask 1044484   ;;  %s6823_s11 = sshll.u32 %s11163_s27, 8 }
  0x12   : > { %7312 = vmatprep.subr.bf16.mxu1 %v7835_v4  ;;  %v7840_v13 = vld [vmem:[%s10953_s2 + $0xf0] sm:$0xff]   ;;  %v7842_v25 = vld [vmem:[%s10953_s2 + $0xf8] sm:$0xff]   ;;  %v7844_v28 = vld [vmem:[%s10953_s2 + $0x100] sm:$0xff]   ;;  %vm2975_vm5 = vsmask.f32 4352  ;;  %s10766_s13 = scalar_lea.vmem %s10959_s8, %s6823_s11 }
  0x13   : > { %s8202_s16 = scalar_lea.vmem %s10951_s0, %s7802_s25  ;;  %v7845_v16 = vld [vmem:[%s10953_s2 + $0x170] sm:$0xff]   ;;  %v7847_v27 = vld [vmem:[%s10953_s2 + $0x178] sm:$0xff]   ;;  %v7846_v40 = vld [vmem:[%s10953_s2 + $0x108] sm:$0xff]   ;;  %s6822_s19 = sadd.s32 192, %s7802_s25 }
  0x14   : > { %1255 = vmatpush1.bf16.msra.mxu0 %v7831_v2  ;;  %v8212_v14 = vld [vmem:[%s8202_s16 + $0xc] sm:$0xff]   ;;  %v7850_v15 = vld [vmem:[%s8202_s16 + $0x14] ss:$0 sps:$4 sm:$0x11]   ;;  %v8219_v17 = vld [vmem:[%s8202_s16 + $0x18] sm:$0xff]   ;;  %s8408_s23 = scalar_lea.vmem %s10952_s1, %s6822_s19 }
  0x15   : > { %1256 = vmatprep.subr.bf16.mxu0 %v10960_v1  ;;  %7313 = vmatpush3.bf16.msra.mxu1 %v7835_v4  ;;  %v934_v18 = vrot.slane %v8212_v14, 1  ;;  %v935_v19 = vrot.slane %v7850_v15, 1  ;;  %v437_v20 = vld [vmem:[%s8202_s16 + $0x20] sm:$0x1]  ;;  %v8225_v21 = vld [vmem:[%s8202_s16 + $0x24] sm:$0xff]   ;;  %v937_v29 = vrot.slane %v8219_v17, 1  ;;  %vm9248_vm6 = vmand %vm2974_vm4, %vm2975_vm5 }
  0x16   : > { %7314 = vmatprep.subr.bf16.mxu1 %v7837_v6  ;;  %11021 = vst [vmem:[#allocation3_spill] sm:$0xff] %v8225_v21  ;;  %v440_v22 = vld [vmem:[%s8202_s16 + $0x2c] sm:$0x1]  ;;  %v8232_v24 = vcombine.low %v437_v20, %v437_v20  ;;  %v8249_v31 = vld [vmem:[%s8202_s16 + $0x30] sm:$0xff]   ;;  %v940_v32 = vrot.slane %v8225_v21, 1  ;;  %v683_v35 = vshrl.u32 %v8212_v14, 16  ;;  %vm9255_vm7 = vmand %vm2917_vm2, %vm2918_vm3 }
  0x17   : > { %v8229_v23 = vsel %vm930_vm0, %v934_v18, %v935_v19  ;;  %v8237_v26 = vcombine.low %v440_v22, %v440_v22  ;;  %v443_v34 = vld [vmem:[%s8202_s16 + $0x38] sm:$0x1]  ;;  %v685_v36 = vshll.u32 %v8212_v14, 16  ;;  %v8258_v37 = vld [vmem:[%s8202_s16 + $0x3c] sm:$0xff]   ;;  %v446_v38 = vld [vmem:[%s8202_s16 + $0x44] sm:$0x1] }
  0x18   : > { %1257 = vmatpush1.bf16.msra.mxu0 %v7832_v5  ;;  %11022 = vst [vmem:[#allocation4_spill] sm:$0xff] %v8229_v23  ;;  %7326 = vmatprep.mubr.bf16.mxu1 %v8229_v23  ;;  %v938_v30 = vrot.slane %v8232_v24, 1  ;;  %v8270_v43 = vcombine.low %v443_v34, %v443_v34  ;;  %v690_v44 = vshll.u32 %v7850_v15, 16  ;;  %v8277_v45 = vld [vmem:[%s10953_s2] sm:$0xff]   ;;  %v8279_v46 = vcombine.low %v446_v38, %v446_v38  ;;  %v7848_v49 = vld [vmem:[%s10953_s2 + $0x110] sm:$0xff]   ;;  %v8291_v52 = vld [vmem:[%s10953_s2 + $0x8] sm:$0xff]  }
  0x19   : > { %1258 = vmatprep.subr.bf16.mxu0 %v10960_v1  ;;  %7315 = vmatpush3.bf16.msra.mxu1 %v7837_v6  ;;  %v941_v33 = vrot.slane %v8237_v26, 1  ;;  %v687_v39 = vrot.slane %v685_v36, 1  ;;  %v943_v50 = vrot.slane %v8249_v31, 1  ;;  %v946_v54 = vrot.slane %v8258_v37, 1  ;;  %v8301_v56 = vld [vmem:[%s8202_s16 + $0x48] sm:$0xff]   ;;  %v8305_v58 = vld [vmem:[%s8202_s16 + $0x54] sm:$0xff]  }
  0x1a   : > { %7316 = vmatprep.subr.bf16.mxu1 %v7839_v8  ;;  %v8265_v41 = vsel %vm930_vm0, %v937_v29, %v938_v30  ;;  %v692_v48 = vrot.slane %v690_v44, 1  ;;  %v944_v51 = vrot.slane %v8270_v43, 1  ;;  %v947_v55 = vrot.slane %v8279_v46, 1  ;;  %v449_v57 = vld [vmem:[%s8202_s16 + $0x50] sm:$0x1]  ;;  %v7853_v60 = vld [vmem:[%s10953_s2 + $0x118] sm:$0xff]  }
  0x1b   : > { %11023 = vst [vmem:[#allocation5_spill] sm:$0xff] %v8265_v41  ;;  %v8268_v42 = vsel %vm930_vm0, %v940_v32, %v941_v33  ;;  %v688_v47 = vor.u32 %v687_v39, %v683_v35  ;;  %v452_v59 = vld [vmem:[%s8202_s16 + $0x5c] sm:$0x1]  ;;  %v8316_v62 = vcombine.low %v449_v57, %v449_v57  ;;  %v8326_v0 = vld [vmem:[%s10953_s2 + $0x10] sm:$0xff]   ;;  %v7854_v3 = vld [vmem:[%s10953_s2 + $0x120] sm:$0xff]   ;;  %v949_v4 = vrot.slane %v8301_v56, 1 }
  0x1c   : > { %1259 = vmatpush1.bf16.msra.mxu0 %v7834_v7  ;;  %11024 = vst [vmem:[#allocation6_spill] sm:$0xff] %v8268_v42  ;;  %v8314_v61 = vsel %vm930_vm0, %v943_v50, %v944_v51  ;;  %v8321_v63 = vsel %vm930_vm0, %v946_v54, %v947_v55  ;;  %v8328_v2 = vcombine.low %v452_v59, %v452_v59  ;;  %v8339_v6 = vld [vmem:[%s8202_s16 + $0x60] sm:$0xff]   ;;  %v8346_v7 = vld [vmem:[%s10953_s2 + $0x18] sm:$0xff]   ;;  %v7860_v15 = vld [vmem:[%s10953_s2 + $0x128] sm:$0xff]   ;;  %v702_v33 = vshll.u32 %v8232_v24, 16 }
  0x1d   : > { %1260 = vmatprep.subr.bf16.mxu0 %v10960_v1  ;;  %7317 = vmatpush3.bf16.msra.mxu1 %v7839_v8  ;;  %v8294_v53 = vsel %vm669_vm1, %v688_v47, %v692_v48  ;;  %11025 = vst [vmem:[#allocation7_spill] sm:$0xff] %v8314_v61  ;;  %11026 = vst [vmem:[#allocation8_spill] sm:$0xff] %v8321_v63  ;;  %v950_v5 = vrot.slane %v8316_v62, 1  ;;  %v952_v8 = vrot.slane %v8305_v58, 1  ;;  %v8373_v20 = vld [vmem:[%s10953_s2 + $0x20] sm:$0xff]   ;;  %v8389_v30 = vld [vmem:[%s10953_s2 + $0x28] sm:$0xff]  }
  0x1e   : > { %7318 = vmatprep.subr.bf16.mxu1 %v7841_v10  ;;  %1284 = vmatprep.mubr.bf16.mxu0 %v8294_v53  ;;  %v461_v34 = vld [vmem:[%s8202_s16 + $0x80] sm:$0x1]  ;;  %v8400_v38 = vld [vmem:[%s8202_s16 + $0x78] sm:$0xff]   ;;  %v8403_v39 = vld [vmem:[%s8202_s16 + $0x84] sm:$0xff]   ;;  %v704_v48 = vrot.slane %v702_v33, 1  ;;  %v709_v54 = vshll.u32 %v8225_v21, 16 }
  0x1f   : > { %v464_v24 = vld [vmem:[%s8202_s16 + $0x8c] sm:$0x1]  ;;  %v7868_v44 = vld [vmem:[%s10953_s2 + $0x138] sm:$0xff]   ;;  %v8428_v51 = vld [vmem:[%s10953_s2 + $0x30] sm:$0xff]  }
  0x20   : > { %1261 = vmatpush1.bf16.msra.mxu0 %v7836_v9  ;;  %v953_v9 = vrot.slane %v8328_v2, 1  ;;  %v8431_v55 = vcombine.low %v464_v24, %v464_v24  ;;  %v8435_v57 = vld [vmem:[%s8202_s16 + $0x90] sm:$0xff]   ;;  %v467_v59 = vld [vmem:[%s8202_s16 + $0x98] sm:$0x1] }
  0x21   : > { %1262 = vmatprep.subr.bf16.mxu0 %v10960_v1  ;;  %7319 = vmatpush3.bf16.msra.mxu1 %v7841_v10  ;;  %v455_v10 = vld [vmem:[%s8202_s16 + $0x68] sm:$0x1]  ;;  %v473_v24 = vld [vmem:[%s8202_s16 + $0xb0] sm:$0x1] }
  0x22   : > { %7320 = vmatprep.subr.bf16.mxu1 %v7843_v12  ;;  %v8363_v18 = vcombine.low %v455_v10, %v455_v10  ;;  %v8368_v19 = vsel %vm930_vm0, %v952_v8, %v953_v9  ;;  %v8449_v8 = vld [vmem:[%s10953_s2 + $0x38] sm:$0xff]   ;;  %v707_v9 = vshrl.u32 %v8225_v21, 16  ;;  %v711_v10 = vrot.slane %v709_v54, 1 }
  0x23   : > { %11028 = vst [vmem:[#allocation10_spill] sm:$0xff] %v8368_v19 }
  0x24   : > { %1263 = vmatpush1.bf16.msra.mxu0 %v7838_v11  ;;  %v8353_v11 = vld [vmem:[%s8202_s16 + $0x6c] sm:$0xff]   ;;  %v956_v32 = vrot.slane %v8363_v18, 1 }
  0x25   : > { %1264 = vmatprep.subr.bf16.mxu0 %v10960_v1  ;;  %7321 = vmatpush3.bf16.msra.mxu1 %v7843_v12  ;;  %v458_v12 = vld [vmem:[%s8202_s16 + $0x74] sm:$0x1]  ;;  %v958_v35 = vrot.slane %v8353_v11, 1 }
  0x26   : > { %7322 = vmatprep.subr.bf16.mxu1 %v7845_v16  ;;  %v8375_v22 = vcombine.low %v458_v12, %v458_v12  ;;  %v964_v12 = vrot.slane %v8403_v39, 1 }
  0x28   : > { %1265 = vmatpush1.bf16.msra.mxu0 %v7840_v13  ;;  %v697_v13 = vshll.u32 %v8219_v17, 16  ;;  %v959_v36 = vrot.slane %v8375_v22, 1 }
  0x29   : > { %1266 = vmatprep.subr.bf16.mxu0 %v10960_v1  ;;  %7323 = vmatpush3.bf16.msra.mxu1 %v7845_v16  ;;  %v8361_v16 = vsel %vm930_vm0, %v949_v4, %v950_v5  ;;  %v714_v5 = vshll.u32 %v8237_v26, 16  ;;  %v8457_v26 = vcombine.low %v467_v59, %v467_v59  ;;  %v726_v59 = vshll.u32 %v8270_v43, 16 }
  0x2a   : > { %7324 = vmatprep.subr.bf16.mxu1 %v7847_v27  ;;  %11027 = vst [vmem:[#allocation9_spill] sm:$0xff] %v8361_v16  ;;  %v699_v29 = vrot.slane %v697_v13, 1  ;;  %v8423_v50 = vsel %vm930_vm0, %v958_v35, %v959_v36  ;;  %v965_v13 = vrot.slane %v8431_v55, 1  ;;  %v967_v35 = vrot.slane %v8435_v57, 1 }
  0x2b   : > { %11030 = vst [vmem:[#allocation12_spill] sm:$0xff] %v8423_v50  ;;  %v968_v36 = vrot.slane %v8457_v26, 1  ;;  %v733_v43 = vshll.u32 %v8258_v37, 16 }
  0x2c   : > { %1267 = vmatpush1.bf16.msra.mxu0 %v7842_v25  ;;  %v7862_v25 = vld [vmem:[%s10953_s2 + $0x130] sm:$0xff]  }
  0x2d   : > { %1268 = vmatprep.subr.bf16.mxu0 %v10960_v1  ;;  %7325 = vmatpush3.bf16.msra.mxu1 %v7847_v27  ;;  %v955_v27 = vrot.slane %v8339_v6, 1 }
  0x2e   : > { %7610 = vmatprep.subr.bf16.mxu1 %v10960_v1 }
  0x2f   : > { %v8416_v47 = vsel %vm930_vm0, %v955_v27, %v956_v32  ;;  %v712_v32 = vor.u32 %v711_v10, %v707_v9  ;;  %v8510_v9 = vcombine.low %v473_v24, %v473_v24  ;;  %v479_v24 = vld [vmem:[%s8408_s23 + $0x8] sm:$0x1] }
  0x30   : > { %1269 = vmatpush1.bf16.msra.mxu0 %v7844_v28  ;;  %7327 = vmatmul.mubr.bf16.vlgmr.msra.gmra.mrb[0].mxu1 %v8265_v41  ;;  %v695_v28 = vshrl.u32 %v8219_v17, 16  ;;  %11029 = vst [vmem:[#allocation11_spill] sm:$0xff] %v8416_v47  ;;  %v781_v41 = vshll.u32 %v8353_v11, 16 }
  0x31   : > { %1270 = vmatprep.subr.bf16.mxu0 %v10960_v1  ;;  %7330 = vmatprep.mubr.bf16.mxu1 %v8268_v42 }
  0x32   : > { %7626 = vmatpush1.bf16.msra.mxu1 %v8277_v45 }
  0x33   : > { %7611 = vmatprep.subr.bf16.mxu1 %v10960_v1 }
  0x34   : > { %1271 = vmatpush1.bf16.msra.mxu0 %v7846_v40  ;;  %v700_v40 = vor.u32 %v699_v29, %v695_v28  ;;  %v716_v28 = vrot.slane %v714_v5, 1  ;;  %v721_v29 = vshll.u32 %v8249_v31, 16 }
  0x35   : > { %1272 = vmatprep.subr.bf16.mxu0 %v10960_v1 }
  0x36   : > { %7627 = vmatpush1.bf16.msra.mxu1 %v8291_v52  ;;  %v723_v54 = vrot.slane %v721_v29, 1  ;;  %v728_v29 = vrot.slane %v726_v59, 1 }
  0x37   : > { %7612 = vmatprep.subr.bf16.mxu1 %v10960_v1 }
  0x38   : > { %1273 = vmatpush1.bf16.msra.mxu0 %v7848_v49  ;;  %7331 = vmatmul.mubr.bf16.gmra.mrb[4].mxu1 %v8314_v61  ;;  %v8418_v49 = vcombine.low %v461_v34, %v461_v34  ;;  %v8483_v34 = vld [vmem:[%s8202_s16 + $0xa8] sm:$0xff]   ;;  %v774_v61 = vshll.u32 %v8363_v18, 16 }
  0x39   : > { %1274 = vmatprep.subr.bf16.mxu0 %v10960_v1  ;;  %7334 = vmatprep.mubr.bf16.mxu1 %v8321_v63  ;;  %v769_v63 = vshll.u32 %v8339_v6, 16 }
  0x3a   : > { %7628 = vmatpush1.bf16.msra.mxu1 %v8326_v0  ;;  %v962_v4 = vrot.slane %v8418_v49, 1 }
  0x3b   : > { %7613 = vmatprep.subr.bf16.mxu1 %v10960_v1 }
  0x3c   : > { %1275 = vmatpush1.bf16.msra.mxu0 %v7853_v60  ;;  %v8440_v60 = vsel %vm669_vm1, %v700_v40, %v704_v48  ;;  %v719_v40 = vshrl.u32 %v8249_v31, 16  ;;  %v476_v48 = vld [vmem:[%s8202_s16 + $0xbc] sm:$0x1] }
  0x3d   : > { %1276 = vmatprep.subr.bf16.mxu0 %v10960_v1  ;;  %v8514_v10 = vcombine.low %v476_v48, %v476_v48 }
  0x3e   : > { %7629 = vmatpush1.bf16.msra.mxu1 %v8346_v7 }
  0x3f   : > { %7614 = vmatprep.subr.bf16.mxu1 %v10960_v1  ;;  %v977_v59 = vrot.slane %v8514_v10, 1 }
  0x40   : > { %1277 = vmatpush1.bf16.msra.mxu0 %v7854_v3  ;;  %7335 = vmatmul.mubr.bf16.gmra.mrb[8].mxu1 %v8361_v16  ;;  %v961_v3 = vrot.slane %v8400_v38, 1  ;;  %v757_v16 = vshll.u32 %v8305_v58, 16 }
  0x41   : > { %1278 = vmatprep.subr.bf16.mxu0 %v10960_v1  ;;  %7338 = vmatprep.mubr.bf16.mxu1 %v8368_v19 }
  0x42   : > { %7630 = vmatpush1.bf16.msra.mxu1 %v8373_v20  ;;  %v8467_v27 = vsel %vm930_vm0, %v961_v3, %v962_v4  ;;  %v8499_v3 = vsel %vm669_vm1, %v712_v32, %v716_v28  ;;  %v8506_v4 = vld [vmem:[%s10953_s2 + $0x48] sm:$0xff]   ;;  %v724_v28 = vor.u32 %v723_v54, %v719_v40  ;;  %v973_v32 = vrot.slane %v8483_v34, 1 }
  0x43   : > { %7615 = vmatprep.subr.bf16.mxu1 %v10960_v1  ;;  %11031 = vst [vmem:[#allocation13_spill] sm:$0xff] %v8467_v27  ;;  %v735_v40 = vrot.slane %v733_v43, 1  ;;  %v8558_v43 = vld [vmem:[%s8408_s23 + $0x20] ss:$0 sps:$4 sm:$0x11]   ;;  %v759_v42 = vrot.slane %v757_v16, 1 }
  0x44   : > { %1279 = vmatpush1.bf16.msra.mxu0 %v7860_v15  ;;  %v8460_v15 = vld [vmem:[%s8202_s16 + $0x9c] sm:$0xff]   ;;  %v8623_v16 = vld [vmem:[%s10953_s2 + $0x70] sm:$0xff]  }
  0x45   : > { %1280 = vmatprep.subr.bf16.mxu0 %v10960_v1 }
  0x46   : > { %7631 = vmatpush1.bf16.msra.mxu1 %v8389_v30 }
  0x47   : > { %7616 = vmatprep.subr.bf16.mxu1 %v10960_v1 }
  0x48   : > { %1281 = vmatpush1.bf16.msra.mxu0 %v7862_v25  ;;  %7339 = vmatmul.mubr.bf16.gmra.mrb[12].mxu1 %v8416_v47  ;;  %v470_v25 = vld [vmem:[%s8202_s16 + $0xa4] sm:$0x1]  ;;  %v8561_v47 = vsel %vm669_vm1, %v724_v28, %v728_v29 }
  0x49   : > { %1282 = vmatprep.subr.bf16.mxu0 %v10960_v1  ;;  %7342 = vmatprep.mubr.bf16.mxu1 %v8423_v50  ;;  %v8480_v33 = vcombine.low %v470_v25, %v470_v25  ;;  %v8527_v25 = vsel %vm930_vm0, %v967_v35, %v968_v36  ;;  %v731_v35 = vshrl.u32 %v8258_v37, 16  ;;  %v8541_v36 = vld [vmem:[%s8408_s23 + $0xc] sm:$0xff]   ;;  %v8552_v50 = vld [vmem:[%s8408_s23 + $0x18] sm:$0xff]   ;;  %11036 = vst [vmem:[#allocation17_spill] sm:$0xff] %v8561_v47 }
  0x4a   : > { %7632 = vmatpush1.bf16.msra.mxu1 %v8428_v51  ;;  %11033 = vst [vmem:[#allocation15_spill] sm:$0xff] %v8527_v25 }
  0x4b   : > { %7617 = vmatprep.subr.bf16.mxu1 %v10960_v1  ;;  %v971_v5 = vrot.slane %v8480_v33, 1 }
  0x4c   : > { %1283 = vmatpush1.bf16.msra.mxu0 %v7868_v44  ;;  %v8492_v44 = vld [vmem:[%s8202_s16 + $0xb4] sm:$0xff]  }
  0x4d   : > { %1750 = vmatprep.subr.bf16.mxu0 %v10960_v1  ;;  %v976_v54 = vrot.slane %v8492_v44, 1 }
  0x4e   : > { %7633 = vmatpush1.bf16.msra.mxu1 %v8449_v8 }
  0x4f   : > { %1285 = vmatmul.mubr.bf16.vlgmr.msra.gmra.mrb[0].mxu0 %v8212_v14  ;;  %v8473_v14 = vsel %vm930_vm0, %v964_v12, %v965_v13  ;;  %7618 = vmatprep.subr.bf16.mxu1 %v10960_v1  ;;  %v8520_v12 = vld [vmem:[%s10953_s2 + $0x50] sm:$0xff]   ;;  %v8523_v13 = vld [vmem:[%s8408_s23] sm:$0xff]   ;;  %v8577_v28 = vsel %vm930_vm0, %v976_v54, %v977_v59  ;;  %v985_v54 = vrot.slane %v8552_v50, 1  ;;  %v762_v59 = vshll.u32 %v8328_v2, 16  ;;  %v8607_v2 = vld [vmem:[%s10953_s2 + $0x68] sm:$0xff]  }
  0x50   : > { %1751 = vmatpush1.bf16.msra.mxu0 %v8277_v45  ;;  %1292 = vmatprep.mubr.bf16.mxu0 %v8440_v60  ;;  %11032 = vst [vmem:[#allocation14_spill] sm:$0xff] %v8473_v14  ;;  %v8478_v45 = vld [vmem:[%s10953_s2 + $0x40] sm:$0xff]  }
  0x51   : > { %1752 = vmatprep.subr.bf16.mxu0 %v10960_v1  ;;  %7343 = vmatmul.mubr.bf16.gmra.mrb[16].mxu1 %v8467_v27  ;;  %v745_v27 = vshll.u32 %v8301_v56, 16  ;;  %v764_v18 = vrot.slane %v762_v59, 1  ;;  %v793_v59 = vshll.u32 %v8400_v38, 16 }
  0x52   : > { %7346 = vmatprep.mubr.bf16.mxu1 %v8473_v14  ;;  %7634 = vmatpush1.bf16.msra.mxu1 %v8478_v45  ;;  %v11035_v14 = vmov 0  }
  0x53   : > { %7619 = vmatprep.subr.bf16.mxu1 %v10960_v1 }
  0x54   : > { %1753 = vmatpush1.bf16.msra.mxu0 %v8291_v52  ;;  %v970_v52 = vrot.slane %v8460_v15, 1 }
  0x55   : > { %1754 = vmatprep.subr.bf16.mxu0 %v10960_v1  ;;  %v974_v1 = vrot.slane %v8510_v9, 1 }
  0x56   : > { %7635 = vmatpush1.bf16.msra.mxu1 %v8506_v4  ;;  %v8534_v48 = vsel %vm930_vm0, %v970_v52, %v971_v5  ;;  %v482_v52 = vld [vmem:[%s8408_s23 + $0x14] sm:$0x1]  ;;  %v8548_v5 = vcombine.low %v479_v24, %v479_v24  ;;  %v8570_v24 = vld [vmem:[%s10953_s2 + $0x58] sm:$0xff]  }
  0x57   : > { %1293 = vmatmul.mubr.bf16.gmra.mrb[4].mxu0 %v8219_v17  ;;  %11034 = vst [vmem:[#allocation16_spill] sm:$0xff] %v8534_v48  ;;  %7620 = vmatprep.subr.bf16.mxu1 %v11035_v14  ;;  %v8564_v19 = vsel %vm930_vm0, %v973_v32, %v974_v1  ;;  %v979_v1 = vrot.slane %v8523_v13, 1  ;;  %v743_v32 = vshrl.u32 %v8301_v56, 16 }
  0x58   : > { %1300 = vmatprep.mubr.bf16.mxu0 %v8499_v3  ;;  %1755 = vmatpush1.bf16.msra.mxu0 %v8326_v0  ;;  %v738_v0 = vshll.u32 %v8279_v46, 16  ;;  %v750_v46 = vshll.u32 %v8316_v62, 16  ;;  %11037 = vst [vmem:[#allocation18_spill] sm:$0xff] %v8564_v19  ;;  %v736_v62 = vor.u32 %v735_v40, %v731_v35  ;;  %v980_v29 = vrot.slane %v8548_v5, 1  ;;  %v8588_v35 = vld [vmem:[%s10953_s2 + $0x60] sm:$0xff]  }
  0x59   : > { %1756 = vmatprep.subr.bf16.mxu0 %v11035_v14  ;;  %7347 = vmatmul.mubr.bf16.gmra.mrb[20].mxu1 %v8527_v25  ;;  %v747_v25 = vrot.slane %v745_v27, 1  ;;  %v982_v40 = vrot.slane %v8541_v36, 1 }
  0x5a   : > { %7350 = vmatprep.mubr.bf16.mxu1 %v8534_v48  ;;  %7636 = vmatpush1.bf16.msra.mxu1 %v8520_v12  ;;  %v740_v48 = vrot.slane %v738_v0, 1  ;;  %v752_v0 = vrot.slane %v750_v46, 1  ;;  %v767_v46 = vshrl.u32 %v8339_v6, 16 }
  0x5b   : > { %7621 = vmatprep.subr.bf16.mxu1 %v11035_v14 }
  0x5c   : > { %1757 = vmatpush1.bf16.msra.mxu0 %v8346_v7  ;;  %v8573_v7 = vcombine.low %v482_v52, %v482_v52  ;;  %v986_v52 = vrot.slane %v8558_v43, 1 }
  0x5d   : > { %1758 = vmatprep.subr.bf16.mxu0 %v11035_v14 }
  0x5e   : > { %7637 = vmatpush1.bf16.msra.mxu1 %v8570_v24  ;;  %v983_v27 = vrot.slane %v8573_v7, 1 }
  0x5f   : > { %1301 = vmatmul.mubr.bf16.gmra.mrb[8].mxu0 %v8225_v21  ;;  %7622 = vmatprep.subr.bf16.mxu1 %v11035_v14  ;;  %v776_v21 = vrot.slane %v774_v61, 1  ;;  %v8632_v61 = vsel %vm930_vm0, %v979_v1, %v980_v29  ;;  %v803_v1 = vshrl.u32 %v8403_v39, 16  ;;  %v805_v29 = vshll.u32 %v8403_v39, 16 }
  0x60   : > { %1308 = vmatprep.mubr.bf16.mxu0 %v8561_v47  ;;  %1759 = vmatpush1.bf16.msra.mxu0 %v8373_v20  ;;  %v755_v20 = vshrl.u32 %v8305_v58, 16  ;;  %v8614_v47 = vsel %vm669_vm1, %v736_v62, %v740_v48  ;;  %v786_v48 = vshll.u32 %v8375_v22, 16  ;;  %v791_v62 = vshrl.u32 %v8400_v38, 16 }
  0x61   : > { %1760 = vmatprep.subr.bf16.mxu0 %v11035_v14  ;;  %7351 = vmatmul.mubr.bf16.gmra.mrb[24].mxu1 %v8564_v19  ;;  %v771_v19 = vrot.slane %v769_v63, 1  ;;  %v748_v63 = vor.u32 %v747_v25, %v743_v32  ;;  %v8637_v23 = vsel %vm930_vm0, %v982_v40, %v983_v27  ;;  %v798_v25 = vshll.u32 %v8418_v49, 16  ;;  %v7907_v27 = vld [vmem:[%s10953_s2 + $0x188] sm:$0xff]  }
  0x62   : > { %7354 = vmatprep.mubr.bf16.mxu1 %v8577_v28  ;;  %7638 = vmatpush1.bf16.msra.mxu1 %v8588_v35  ;;  %v760_v32 = vor.u32 %v759_v42, %v755_v20  ;;  %v795_v42 = vrot.slane %v793_v59, 1  ;;  %v810_v40 = vshll.u32 %v8431_v55, 16  ;;  %v822_v20 = vshll.u32 %v8457_v26, 16  ;;  %v7909_v26 = vld [vmem:[%s10953_s2 + $0x198] sm:$0xff]  }
  0x63   : > { %7623 = vmatprep.subr.bf16.mxu1 %v11035_v14  ;;  %v8650_v22 = vsel %vm669_vm1, %v748_v63, %v752_v0  ;;  %v8675_v0 = vrot.slane %v805_v29, 1  ;;  %v839_v29 = vshrl.u32 %v8483_v34, 16 }
  0x64   : > { %1761 = vmatpush1.bf16.msra.mxu0 %v8389_v30  ;;  %v8625_v30 = vrot.slane %v781_v41, 1  ;;  %v8645_v41 = vld [vmem:[%s10953_s2 + $0x78] sm:$0xff]   ;;  %v8671_v49 = vsel %vm669_vm1, %v760_v32, %v764_v18  ;;  %v11038_v18 = vshrl.u32 %v8353_v11, 16  ;;  %v824_v59 = vrot.slane %v822_v20, 1 }
  0x65   : > { %1762 = vmatprep.subr.bf16.mxu0 %v11035_v14  ;;  %v796_v32 = vor.u32 %v795_v42, %v791_v62  ;;  %v841_v42 = vshll.u32 %v8483_v34, 16  ;;  %v7924_v20 = vld [vmem:[%s10953_s2 + $0x1d8] sm:$0xff]  }
  0x66   : > { %7639 = vmatpush1.bf16.msra.mxu1 %v8607_v2 }
  0x67   : > { %1309 = vmatmul.mubr.bf16.gmra.mrb[12].mxu0 %v8249_v31  ;;  %7624 = vmatprep.subr.bf16.mxu1 %v11035_v14 }
  0x68   : > { %1316 = vmatprep.mubr.bf16.mxu0 %v8614_v47  ;;  %1763 = vmatpush1.bf16.msra.mxu0 %v8428_v51  ;;  %v788_v51 = vrot.slane %v786_v48, 1  ;;  %v784_v48 = vor.u32 %v8625_v30, %v11038_v18  ;;  %v853_v18 = vshll.u32 %v8492_v44, 16 }
  0x69   : > { %1764 = vmatprep.subr.bf16.mxu0 %v11035_v14  ;;  %7355 = vmatmul.mubr.bf16.gmra.mrb[28].mxu1 %v8632_v61 }
  0x6a   : > { %7358 = vmatprep.mubr.bf16.mxu1 %v8637_v23  ;;  %7640 = vmatpush1.bf16.msra.mxu1 %v8623_v16 }
  0x6b   : > { %7625 = vmatprep.subr.bf16.mxu1 %v11035_v14 }
  0x6c   : > { %1765 = vmatpush1.bf16.msra.mxu0 %v8449_v8  ;;  %v8661_v8 = vsel %vm930_vm0, %v985_v54, %v986_v52  ;;  %v7906_v54 = vld [vmem:[%s10953_s2 + $0x180] sm:$0xff]   ;;  %v812_v52 = vrot.slane %v810_v40, 1  ;;  %v7912_v40 = vld [vmem:[%s10953_s2 + $0x1b0] sm:$0xff]  }
  0x6d   : > { %1766 = vmatprep.subr.bf16.mxu0 %v11035_v14 }
  0x6e   : > { %7641 = vmatpush1.bf16.msra.mxu1 %v8645_v41 }
  0x6f   : > { %1317 = vmatmul.mubr.bf16.gmra.mrb[16].mxu0 %v8258_v37  ;;  %2297 = vmatprep.subr.bf16.mxu1 %v11035_v14 }
  0x70   : > { %1324 = vmatprep.mubr.bf16.mxu0 %v8650_v22  ;;  %1767 = vmatpush1.bf16.msra.mxu0 %v8478_v45  ;;  %v800_v45 = vrot.slane %v798_v25, 1  ;;  %v834_v25 = vshll.u32 %v8480_v33, 16  ;;  %v7911_v33 = vld [vmem:[%s10953_s2 + $0x1a8] sm:$0xff]  }
  0x71   : > { %1768 = vmatprep.subr.bf16.mxu0 %v11035_v14  ;;  %7359 = vmatmul.mubr.bf16.gmra.mrb[32].mxu1 %v8661_v8 }
  0x72   : > { %1830 = vmatprep.mubr.bf16.mxu1 %v8650_v22  ;;  %v836_v62 = vrot.slane %v834_v25, 1  ;;  %v7928_v25 = vld [vmem:[%s10953_s2 + $0x1e8] sm:$0xff]  }
  0x74   : > { %1769 = vmatpush1.bf16.msra.mxu0 %v8506_v4  ;;  %v772_v4 = vor.u32 %v771_v19, %v767_v46  ;;  %v815_v19 = vshrl.u32 %v8435_v57, 16  ;;  %v827_v46 = vshrl.u32 %v8460_v15, 16 }
  0x75   : > { %1770 = vmatprep.subr.bf16.mxu0 %v11035_v14 }
  0x76   : > { %v8691_v55 = vsel %vm669_vm1, %v772_v4, %v776_v21  ;;  %v7908_v21 = vld [vmem:[%s10953_s2 + $0x190] sm:$0xff]  }
  0x77   : > { %1325 = vmatmul.mubr.bf16.gmra.mrb[20].mxu0 %v8301_v56 }
  0x78   : > { %1332 = vmatprep.mubr.bf16.mxu0 %v8671_v49  ;;  %1771 = vmatpush1.bf16.msra.mxu0 %v8520_v12  ;;  %v817_v12 = vshll.u32 %v8435_v57, 16 }
  0x79   : > { %1772 = vmatprep.subr.bf16.mxu0 %v11035_v14  ;;  %1831 = vmatmul.mubr.bf16.vlgmr.msra.gmra.mrb[36].mxu1 %v8301_v56 }
  0x7a   : > { %1838 = vmatprep.mubr.bf16.mxu1 %v8671_v49  ;;  %2298 = vmatpush1.bf16.msra.mxu1 %v7906_v54  ;;  %v819_v30 = vrot.slane %v817_v12, 1  ;;  %v7922_v12 = vld [vmem:[%s10953_s2 + $0x1d0] sm:$0xff]  }
  0x7b   : > { %2299 = vmatprep.subr.bf16.mxu1 %v11035_v14 }
  0x7c   : > { %1773 = vmatpush1.bf16.msra.mxu0 %v8570_v24  ;;  %v829_v24 = vshll.u32 %v8460_v15, 16  ;;  %v820_v4 = vor.u32 %v819_v30, %v815_v19  ;;  %v843_v19 = vrot.slane %v841_v42, 1  ;;  %v851_v30 = vshrl.u32 %v8492_v44, 16 }
  0x7d   : > { %1774 = vmatprep.subr.bf16.mxu0 %v11035_v14 }
  0x7e   : > { %2300 = vmatpush1.bf16.msra.mxu1 %v7907_v27  ;;  %v831_v63 = vrot.slane %v829_v24, 1  ;;  %v7920_v27 = vld [vmem:[%s10953_s2 + $0x1c8] sm:$0xff]  }
  0x7f   : > { %1333 = vmatmul.mubr.bf16.gmra.mrb[24].mxu0 %v8305_v58  ;;  %2301 = vmatprep.subr.bf16.mxu1 %v11035_v14 }
  0x80   : > { %1340 = vmatprep.mubr.bf16.mxu0 %v8691_v55  ;;  %1775 = vmatpush1.bf16.msra.mxu0 %v8588_v35  ;;  %v8718_v35 = vsel %vm669_vm1, %v784_v48, %v788_v51  ;;  %v8731_v51 = vld [vmem:[%s10953_s2 + $0x80] sm:$0xff]  }
  0x81   : > { %1776 = vmatprep.subr.bf16.mxu0 %v11035_v14  ;;  %1839 = vmatmul.mubr.bf16.gmra.mrb[40].mxu1 %v8305_v58  ;;  %v7926_v48 = vld [vmem:[%s10953_s2 + $0x1e0] sm:$0xff]  }
  0x82   : > { %1846 = vmatprep.mubr.bf16.mxu1 %v8691_v55  ;;  %2302 = vmatpush1.bf16.msra.mxu1 %v7908_v21 }
  0x83   : > { %2303 = vmatprep.subr.bf16.mxu1 %v11035_v14 }
  0x84   : > { %1777 = vmatpush1.bf16.msra.mxu0 %v8607_v2  ;;  %v7910_v2 = vld [vmem:[%s10953_s2 + $0x1a0] sm:$0xff]  }
  0x85   : > { %1778 = vmatprep.subr.bf16.mxu0 %v11035_v14 }
  0x86   : > { %2304 = vmatpush1.bf16.msra.mxu1 %v7909_v26 }
  0x87   : > { %1341 = vmatmul.mubr.bf16.gmra.mrb[28].mxu0 %v8339_v6  ;;  %2305 = vmatprep.subr.bf16.mxu1 %v11035_v14 }
  0x88   : > { %1348 = vmatprep.mubr.bf16.mxu0 %v8718_v35  ;;  %1779 = vmatpush1.bf16.msra.mxu0 %v8623_v16  ;;  %v8746_v16 = vsel %vm669_vm1, %v796_v32, %v800_v45  ;;  %v7916_v45 = vld [vmem:[%s10953_s2 + $0x1b8] sm:$0xff]   ;;  %v865_v32 = vshll.u32 %v8523_v13, 16 }
  0x89   : > { %1780 = vmatprep.subr.bf16.mxu0 %v11035_v14  ;;  %1847 = vmatmul.mubr.bf16.gmra.mrb[44].mxu1 %v8339_v6 }
  0x8a   : > { %1854 = vmatprep.mubr.bf16.mxu1 %v8718_v35  ;;  %2306 = vmatpush1.bf16.msra.mxu1 %v7910_v2  ;;  %v867_v42 = vrot.slane %v865_v32, 1 }
  0x8b   : > { %2307 = vmatprep.subr.bf16.mxu1 %v11035_v14 }
  0x8c   : > { %1781 = vmatpush1.bf16.msra.mxu0 %v8645_v41  ;;  %v808_v41 = vor.u32 %v8675_v0, %v803_v1  ;;  %v846_v1 = vshll.u32 %v8510_v9, 16  ;;  %v7918_v0 = vld [vmem:[%s10953_s2 + $0x1c0] sm:$0xff]   ;;  %v8784_v9 = vsel %vm669_vm1, %v820_v4, %v824_v59  ;;  %v855_v59 = vrot.slane %v853_v18, 1 }
  0x8d   : > { %7362 = vmatprep.subr.bf16.mxu0 %v8731_v51  ;;  %v875_v4 = vshrl.u32 %v8541_v36, 16 }
  0x8e   : > { %2308 = vmatpush1.bf16.msra.mxu1 %v7911_v33  ;;  %v8766_v54 = vsel %vm669_vm1, %v808_v41, %v812_v52  ;;  %v832_v52 = vor.u32 %v831_v63, %v827_v46  ;;  %v844_v46 = vor.u32 %v843_v19, %v839_v29  ;;  %v848_v21 = vrot.slane %v846_v1, 1  ;;  %v7931_v41 = vld [vmem:[%s10953_s2 + $0x1f8] sm:$0xff]  }
  0x8f   : > { %1349 = vmatmul.mubr.bf16.gmra.mrb[32].mxu0 %v8353_v11  ;;  %2309 = vmatprep.subr.bf16.mxu1 %v11035_v14  ;;  %v858_v63 = vshll.u32 %v8514_v10, 16  ;;  %v856_v29 = vor.u32 %v855_v59, %v851_v30  ;;  %v7929_v10 = vld [vmem:[%s10953_s2 + $0x1f0] sm:$0xff]   ;;  %v882_v19 = vshll.u32 %v8573_v7, 16  ;;  %v894_v7 = vshll.u32 %v8558_v43, 16 }
  0x90   : > { %1356 = vmatprep.mubr.bf16.mxu0 %v8746_v16  ;;  %v8801_v24 = vsel %vm669_vm1, %v832_v52, %v836_v62  ;;  %v8814_v26 = vsel %vm669_vm1, %v844_v46, %v848_v21  ;;  %v863_v62 = vshrl.u32 %v8523_v13, 16  ;;  %v887_v21 = vshrl.u32 %v8552_v50, 16 }
  0x91   : > { %1855 = vmatmul.mubr.bf16.gmra.mrb[48].mxu1 %v8353_v11  ;;  %v860_v2 = vrot.slane %v858_v63, 1  ;;  %v884_v52 = vrot.slane %v882_v19, 1  ;;  %v896_v59 = vrot.slane %v894_v7, 1  ;;  %v8866_v63 = vld [vmem:[%s8202_s16 + $0x8] ss:$0 sps:$4 sm:$0x11]  }
  0x92   : > { %1862 = vmatprep.mubr.bf16.mxu1 %v8746_v16  ;;  %2310 = vmatpush1.bf16.msra.mxu1 %v7912_v40  ;;  %v870_v40 = vshll.u32 %v8548_v5, 16  ;;  %v678_v32 = vshll.u32 %v8866_v63, 16 }
  0x93   : > { %2311 = vmatprep.subr.bf16.mxu1 %v11035_v14  ;;  %v8832_v33 = vsel %vm669_vm1, %v856_v29, %v860_v2 }
  0x94   : > { %v872_v1 = vrot.slane %v870_v40, 1  ;;  %v7917_v40 = vld [vmem:[%s10953_s2 + $0x88] sm:$0xff]  }
  0x96   : > { %2312 = vmatpush1.bf16.msra.mxu1 %v7916_v45  ;;  %v868_v45 = vor.u32 %v867_v42, %v863_v62  ;;  %v680_v62 = vrot.slane %v678_v32, 1 }
  0x97   : > { %1357 = vmatmul.mubr.bf16.gmra.mrb[36].mxu0 %v8400_v38  ;;  %2313 = vmatprep.subr.bf16.mxu1 %v11035_v14 }
  0x98   : > { %1364 = vmatprep.mubr.bf16.mxu0 %v8766_v54  ;;  %v8846_v5 = vsel %vm669_vm1, %v868_v45, %v872_v1  ;;  %v11040_v45 = vld [vmem:[#allocation17_spill] sm:$0xff]  ;;  %v7921_v1 = vld [vmem:[%s10953_s2 + $0x98] sm:$0xff]  }
  0x99   : > { %1863 = vmatmul.mubr.bf16.gmra.mrb[52].mxu1 %v8400_v38 }
  0x9a   : > { %1870 = vmatprep.mubr.bf16.mxu1 %v8766_v54  ;;  %2314 = vmatpush1.bf16.msra.mxu1 %v7918_v0  ;;  %v877_v0 = vshll.u32 %v8541_v36, 16 }
  0x9b   : > { %2315 = vmatprep.subr.bf16.mxu1 %v11035_v14 }
  0x9e   : > { %2316 = vmatpush1.bf16.msra.mxu1 %v7920_v27  ;;  %v879_v27 = vrot.slane %v877_v0, 1  ;;  %v8030_v0 = vld [vmem:[%s8202_s16 + $0xc] sm:$0xff]  }
  0x9f   : > { %1365 = vmatmul.mubr.bf16.gmra.mrb[40].mxu0 %v8403_v39  ;;  %2317 = vmatprep.subr.bf16.mxu1 %v11035_v14 }
  0xa0   : > { %1372 = vmatprep.mubr.bf16.mxu0 %v8784_v9 }
  0xa1   : > { %1871 = vmatmul.mubr.bf16.gmra.mrb[56].mxu1 %v8403_v39 }
  0xa2   : > { %1878 = vmatprep.mubr.bf16.mxu1 %v8784_v9  ;;  %2318 = vmatpush1.bf16.msra.mxu1 %v7922_v12  ;;  %v880_v12 = vor.u32 %v879_v27, %v875_v4  ;;  %v7930_v4 = vld [vmem:[%s10953_s2 + $0xb8] sm:$0xff]  }
  0xa3   : > { %2319 = vmatprep.subr.bf16.mxu1 %v11035_v14 }
  0xa4   : > { %v8856_v46 = vsel %vm669_vm1, %v880_v12, %v884_v52 }
  0xa6   : > { %2320 = vmatpush1.bf16.msra.mxu1 %v7924_v20  ;;  %v889_v20 = vshll.u32 %v8552_v50, 16 }
  0xa7   : > { %1373 = vmatmul.mubr.bf16.gmra.mrb[44].mxu0 %v8435_v57  ;;  %2321 = vmatprep.subr.bf16.mxu1 %v11035_v14 }
  0xa8   : > { %1380 = vmatprep.mubr.bf16.mxu0 %v8801_v24  ;;  %v891_v18 = vrot.slane %v889_v20, 1  ;;  %v7935_v20 = vld [vmem:[%s10953_s2 + $0x218] sm:$0xff]  }
  0xa9   : > { %1879 = vmatmul.mubr.bf16.gmra.mrb[60].mxu1 %v8435_v57 }
  0xaa   : > { %1886 = vmatprep.mubr.bf16.mxu1 %v8801_v24  ;;  %2322 = vmatpush1.bf16.msra.mxu1 %v7926_v48  ;;  %v8861_v48 = vld [vmem:[%s8202_s16] sm:$0xff]   ;;  %v892_v30 = vor.u32 %v891_v18, %v887_v21  ;;  %v11043_v18 = vld [vmem:[#allocation6_spill] sm:$0xff] }
  0xab   : > { %2323 = vmatprep.subr.bf16.mxu1 %v11035_v14  ;;  %v671_v43 = vshrl.u32 %v8861_v48, 16 }
  0xac   : > { %v8872_v29 = vsel %vm669_vm1, %v892_v30, %v896_v59  ;;  %v7937_v59 = vld [vmem:[%s10953_s2 + $0x228] sm:$0xff]  }
  0xae   : > { %2324 = vmatpush1.bf16.msra.mxu1 %v7928_v25  ;;  %v673_v25 = vshll.u32 %v8861_v48, 16 }
  0xaf   : > { %1381 = vmatmul.mubr.bf16.gmra.mrb[48].mxu0 %v8460_v15  ;;  %2325 = vmatprep.subr.bf16.mxu1 %v11035_v14 }
  0xb0   : > { %1388 = vmatprep.mubr.bf16.mxu0 %v8814_v26  ;;  %v675_v2 = vrot.slane %v673_v25, 1  ;;  %v11045_v25 = vld [vmem:[#allocation8_spill] sm:$0xff] }
  0xb1   : > { %1887 = vmatmul.mubr.bf16.gmra.mrb[64].mxu1 %v8460_v15 }
  0xb2   : > { %1894 = vmatprep.mubr.bf16.mxu1 %v8814_v26  ;;  %2326 = vmatpush1.bf16.msra.mxu1 %v7929_v10  ;;  %v676_v10 = vor.u32 %v675_v2, %v671_v43  ;;  %v11046_v2 = vld [vmem:[#allocation9_spill] sm:$0xff] }
  0xb3   : > { %2327 = vmatprep.subr.bf16.mxu1 %v11035_v14 }
  0xb4   : > { %v681_v42 = vsel %vm669_vm1, %v676_v10, %v680_v62 }
  0xb6   : > { %2328 = vmatpush1.bf16.msra.mxu1 %v7931_v41  ;;  %v11039_v41 = vld [vmem:[#allocation3_spill] sm:$0xff] }
  0xb7   : > { %1389 = vmatmul.mubr.bf16.gmra.mrb[52].mxu0 %v8483_v34 }
  0xb8   : > { %1396 = vmatprep.mubr.bf16.mxu0 %v8832_v33 }
  0xb9   : > { %1895 = vmatmul.mubr.bf16.gmra.mrb[68].mxu1 %v8483_v34 }
  0xba   : > { %1902 = vmatprep.mubr.bf16.mxu1 %v8832_v33 }
  0xbf   : > { %1397 = vmatmul.mubr.bf16.gmra.mrb[56].mxu0 %v8492_v44 }
  0xc0   : > { %1404 = vmatprep.mubr.bf16.mxu0 %v8846_v5 }
  0xc1   : > { %1903 = vmatmul.mubr.bf16.gmra.mrb[72].mxu1 %v8492_v44 }
  0xc2   : > { %1910 = vmatprep.mubr.bf16.mxu1 %v8846_v5 }
  0xc7   : > { %1405 = vmatmul.mubr.bf16.gmra.mrb[60].mxu0 %v8523_v13 }
  0xc8   : > { %1412 = vmatprep.mubr.bf16.mxu0 %v8856_v46 }
  0xc9   : > { %1911 = vmatmul.mubr.bf16.gmra.mrb[76].mxu1 %v8523_v13 }
  0xca   : > { %1918 = vmatprep.mubr.bf16.mxu1 %v8856_v46 }
  0xcf   : > { %1413 = vmatmul.mubr.bf16.gmra.mrb[64].mxu0 %v8541_v36 }
  0xd0   : > { %1420 = vmatprep.mubr.bf16.mxu0 %v8872_v29 }
  0xd1   : > { %1919 = vmatmul.mubr.bf16.gmra.mrb[80].mxu1 %v8541_v36 }
  0xd2   : > { %2329 = vmatprep.mubr.bf16.mxu1 %v8440_v60 }
  0xd7   : > { %1421 = vmatmul.mubr.bf16.gmra.mrb[68].mxu0 %v8552_v50  ;;  %v7919_v50 = vld [vmem:[%s10953_s2 + $0x90] sm:$0xff]  }
  0xd8   : > { %1782 = vmatprep.mubr.bf16.mxu0 %v681_v42 }
  0xd9   : > { %2330 = vmatmul.mubr.bf16.vlgmr.msra.gmra.mrb[84].mxu1 %v8219_v17 }
  0xda   : > { %2337 = vmatprep.mubr.bf16.mxu1 %v8499_v3 }
  0xdf   : > { %1783 = vmatmul.mubr.bf16.vlgmr.msra.gmra.mrb[72].mxu0 %v8861_v48 }
  0xe0   : > { %7363 = vmatpush3.bf16.msra.mxu0 %v8731_v51  ;;  %1790 = vmatprep.mubr.bf16.mxu0 %v8294_v53  ;;  %v7923_v53 = vld [vmem:[%s10953_s2 + $0xa0] sm:$0xff]   ;;  %v7925_v51 = vld [vmem:[%s10953_s2 + $0xa8] sm:$0xff]  }
  0xe1   : > { %7364 = vmatprep.subr.bf16.mxu0 %v7917_v40  ;;  %2338 = vmatmul.mubr.bf16.gmra.mrb[88].mxu1 %v11039_v41 }
  0xe2   : > { %2345 = vmatprep.mubr.bf16.mxu1 %v11040_v45 }
  0xe4   : > { %7365 = vmatpush3.bf16.msra.mxu0 %v7917_v40 }
  0xe5   : > { %7366 = vmatprep.subr.bf16.mxu0 %v7919_v50 }
  0xe7   : > { %1791 = vmatmul.mubr.bf16.gmra.mrb[76].mxu0 %v8030_v0  ;;  %v11047_v0 = vld [vmem:[#allocation10_spill] sm:$0xff] }
  0xe8   : > { %7367 = vmatpush3.bf16.msra.mxu0 %v7919_v50  ;;  %1798 = vmatprep.mubr.bf16.mxu0 %v8440_v60  ;;  %v7927_v60 = vld [vmem:[%s10953_s2 + $0xb0] sm:$0xff]  }
  0xe9   : > { %7368 = vmatprep.subr.bf16.mxu0 %v7921_v1  ;;  %2346 = vmatmul.mubr.bf16.gmra.mrb[92].mxu1 %v8249_v31 }
  0xea   : > { %2353 = vmatprep.mubr.bf16.mxu1 %v8614_v47 }
  0xec   : > { %7369 = vmatpush3.bf16.msra.mxu0 %v7921_v1 }
  0xed   : > { %7370 = vmatprep.subr.bf16.mxu0 %v7923_v53 }
  0xef   : > { %1799 = vmatmul.mubr.bf16.gmra.mrb[80].mxu0 %v8219_v17  ;;  %v7932_v17 = vld [vmem:[%s10953_s2 + $0x200] sm:$0xff]  }
  0xf0   : > { %1806 = vmatprep.mubr.bf16.mxu0 %v8499_v3  ;;  %7371 = vmatpush3.bf16.msra.mxu0 %v7923_v53  ;;  %v931_v3 = vrot.slane %v8861_v48, 1  ;;  %v11044_v48 = vld [vmem:[#allocation7_spill] sm:$0xff] }
  0xf1   : > { %7372 = vmatprep.subr.bf16.mxu0 %v7925_v51  ;;  %2354 = vmatmul.mubr.bf16.gmra.mrb[96].mxu1 %v8258_v37 }
  0xf2   : > { %2361 = vmatprep.mubr.bf16.mxu1 %v8650_v22  ;;  %v932_v22 = vrot.slane %v8866_v63, 1 }
  0xf4   : > { %7373 = vmatpush3.bf16.msra.mxu0 %v7925_v51  ;;  %v933_v27 = vsel %vm930_vm0, %v931_v3, %v932_v22  ;;  %v11048_v51 = vld [vmem:[#allocation11_spill] sm:$0xff] }
  0xf5   : > { %7374 = vmatprep.subr.bf16.mxu0 %v7927_v60 }
  0xf7   : > { %1807 = vmatmul.mubr.bf16.gmra.mrb[84].mxu0 %v11039_v41 }
  0xf8   : > { %1814 = vmatprep.mubr.bf16.mxu0 %v11040_v45  ;;  %7375 = vmatpush3.bf16.msra.mxu0 %v7927_v60  ;;  %v7939_v45 = vld [vmem:[%s10953_s2 + $0x238] sm:$0xff]  }
  0xf9   : > { %7376 = vmatprep.subr.bf16.mxu0 %v7930_v4  ;;  %2362 = vmatmul.mubr.bf16.gmra.mrb[100].mxu1 %v8301_v56 }
  0xfa   : > { %2369 = vmatprep.mubr.bf16.mxu1 %v8671_v49 }
  0xfc   : > { %7377 = vmatpush3.bf16.msra.mxu0 %v7930_v4 }
  0xfd   : > { %7414 = vmatprep.subr.bf16.mxu0 %v7932_v17 }
  0xff   : > { %1815 = vmatmul.mubr.bf16.gmra.mrb[88].mxu0 %v8249_v31 }
 0x100   : > { %1822 = vmatprep.mubr.bf16.mxu0 %v8614_v47 }
 0x101   : > { %2370 = vmatmul.mubr.bf16.gmra.mrb[104].mxu1 %v8305_v58  ;;  %v7933_v58 = vld [vmem:[%s10953_s2 + $0x208] sm:$0xff]  }
 0x102   : > { %2377 = vmatprep.mubr.bf16.mxu1 %v8691_v55  ;;  %v11041_v55 = vld [vmem:[#allocation4_spill] sm:$0xff] }
 0x103   : > { %v8932_v19 = vpop.f32.mrb[0].mxu1 }
 0x104   : > { %v1463_v56 = vpop.f32.mrb[1].mxu1 }
 0x105   : > { %v8935_v49 = vpop.f32.mrb[2].mxu1 }
 0x106   : > { %v1466_v31 = vpop.f32.mrb[3].mxu1 }
 0x107   : > { %1823 = vmatmul.mubr.bf16.gmra.mrb[92].mxu0 %v8258_v37  ;;  %v11042_v37 = vld [vmem:[#allocation5_spill] sm:$0xff] }
 0x108   : > { %7378 = vmatprep.mubr.bf16.mxu0 %v933_v27 }
 0x109   : > { %2378 = vmatmul.mubr.bf16.gmra.mrb[108].mxu1 %v8339_v6  ;;  %v7934_v6 = vld [vmem:[%s10953_s2 + $0x210] sm:$0xff]  }
 0x10a   : > { %2385 = vmatprep.mubr.bf16.mxu1 %v8718_v35 }
 0x10b   : > { %v8942_v47 = vpop.f32.mrb[4].mxu1 }
 0x10c   : > { %v8945_v12 = vpop.f32.mrb[5].mxu1 }
 0x10d   : > { %v8948_v52 = vpop.f32.mrb[6].mxu1 }
 0x10e   : > { %v8953_v35 = vpop.f32.mrb[7].mxu1 }
 0x10f   : > { %7379 = vmatmul.mubr.bf16.vlgmr.msra.gmra.mrb[96].mxu0 %v11041_v55  ;;  %v11050_v55 = vld [vmem:[#allocation13_spill] sm:$0xff] }
 0x110   : > { %7415 = vmatpush3.bf16.msra.mxu0 %v7932_v17  ;;  %7382 = vmatprep.mubr.bf16.mxu0 %v11042_v37 }
 0x111   : > { %7416 = vmatprep.subr.bf16.mxu0 %v7933_v58  ;;  %2386 = vmatmul.mubr.bf16.gmra.mrb[112].mxu1 %v8353_v11  ;;  %v7936_v11 = vld [vmem:[%s10953_s2 + $0x220] sm:$0xff]  }
 0x112   : > { %2393 = vmatprep.mubr.bf16.mxu1 %v8746_v16 }
 0x113   : > { %v8960_v21 = vpop.f32.mrb[8].mxu1 }
 0x114   : > { %7417 = vmatpush3.bf16.msra.mxu0 %v7933_v58  ;;  %v8963_v7 = vpop.f32.mrb[9].mxu1 }
 0x115   : > { %7418 = vmatprep.subr.bf16.mxu0 %v7934_v6  ;;  %v8966_v30 = vpop.f32.mrb[10].mxu1 }
 0x116   : > { %v8971_v16 = vpop.f32.mrb[11].mxu1 }
 0x117   : > { %7383 = vmatmul.mubr.bf16.gmra.mrb[100].mxu0 %v11043_v18 }
 0x118   : > { %7386 = vmatprep.mubr.bf16.mxu0 %v11044_v48  ;;  %7419 = vmatpush3.bf16.msra.mxu0 %v7934_v6 }
 0x119   : > { %7420 = vmatprep.subr.bf16.mxu0 %v7935_v20  ;;  %2394 = vmatmul.mubr.bf16.gmra.mrb[116].mxu1 %v8400_v38 }
 0x11a   : > { %2401 = vmatprep.mubr.bf16.mxu1 %v8766_v54  ;;  %v7938_v54 = vld [vmem:[%s10953_s2 + $0x230] sm:$0xff]  }
 0x11b   : > { %v8978_v63 = vpop.f32.mrb[12].mxu1 }
 0x11c   : > { %7421 = vmatpush3.bf16.msra.mxu0 %v7935_v20  ;;  %v8981_v43 = vpop.f32.mrb[13].mxu1 }
 0x11d   : > { %7422 = vmatprep.subr.bf16.mxu0 %v7936_v11  ;;  %v8984_v32 = vpop.f32.mrb[14].mxu1 }
 0x11e   : > { %v8986_v38 = vpop.f32.mrb[15].mxu1 }
 0x11f   : > { %7387 = vmatmul.mubr.bf16.gmra.mrb[104].mxu0 %v11045_v25 }
 0x120   : > { %7390 = vmatprep.mubr.bf16.mxu0 %v11046_v2  ;;  %7423 = vmatpush3.bf16.msra.mxu0 %v7936_v11 }
 0x121   : > { %7424 = vmatprep.subr.bf16.mxu0 %v7937_v59  ;;  %2402 = vmatmul.mubr.bf16.gmra.mrb[120].mxu1 %v8403_v39 }
 0x122   : > { %v1286_v10 = vpop.f32.mrb[0].mxu0  ;;  %2409 = vmatprep.mubr.bf16.mxu1 %v8784_v9 }
 0x123   : > { %v8991_v62 = vadd.f32 %v1463_v56, %v1286_v10  ;;  %v1288_v42 = vpop.f32.mrb[1].mxu0  ;;  %v11053_v10 = vld [vmem:[#allocation14_spill] sm:$0xff] }
 0x124   : > { %v1289_v40 = vpop.f32.mrb[2].mxu0  ;;  %7425 = vmatpush3.bf16.msra.mxu0 %v7937_v59  ;;  %v9000_v1 = vpop.f32.mrb[16].mxu1 }
 0x125   : > { %v8995_v50 = vadd.f32 %v1466_v31, %v1289_v40  ;;  %v1291_v41 = vpop.f32.mrb[3].mxu0  ;;  %7426 = vmatprep.subr.bf16.mxu0 %v7938_v54  ;;  %v9003_v53 = vpop.f32.mrb[17].mxu1  ;;  %v11049_v31 = vld [vmem:[#allocation12_spill] sm:$0xff]  ;;  %v11054_v40 = vld [vmem:[#allocation15_spill] sm:$0xff] }
 0x126   : > { %v9006_v39 = vpop.f32.mrb[18].mxu1 }
 0x127   : > { %7391 = vmatmul.mubr.bf16.gmra.mrb[108].mxu0 %v11047_v0  ;;  %v9008_v9 = vpop.f32.mrb[19].mxu1 }
 0x128   : > { %7394 = vmatprep.mubr.bf16.mxu0 %v11048_v51  ;;  %7427 = vmatpush3.bf16.msra.mxu0 %v7938_v54 }
 0x129   : > { %7428 = vmatprep.subr.bf16.mxu0 %v7939_v45  ;;  %2410 = vmatmul.mubr.bf16.gmra.mrb[124].mxu1 %v8435_v57 }
 0x12a   : > { %v1294_v60 = vpop.f32.mrb[4].mxu0  ;;  %2417 = vmatprep.mubr.bf16.mxu1 %v8801_v24 }
 0x12b   : > { %v1296_v4 = vpop.f32.mrb[5].mxu0  ;;  %v9012_v17 = vadd.f32 %v8932_v19, %v1294_v60 }
 0x12c   : > { %v1297_v3 = vpop.f32.mrb[6].mxu0  ;;  %7429 = vmatpush3.bf16.msra.mxu0 %v7939_v45  ;;  %v9018_v56 = vpop.f32.mrb[20].mxu1 }
 0x12d   : > { %v1299_v22 = vpop.f32.mrb[7].mxu0  ;;  %v9016_v27 = vadd.f32 %v8935_v49, %v1297_v3  ;;  %v9021_v58 = vpop.f32.mrb[21].mxu1 }
 0x12e   : > { %v9024_v57 = vpop.f32.mrb[22].mxu1  ;;  %v11057_v22 = vld [vmem:[#allocation16_spill] sm:$0xff] }
 0x12f   : > { %7395 = vmatmul.mubr.bf16.gmra.mrb[112].mxu0 %v11049_v31  ;;  %v9026_v19 = vpop.f32.mrb[23].mxu1 }
 0x130   : > { %7398 = vmatprep.mubr.bf16.mxu0 %v11050_v55 }
 0x131   : > { %2418 = vmatmul.mubr.bf16.gmra.mrb[128].mxu1 %v8460_v15 }
 0x132   : > { %v1302_v6 = vpop.f32.mrb[8].mxu0  ;;  %2425 = vmatprep.mubr.bf16.mxu1 %v8814_v26 }
 0x133   : > { %v9029_v20 = vadd.f32 %v8945_v12, %v1302_v6  ;;  %v1304_v24 = vpop.f32.mrb[9].mxu0 }
 0x134   : > { %v1305_v49 = vpop.f32.mrb[10].mxu0  ;;  %v9036_v54 = vpop.f32.mrb[24].mxu1  ;;  %v11058_v24 = vld [vmem:[#allocation18_spill] sm:$0xff] }
 0x135   : > { %11051 = vst [vmem:[#allocation3_spill] sm:$0xff] %v9029_v20  ;;  %v9034_v11 = vadd.f32 %v8953_v35, %v1305_v49  ;;  %v1307_v59 = vpop.f32.mrb[11].mxu0  ;;  %v9039_v42 = vpop.f32.mrb[25].mxu1 }
 0x136   : > { %v9042_v12 = vpop.f32.mrb[26].mxu1 }
 0x137   : > { %11052 = vst [vmem:[#allocation17_spill] sm:$0xff] %v9034_v11  ;;  %7399 = vmatmul.mubr.bf16.gmra.mrb[116].mxu0 %v11053_v10  ;;  %v9044_v41 = vpop.f32.mrb[27].mxu1 }
 0x138   : > { %7402 = vmatprep.mubr.bf16.mxu0 %v11054_v40 }
 0x139   : > { %2426 = vmatmul.mubr.bf16.gmra.mrb[132].mxu1 %v8483_v34 }
 0x13a   : > { %v1310_v15 = vpop.f32.mrb[12].mxu0  ;;  %2433 = vmatprep.mubr.bf16.mxu1 %v8832_v33 }
 0x13b   : > { %v1312_v45 = vpop.f32.mrb[13].mxu0  ;;  %v9048_v26 = vadd.f32 %v8942_v47, %v1310_v15 }
 0x13c   : > { %v1313_v35 = vpop.f32.mrb[14].mxu0  ;;  %v9054_v3 = vpop.f32.mrb[28].mxu1  ;;  %v7942_v45 = vld [vmem:[%s10954_s3 + $0x140] sm:$0xff]  }
 0x13d   : > { %11055 = vst [vmem:[#allocation4_spill] sm:$0xff] %v9048_v26  ;;  %v1315_v60 = vpop.f32.mrb[15].mxu0  ;;  %v9052_v4 = vadd.f32 %v8948_v52, %v1313_v35  ;;  %v9057_v6 = vpop.f32.mrb[29].mxu1  ;;  %7466 = vmatprep.subr.bf16.mxu1 %v7942_v45 }
 0x13e   : > { %v9060_v49 = vpop.f32.mrb[30].mxu1  ;;  %7467 = vmatpush3.bf16.msra.mxu1 %v7942_v45 }
 0x13f   : > { %11056 = vst [vmem:[#allocation5_spill] sm:$0xff] %v9052_v4  ;;  %7403 = vmatmul.mubr.bf16.gmra.mrb[120].mxu0 %v11057_v22  ;;  %v9062_v34 = vpop.f32.mrb[31].mxu1 }
 0x140   : > { %7406 = vmatprep.mubr.bf16.mxu0 %v11058_v24 }
 0x141   : > { %2434 = vmatmul.mubr.bf16.gmra.mrb[136].mxu1 %v8492_v44 }
 0x142   : > { %v1318_v47 = vpop.f32.mrb[16].mxu0  ;;  %2441 = vmatprep.mubr.bf16.mxu1 %v8846_v5 }
 0x143   : > { %v1320_v59 = vpop.f32.mrb[17].mxu0  ;;  %v9066_v33 = vadd.f32 %v8963_v7, %v1318_v47  ;;  %v9086_v47 = vld [vmem:[%s8408_s23 + $0x24] sm:$0xff]  }
 0x144   : > { %v1321_v52 = vpop.f32.mrb[18].mxu0  ;;  %v9075_v60 = vpop.f32.mrb[32].mxu1 }
 0x145   : > { %11059 = vst [vmem:[#allocation6_spill] sm:$0xff] %v9066_v33  ;;  %v1323_v15 = vpop.f32.mrb[19].mxu0  ;;  %v9073_v35 = vadd.f32 %v8971_v16, %v1321_v52  ;;  %v9078_v44 = vpop.f32.mrb[33].mxu1  ;;  %v901_v33 = vshll.u32 %v9086_v47, 16 }
 0x146   : > { %v9081_v7 = vpop.f32.mrb[34].mxu1 }
 0x147   : > { %11060 = vst [vmem:[#allocation7_spill] sm:$0xff] %v9073_v35  ;;  %7407 = vmatmul.mubr.bf16.gmra.mrb[124].mxu0 %v8577_v28  ;;  %v9083_v5 = vpop.f32.mrb[35].mxu1  ;;  %v9094_v35 = vld [vmem:[%s8408_s23 + $0x2c] ss:$0 sps:$4 sm:$0x11]  }
 0x148   : > { %7410 = vmatprep.mubr.bf16.mxu0 %v8632_v61 }
 0x149   : > { %2442 = vmatmul.mubr.bf16.gmra.mrb[140].mxu1 %v8523_v13 }
 0x14a   : > { %v1326_v59 = vpop.f32.mrb[20].mxu0  ;;  %2449 = vmatprep.mubr.bf16.mxu1 %v8856_v46 }
 0x14b   : > { %v1328_v16 = vpop.f32.mrb[21].mxu0  ;;  %v9090_v52 = vadd.f32 %v8960_v21, %v1326_v59  ;;  %v899_v21 = vshrl.u32 %v9086_v47, 16  ;;  %v903_v59 = vrot.slane %v901_v33, 1  ;;  %v7943_v33 = vld [vmem:[%s10954_s3 + $0x148] sm:$0xff]  }
 0x14c   : > { %v1329_v15 = vpop.f32.mrb[22].mxu0  ;;  %v1832_v4 = vpop.f32.mrb[36].mxu1  ;;  %7468 = vmatprep.subr.bf16.mxu1 %v7943_v33 }
 0x14d   : > { %11061 = vst [vmem:[#allocation8_spill] sm:$0xff] %v9090_v52  ;;  %v1331_v14 = vpop.f32.mrb[23].mxu0  ;;  %v9098_v45 = vadd.f32 %v8966_v30, %v1329_v15  ;;  %v1834_v16 = vpop.f32.mrb[37].mxu1  ;;  %7469 = vmatpush3.bf16.msra.mxu1 %v7943_v33 }
 0x14e   : > { %v1835_v26 = vpop.f32.mrb[38].mxu1  ;;  %v906_v14 = vshll.u32 %v9094_v35, 16 }
 0x14f   : > { %11062 = vst [vmem:[#allocation9_spill] sm:$0xff] %v9098_v45  ;;  %7411 = vmatmul.mubr.bf16.gmra.mrb[128].mxu0 %v8637_v23  ;;  %v1837_v13 = vpop.f32.mrb[39].mxu1 }
 0x150   : > { %7430 = vmatprep.mubr.bf16.mxu0 %v11042_v37  ;;  %v904_v13 = vor.u32 %v903_v59, %v899_v21  ;;  %v908_v45 = vrot.slane %v906_v14, 1  ;;  %v8031_v59 = vld [vmem:[%s8408_s23 + $0x18] sm:$0xff]  }
 0x151   : > { %2450 = vmatmul.mubr.bf16.gmra.mrb[144].mxu1 %v8541_v36 }
 0x152   : > { %v1334_v46 = vpop.f32.mrb[24].mxu0  ;;  %2457 = vmatprep.mubr.bf16.mxu1 %v8872_v29 }
 0x153   : > { %v1336_v52 = vpop.f32.mrb[25].mxu0  ;;  %v1512_v11 = vadd.f32 %v8981_v43, %v1334_v46 }
 0x154   : > { %v1337_v30 = vpop.f32.mrb[26].mxu0  ;;  %v1840_v52 = vpop.f32.mrb[40].mxu1 }
 0x155   : > { %v9107_v15 = vadd.f32 %v1832_v4, %v1512_v11  ;;  %v1339_v16 = vpop.f32.mrb[27].mxu0  ;;  %v1515_v37 = vadd.f32 %v8986_v38, %v1337_v30  ;;  %v1842_v36 = vpop.f32.mrb[41].mxu1  ;;  %v909_v38 = vsel %vm669_vm1, %v904_v13, %v908_v45 }
 0x156   : > { %v1843_v29 = vpop.f32.mrb[42].mxu1 }
 0x157   : > { %v9113_v20 = vadd.f32 %v1835_v26, %v1515_v37  ;;  %7431 = vmatmul.mubr.bf16.vlgmr.msra.gmra.mrb[132].mxu0 %v11043_v18  ;;  %v1845_v43 = vpop.f32.mrb[43].mxu1 }
 0x158   : > { %7434 = vmatprep.mubr.bf16.mxu0 %v11044_v48 }
 0x159   : > { %2458 = vmatmul.mubr.bf16.gmra.mrb[148].mxu1 %v8031_v59  ;;  %v7944_v59 = vld [vmem:[%s10954_s3 + $0x150] sm:$0xff]  }
 0x15a   : > { %v1342_v11 = vpop.f32.mrb[28].mxu0  ;;  %2465 = vmatprep.mubr.bf16.mxu1 %v909_v38  ;;  %7470 = vmatprep.subr.bf16.mxu1 %v7944_v59 }
 0x15b   : > { %v1344_v4 = vpop.f32.mrb[29].mxu0  ;;  %v1520_v21 = vadd.f32 %v8978_v63, %v1342_v11  ;;  %7471 = vmatpush3.bf16.msra.mxu1 %v7944_v59 }
 0x15c   : > { %v1345_v14 = vpop.f32.mrb[30].mxu0  ;;  %v1848_v30 = vpop.f32.mrb[44].mxu1 }
 0x15d   : > { %v9120_v26 = vadd.f32 %v1840_v52, %v1520_v21  ;;  %v1347_v18 = vpop.f32.mrb[31].mxu0  ;;  %v1523_v46 = vadd.f32 %v8984_v32, %v1345_v14  ;;  %v1850_v48 = vpop.f32.mrb[45].mxu1 }
 0x15e   : > { %v1851_v45 = vpop.f32.mrb[46].mxu1 }
 0x15f   : > { %v9123_v16 = vadd.f32 %v1843_v29, %v1523_v46  ;;  %7435 = vmatmul.mubr.bf16.gmra.mrb[136].mxu0 %v11045_v25  ;;  %v1853_v37 = vpop.f32.mrb[47].mxu1 }
 0x160   : > { %7438 = vmatprep.mubr.bf16.mxu0 %v11046_v2 }
 0x161   : > { %2466 = vmatmul.mubr.bf16.gmra.mrb[152].mxu1 %v9086_v47 }
 0x162   : > { %v1350_v63 = vpop.f32.mrb[32].mxu0 }
 0x163   : > { %v1352_v13 = vpop.f32.mrb[33].mxu0  ;;  %v1528_v33 = vadd.f32 %v9003_v53, %v1350_v63 }
 0x164   : > { %v1353_v52 = vpop.f32.mrb[34].mxu0  ;;  %v1856_v43 = vpop.f32.mrb[48].mxu1 }
 0x165   : > { %v9129_v36 = vadd.f32 %v1848_v30, %v1528_v33  ;;  %v1355_v32 = vpop.f32.mrb[35].mxu0  ;;  %v1531_v29 = vadd.f32 %v9008_v9, %v1353_v52  ;;  %v1858_v25 = vpop.f32.mrb[49].mxu1 }
 0x166   : > { %v1859_v2 = vpop.f32.mrb[50].mxu1 }
 0x167   : > { %v9132_v38 = vadd.f32 %v1851_v45, %v1531_v29  ;;  %7439 = vmatmul.mubr.bf16.gmra.mrb[140].mxu0 %v11047_v0  ;;  %v1861_v11 = vpop.f32.mrb[51].mxu1 }
 0x168   : > { %7442 = vmatprep.mubr.bf16.mxu0 %v11048_v51 }
 0x16a   : > { %v1358_v4 = vpop.f32.mrb[36].mxu0 }
 0x16b   : > { %v1360_v53 = vpop.f32.mrb[37].mxu0  ;;  %v1536_v21 = vadd.f32 %v9000_v1, %v1358_v4 }
 0x16c   : > { %v1361_v14 = vpop.f32.mrb[38].mxu0  ;;  %v1864_v0 = vpop.f32.mrb[52].mxu1 }
 0x16d   : > { %v9140_v9 = vadd.f32 %v1856_v43, %v1536_v21  ;;  %v1363_v18 = vpop.f32.mrb[39].mxu0  ;;  %v1539_v46 = vadd.f32 %v9006_v39, %v1361_v14  ;;  %v1866_v51 = vpop.f32.mrb[53].mxu1  ;;  %v7945_v21 = vld [vmem:[%s10954_s3 + $0x158] sm:$0xff]  }
 0x16e   : > { %v1867_v48 = vpop.f32.mrb[54].mxu1  ;;  %7472 = vmatprep.subr.bf16.mxu1 %v7945_v21 }
 0x16f   : > { %v9143_v30 = vadd.f32 %v1859_v2, %v1539_v46  ;;  %7443 = vmatmul.mubr.bf16.gmra.mrb[144].mxu0 %v11049_v31  ;;  %v1869_v1 = vpop.f32.mrb[55].mxu1  ;;  %7473 = vmatpush3.bf16.msra.mxu1 %v7945_v21 }
 0x170   : > { %7446 = vmatprep.mubr.bf16.mxu0 %v11050_v55 }
 0x172   : > { %v1366_v45 = vpop.f32.mrb[40].mxu0 }
 0x173   : > { %v1544_v37 = vadd.f32 %v9021_v58, %v1366_v45  ;;  %v1368_v63 = vpop.f32.mrb[41].mxu0 }
 0x174   : > { %v1369_v13 = vpop.f32.mrb[42].mxu0  ;;  %v1872_v32 = vpop.f32.mrb[56].mxu1 }
 0x175   : > { %v1547_v33 = vadd.f32 %v9026_v19, %v1369_v13  ;;  %v9149_v39 = vadd.f32 %v1864_v0, %v1544_v37  ;;  %v1371_v52 = vpop.f32.mrb[43].mxu0  ;;  %v1874_v31 = vpop.f32.mrb[57].mxu1 }
 0x176   : > { %v1875_v43 = vpop.f32.mrb[58].mxu1 }
 0x177   : > { %v9151_v29 = vadd.f32 %v1867_v48, %v1547_v33  ;;  %7447 = vmatmul.mubr.bf16.gmra.mrb[148].mxu0 %v11053_v10  ;;  %v1877_v55 = vpop.f32.mrb[59].mxu1 }
 0x178   : > { %7450 = vmatprep.mubr.bf16.mxu0 %v11054_v40 }
 0x17a   : > { %v1374_v25 = vpop.f32.mrb[44].mxu0 }
 0x17b   : > { %v1552_v58 = vadd.f32 %v9018_v56, %v1374_v25  ;;  %v1376_v2 = vpop.f32.mrb[45].mxu0 }
 0x17c   : > { %v1377_v11 = vpop.f32.mrb[46].mxu0  ;;  %v1880_v10 = vpop.f32.mrb[60].mxu1 }
 0x17d   : > { %v1555_v19 = vadd.f32 %v9024_v57, %v1377_v11  ;;  %v9157_v4 = vadd.f32 %v1872_v32, %v1552_v58  ;;  %v1379_v53 = vpop.f32.mrb[47].mxu0  ;;  %v1882_v40 = vpop.f32.mrb[61].mxu1 }
 0x17e   : > { %v1883_v14 = vpop.f32.mrb[62].mxu1 }
 0x17f   : > { %v9162_v59 = vadd.f32 %v1875_v43, %v1555_v19  ;;  %7451 = vmatmul.mubr.bf16.gmra.mrb[152].mxu0 %v11057_v22  ;;  %v1885_v56 = vpop.f32.mrb[63].mxu1 }
 0x180   : > { %7454 = vmatprep.mubr.bf16.mxu0 %v11058_v24 }
 0x182   : > { %v1382_v57 = vpop.f32.mrb[48].mxu0 }
 0x183   : > { %v1560_v18 = vadd.f32 %v9039_v42, %v1382_v57  ;;  %v1384_v46 = vpop.f32.mrb[49].mxu0 }
 0x184   : > { %v1385_v0 = vpop.f32.mrb[50].mxu0  ;;  %v1888_v45 = vpop.f32.mrb[64].mxu1 }
 0x185   : > { %v1563_v51 = vadd.f32 %v9044_v41, %v1385_v0  ;;  %v9168_v48 = vadd.f32 %v1880_v10, %v1560_v18  ;;  %v1387_v1 = vpop.f32.mrb[51].mxu0  ;;  %v1890_v22 = vpop.f32.mrb[65].mxu1 }
 0x186   : > { %v1891_v63 = vpop.f32.mrb[66].mxu1 }
 0x187   : > { %v9170_v37 = vadd.f32 %v1883_v14, %v1563_v51  ;;  %7455 = vmatmul.mubr.bf16.gmra.mrb[156].mxu0 %v8577_v28  ;;  %v1893_v24 = vpop.f32.mrb[67].mxu1  ;;  %v7946_v28 = vld [vmem:[%s10954_s3 + $0x160] sm:$0xff]  }
 0x188   : > { %7458 = vmatprep.mubr.bf16.mxu0 %v8632_v61  ;;  %7474 = vmatprep.subr.bf16.mxu1 %v7946_v28 }
 0x189   : > { %7475 = vmatpush3.bf16.msra.mxu1 %v7946_v28 }
 0x18a   : > { %v1390_v13 = vpop.f32.mrb[52].mxu0 }
 0x18b   : > { %v1568_v42 = vadd.f32 %v9036_v54, %v1390_v13  ;;  %v1392_v33 = vpop.f32.mrb[53].mxu0  ;;  %v988_v54 = vrot.slane %v9086_v47, 1 }
 0x18c   : > { %v1393_v52 = vpop.f32.mrb[54].mxu0  ;;  %v1896_v43 = vpop.f32.mrb[68].mxu1 }
 0x18d   : > { %v1571_v41 = vadd.f32 %v9042_v12, %v1393_v52  ;;  %v9176_v32 = vadd.f32 %v1888_v45, %v1568_v42  ;;  %v1395_v31 = vpop.f32.mrb[55].mxu0  ;;  %v1898_v61 = vpop.f32.mrb[69].mxu1  ;;  %v989_v12 = vrot.slane %v9094_v35, 1  ;;  %v7947_v45 = vld [vmem:[%s10954_s3 + $0x168] sm:$0xff]  }
 0x18e   : > { %v1899_v25 = vpop.f32.mrb[70].mxu1  ;;  %7476 = vmatprep.subr.bf16.mxu1 %v7947_v45 }
 0x18f   : > { %v9181_v55 = vadd.f32 %v1891_v63, %v1571_v41  ;;  %7459 = vmatmul.mubr.bf16.gmra.mrb[160].mxu0 %v8637_v23  ;;  %v1901_v58 = vpop.f32.mrb[71].mxu1  ;;  %v990_v21 = vsel %vm930_vm0, %v988_v54, %v989_v12  ;;  %7477 = vmatpush3.bf16.msra.mxu1 %v7947_v45 }
 0x190   : > { %7462 = vmatprep.mubr.bf16.mxu0 %v8661_v8 }
 0x192   : > { %v1398_v2 = vpop.f32.mrb[56].mxu0 }
 0x193   : > { %v1576_v11 = vadd.f32 %v9057_v6, %v1398_v2  ;;  %v1400_v19 = vpop.f32.mrb[57].mxu0 }
 0x194   : > { %v1401_v53 = vpop.f32.mrb[58].mxu0  ;;  %v1904_v8 = vpop.f32.mrb[72].mxu1 }
 0x195   : > { %v1579_v23 = vadd.f32 %v9062_v34, %v1401_v53  ;;  %v9190_v10 = vadd.f32 %v1896_v43, %v1576_v11  ;;  %v1403_v40 = vpop.f32.mrb[59].mxu0  ;;  %v1906_v35 = vpop.f32.mrb[73].mxu1 }
 0x196   : > { %v1907_v47 = vpop.f32.mrb[74].mxu1 }
 0x197   : > { %v9192_v14 = vadd.f32 %v1899_v25, %v1579_v23  ;;  %7463 = vmatmul.mubr.bf16.gmra.mrb[164].mxu0 %v990_v21  ;;  %v1909_v56 = vpop.f32.mrb[75].mxu1 }
 0x19a   : > { %v1406_v57 = vpop.f32.mrb[60].mxu0 }
 0x19b   : > { %v1584_v18 = vadd.f32 %v9054_v3, %v1406_v57  ;;  %v1408_v6 = vpop.f32.mrb[61].mxu0 }
 0x19c   : > { %v1409_v46 = vpop.f32.mrb[62].mxu0  ;;  %v1912_v1 = vpop.f32.mrb[76].mxu1 }
 0x19d   : > { %v1587_v0 = vadd.f32 %v9060_v49, %v1409_v46  ;;  %v9196_v51 = vadd.f32 %v1904_v8, %v1584_v18  ;;  %v1411_v34 = vpop.f32.mrb[63].mxu0  ;;  %v1914_v63 = vpop.f32.mrb[77].mxu1  ;;  %v7948_v8 = vld [vmem:[%s10954_s3 + $0x100] sm:$0xff]   ;;  %v7951_v18 = vld [vmem:[%s10954_s3 + $0x108] sm:$0xff]  }
 0x19e   : > { %v1915_v24 = vpop.f32.mrb[78].mxu1  ;;  %6902 = vmatprep.subr.bf16.mxu0 %v7948_v8  ;;  %v7954_v63 = vld [vmem:[%s10954_s3 + $0xd0] sm:$0xff]  }
 0x19f   : > { %v9201_v22 = vadd.f32 %v1907_v47, %v1587_v0  ;;  %v1917_v13 = vpop.f32.mrb[79].mxu1  ;;  %v7952_v0 = vld [vmem:[%s10954_s3 + $0xc8] sm:$0xff]  }
 0x1a2   : > { %v1414_v3 = vpop.f32.mrb[64].mxu0 }
 0x1a3   : > { %v1592_v42 = vadd.f32 %v9078_v44, %v1414_v3  ;;  %v1416_v33 = vpop.f32.mrb[65].mxu0 }
 0x1a4   : > { %v1417_v49 = vpop.f32.mrb[66].mxu0  ;;  %v1920_v43 = vpop.f32.mrb[80].mxu1 }
 0x1a5   : > { %v1595_v52 = vadd.f32 %v9083_v5, %v1417_v49  ;;  %v9205_v41 = vadd.f32 %v1912_v1, %v1592_v42  ;;  %v1419_v31 = vpop.f32.mrb[67].mxu0  ;;  %v1922_v61 = vpop.f32.mrb[81].mxu1 }
 0x1a6   : > { %v1923_v25 = vpop.f32.mrb[82].mxu1  ;;  %v2977_v61 = vld [vmem:[#allocation2 + $0x8] sm:$0x10] }
 0x1a7   : > { %v9207_v28 = vadd.f32 %v1915_v24, %v1595_v52  ;;  %v1925_v54 = vpop.f32.mrb[83].mxu1  ;;  %v2980_v24 = vld [vmem:[#allocation2 + $0x18] sm:$0x10] }
 0x1a8   : > { %v2981_v52 = vsel %vm9248_vm6, 0, %v2980_v24 }
 0x1a9   : > { %2982 = vst [vmem:[#allocation2 + $0x18] sm:$0x10] %v2981_v52 }
 0x1aa   : > { %v1422_v12 = vpop.f32.mrb[68].mxu0 }
 0x1ab   : > { %v1600_v58 = vadd.f32 %v9075_v60, %v1422_v12  ;;  %v1424_v2 = vpop.f32.mrb[69].mxu0  ;;  %v7950_v60 = vld [vmem:[%s10954_s3 + $0xc0] sm:$0xff]  }
 0x1ac   : > { %v1425_v11 = vpop.f32.mrb[70].mxu0  ;;  %v9213_v5 = vpop.f32.mrb[84].mxu1  ;;  %6903 = vmatpush3.bf16.msra.mxu0 %v7950_v60  ;;  %v7949_v2 = vld [vmem:[%s10954_s3 + $0x170] sm:$0xff]  }
 0x1ad   : > { %v1603_v44 = vadd.f32 %v9081_v7, %v1425_v11  ;;  %v9211_v19 = vadd.f32 %v1920_v43, %v1600_v58  ;;  %v1427_v53 = vpop.f32.mrb[71].mxu0  ;;  %v2333_v23 = vpop.f32.mrb[85].mxu1  ;;  %6904 = vmatprep.subr.bf16.mxu0 %v7951_v18  ;;  %v2920_v43 = vld [vmem:[#allocation2] sm:$0x8]  ;;  %v2978_v58 = vsel %vm9248_vm6, 0, %v2977_v61  ;;  %v7956_v11 = vld [vmem:[%s10954_s3 + $0xd8] sm:$0xff]   ;;  %7478 = vmatprep.subr.bf16.mxu1 %v7949_v2 }
 0x1ae   : > { %v9217_v40 = vpop.f32.mrb[86].mxu1  ;;  %v2921_v12 = vsel %vm9255_vm7, 0, %v2920_v43  ;;  %2979 = vst [vmem:[#allocation2 + $0x8] sm:$0x10] %v2978_v58  ;;  %7479 = vmatpush3.bf16.msra.mxu1 %v7949_v2  ;;  %v7957_v23 = vld [vmem:[%s10954_s3 + $0x120] sm:$0xff]  }
 0x1af   : > { %v9215_v21 = vadd.f32 %v1923_v25, %v1603_v44  ;;  %v2336_v35 = vpop.f32.mrb[87].mxu1  ;;  %v7955_v25 = vld [vmem:[%s10954_s3 + $0x118] sm:$0xff]   ;;  %2922 = vst [vmem:[#allocation2] sm:$0x8] %v2921_v12  ;;  %v2923_v61 = vld [vmem:[#allocation2 + $0x10] sm:$0x8] }
 0x1b0   : > { %6905 = vmatpush3.bf16.msra.mxu0 %v7952_v0  ;;  %v7958_v35 = vld [vmem:[%s10954_s3 + $0xe0] sm:$0xff]   ;;  %v11068_v0 = vld [vmem:[#allocation17_spill] sm:$0xff]  ;;  %v2924_v58 = vsel %vm9255_vm7, 0, %v2923_v61  ;;  %v7965_v61 = vld [vmem:[%s10954_s3 + $0xf8] sm:$0xff]  }
 0x1b1   : > { %2925 = vst [vmem:[#allocation2 + $0x10] sm:$0x8] %v2924_v58  ;;  %v2983_v58 = vld [vmem:[#allocation2 + $0x28] sm:$0x10] }
 0x1b2   : > { %v1784_v7 = vpop.f32.mrb[72].mxu0 }
 0x1b3   : > { %v9226_v47 = vadd.f32 %v1784_v7, %v8991_v62  ;;  %v1786_v56 = vpop.f32.mrb[73].mxu0  ;;  %v11067_v7 = vld [vmem:[#allocation3_spill] sm:$0xff] }
 0x1b4   : > { %v1787_v57 = vpop.f32.mrb[74].mxu0  ;;  %v9237_v34 = vpop.f32.mrb[88].mxu1 }
 0x1b5   : > { %v9232_v6 = vadd.f32 %v1787_v57, %v8995_v50  ;;  %v1789_v46 = vpop.f32.mrb[75].mxu0  ;;  %v2341_v62 = vpop.f32.mrb[89].mxu1  ;;  %v7953_v50 = vld [vmem:[%s10954_s3 + $0x110] sm:$0xff]  }
 0x1b6   : > { %v9239_v1 = vpop.f32.mrb[90].mxu1  ;;  %6906 = vmatprep.subr.bf16.mxu0 %v7953_v50  ;;  %v7960_v46 = vld [vmem:[%s10954_s3 + $0x128] sm:$0xff]  }
 0x1b7   : > { %v2344_v45 = vpop.f32.mrb[91].mxu1  ;;  %6907 = vmatpush3.bf16.msra.mxu0 %v7954_v63 }
 0x1b8   : > { %6908 = vmatprep.subr.bf16.mxu0 %v7955_v25  ;;  %v7961_v45 = vld [vmem:[%s10954_s3 + $0xe8] sm:$0xff]  }
 0x1b9   : > { %v11069_v25 = vld [vmem:[#allocation4_spill] sm:$0xff] }
 0x1ba   : > { %v1792_v13 = vpop.f32.mrb[76].mxu0 }
 0x1bb   : > { %v9253_v42 = vadd.f32 %v1792_v13, %v9012_v17  ;;  %v1794_v33 = vpop.f32.mrb[77].mxu0  ;;  %6909 = vmatpush3.bf16.msra.mxu0 %v7956_v11  ;;  %v11070_v11 = vld [vmem:[#allocation5_spill] sm:$0xff] }
 0x1bc   : > { %v1795_v31 = vpop.f32.mrb[78].mxu0  ;;  %v9277_v44 = vpop.f32.mrb[92].mxu1  ;;  %6910 = vmatprep.subr.bf16.mxu0 %v7957_v23  ;;  %v7962_v33 = vld [vmem:[%s10954_s3 + $0x130] sm:$0xff]  }
 0x1bd   : > { %v9265_v17 = vadd.f32 %v1795_v31, %v9016_v27  ;;  %v1797_v54 = vpop.f32.mrb[79].mxu0  ;;  %v2349_v27 = vpop.f32.mrb[93].mxu1  ;;  %v7963_v31 = vld [vmem:[%s10954_s3 + $0xf0] sm:$0xff]  }
 0x1be   : > { %v9279_v53 = vpop.f32.mrb[94].mxu1 }
 0x1bf   : > { %v2352_v8 = vpop.f32.mrb[95].mxu1  ;;  %6911 = vmatpush3.bf16.msra.mxu0 %v7958_v35 }
 0x1c0   : > { %6912 = vmatprep.subr.bf16.mxu0 %v7960_v46  ;;  %v11072_v46 = vld [vmem:[#allocation6_spill] sm:$0xff] }
 0x1c2   : > { %v1800_v60 = vpop.f32.mrb[80].mxu0 }
 0x1c3   : > { %v9288_v56 = vadd.f32 %v1800_v60, %v11067_v7  ;;  %v1802_v57 = vpop.f32.mrb[81].mxu0  ;;  %6913 = vmatpush3.bf16.msra.mxu0 %v7961_v45  ;;  %v7959_v7 = vld [vmem:[%s10954_s3 + $0x178] sm:$0xff]  }
 0x1c4   : > { %v1803_v18 = vpop.f32.mrb[82].mxu0  ;;  %v9299_v63 = vpop.f32.mrb[96].mxu1  ;;  %6914 = vmatprep.subr.bf16.mxu0 %v7962_v33  ;;  %7480 = vmatprep.subr.bf16.mxu1 %v7959_v7 }
 0x1c5   : > { %v9294_v62 = vadd.f32 %v1803_v18, %v11068_v0  ;;  %v1805_v50 = vpop.f32.mrb[83].mxu0  ;;  %v2357_v24 = vpop.f32.mrb[97].mxu1  ;;  %7481 = vmatpush3.bf16.msra.mxu1 %v7959_v7 }
 0x1c6   : > { %v9301_v13 = vpop.f32.mrb[98].mxu1  ;;  %v11073_v24 = vld [vmem:[#allocation7_spill] sm:$0xff] }
 0x1c7   : > { %v2360_v52 = vpop.f32.mrb[99].mxu1  ;;  %6915 = vmatpush3.bf16.msra.mxu0 %v7963_v31  ;;  %v7964_v31 = vld [vmem:[%s10954_s3 + $0x138] sm:$0xff]  }
 0x1c8   : > { %6916 = vmatprep.subr.bf16.mxu0 %v7964_v31 }
 0x1ca   : > { %v1808_v43 = vpop.f32.mrb[84].mxu0 }
 0x1cb   : > { %v1809_v54 = vadd.f32 %v1808_v43, %v11069_v25  ;;  %v1810_v12 = vpop.f32.mrb[85].mxu0  ;;  %v2986_v25 = vld [vmem:[#allocation2 + $0x38] sm:$0x10]  ;;  %6917 = vmatpush3.bf16.msra.mxu0 %v7965_v61  ;;  %v2926_v61 = vld [vmem:[#allocation2 + $0x20] sm:$0x8] }
 0x1cc   : > { %v1811_v2 = vpop.f32.mrb[86].mxu0  ;;  %v9313_v8 = vpop.f32.mrb[100].mxu1 }
 0x1cd   : > { %v1812_v27 = vadd.f32 %v1811_v2, %v11070_v11  ;;  %v1813_v23 = vpop.f32.mrb[87].mxu0  ;;  %v2365_v35 = vpop.f32.mrb[101].mxu1  ;;  %v2987_v2 = vsel %vm9248_vm6, 0, %v2986_v25 }
 0x1ce   : > { %v9315_v60 = vpop.f32.mrb[102].mxu1  ;;  %v2984_v23 = vsel %vm9248_vm6, 0, %v2983_v58  ;;  %2988 = vst [vmem:[#allocation2 + $0x38] sm:$0x10] %v2987_v2  ;;  %v2927_v58 = vsel %vm9255_vm7, 0, %v2926_v61 }
 0x1cf   : > { %11071 = vst [vmem:[#allocation10_spill] sm:$0xff] %v9315_v60  ;;  %v2368_v57 = vpop.f32.mrb[103].mxu1  ;;  %2985 = vst [vmem:[#allocation2 + $0x28] sm:$0x10] %v2984_v23 }
 0x1d0   : > { %v11074_v57 = vld [vmem:[#allocation8_spill] sm:$0xff]  ;;  %2928 = vst [vmem:[#allocation2 + $0x20] sm:$0x8] %v2927_v58 }
 0x1d2   : > { %v1816_v18 = vpop.f32.mrb[88].mxu0 }
 0x1d3   : > { %v9321_v0 = vadd.f32 %v1816_v18, %v11072_v46  ;;  %v1818_v50 = vpop.f32.mrb[89].mxu0 }
 0x1d4   : > { %v1819_v45 = vpop.f32.mrb[90].mxu0  ;;  %v9329_v43 = vpop.f32.mrb[104].mxu1 }
 0x1d5   : > { %v9324_v33 = vadd.f32 %v1819_v45, %v11073_v24  ;;  %v1821_v52 = vpop.f32.mrb[91].mxu0  ;;  %v2373_v12 = vpop.f32.mrb[105].mxu1  ;;  %v11075_v45 = vld [vmem:[#allocation9_spill] sm:$0xff] }
 0x1d6   : > { %v9336_v11 = vpop.f32.mrb[106].mxu1 }
 0x1d7   : > { %v2376_v35 = vpop.f32.mrb[107].mxu1 }
 0x1da   : > { %v1824_v7 = vpop.f32.mrb[92].mxu0 }
 0x1db   : > { %v1825_v18 = vadd.f32 %v1824_v7, %v11074_v57  ;;  %v1826_v46 = vpop.f32.mrb[93].mxu0 }
 0x1dc   : > { %v1827_v50 = vpop.f32.mrb[94].mxu0  ;;  %v9342_v31 = vpop.f32.mrb[108].mxu1 }
 0x1dd   : > { %v1828_v24 = vadd.f32 %v1827_v50, %v11075_v45  ;;  %v1829_v52 = vpop.f32.mrb[95].mxu0  ;;  %11076 = vst [vmem:[#allocation11_spill] sm:$0xff] %v9342_v31  ;;  %v2381_v25 = vpop.f32.mrb[109].mxu1 }
 0x1de   : > { %v9344_v12 = vpop.f32.mrb[110].mxu1 }
 0x1df   : > { %11077 = vst [vmem:[#allocation12_spill] sm:$0xff] %v9344_v12  ;;  %v2384_v60 = vpop.f32.mrb[111].mxu1 }
 0x1e2   : > { %v7380_v2 = vpop.f32.mrb[96].mxu0 }
 0x1e3   : > { %v9349_v23 = vadd.f32 %v7380_v2, %v9253_v42  ;;  %v1961_v35 = vpop.f32.mrb[97].mxu0 }
 0x1e4   : > { %v9352_v7 = vadd.f32 %v1961_v35, %v9226_v47  ;;  %v7381_v57 = vpop.f32.mrb[98].mxu0  ;;  %v9360_v60 = vpop.f32.mrb[112].mxu1  ;;  %v7966_v47 = vld [vmem:[%s10954_s3 + $0x40] sm:$0xff]  }
 0x1e5   : > { %v9355_v46 = vadd.f32 %v7381_v57, %v9265_v17  ;;  %v1964_v50 = vpop.f32.mrb[99].mxu0  ;;  %11078 = vst [vmem:[#allocation13_spill] sm:$0xff] %v9360_v60  ;;  %v2389_v52 = vpop.f32.mrb[113].mxu1  ;;  %v2929_v17 = vld [vmem:[#allocation2 + $0x30] sm:$0x8]  ;;  %7038 = vmatprep.subr.bf16.mxu1 %v7966_v47 }
 0x1e6   : > { %v9358_v45 = vadd.f32 %v1964_v50, %v9232_v6  ;;  %v9362_v25 = vpop.f32.mrb[114].mxu1  ;;  %v2930_v57 = vsel %vm9255_vm7, 0, %v2929_v17  ;;  %v2989_v17 = vld [vmem:[#allocation2 + $0x48] sm:$0x10] }
 0x1e7   : > { %11079 = vst [vmem:[#allocation14_spill] sm:$0xff] %v9362_v25  ;;  %v2392_v61 = vpop.f32.mrb[115].mxu1  ;;  %2931 = vst [vmem:[#allocation2 + $0x30] sm:$0x8] %v2930_v57 }
 0x1ea   : > { %v7384_v42 = vpop.f32.mrb[100].mxu0 }
 0x1eb   : > { %v9364_v58 = vadd.f32 %v7384_v42, %v1809_v54  ;;  %v1977_v2 = vpop.f32.mrb[101].mxu0 }
 0x1ec   : > { %v9370_v35 = vadd.f32 %v1977_v2, %v9288_v56  ;;  %v7385_v6 = vpop.f32.mrb[102].mxu0  ;;  %v9379_v61 = vpop.f32.mrb[116].mxu1  ;;  %v2992_v2 = vld [vmem:[#allocation2 + $0x58] sm:$0x10] }
 0x1ed   : > { %v9374_v50 = vadd.f32 %v7385_v6, %v1812_v27  ;;  %v1980_v52 = vpop.f32.mrb[103].mxu0  ;;  %v2397_v42 = vpop.f32.mrb[117].mxu1  ;;  %v2993_v27 = vsel %vm9248_vm6, 0, %v2992_v2  ;;  %v2990_v6 = vsel %vm9248_vm6, 0, %v2989_v17 }
 0x1ee   : > { %v9377_v54 = vadd.f32 %v1980_v52, %v9294_v62  ;;  %v9381_v12 = vpop.f32.mrb[118].mxu1  ;;  %2994 = vst [vmem:[#allocation2 + $0x58] sm:$0x10] %v2993_v27  ;;  %2991 = vst [vmem:[#allocation2 + $0x48] sm:$0x10] %v2990_v6 }
 0x1ef   : > { %11080 = vst [vmem:[#allocation15_spill] sm:$0xff] %v9381_v12  ;;  %v2400_v25 = vpop.f32.mrb[119].mxu1 }
 0x1f2   : > { %v7388_v56 = vpop.f32.mrb[104].mxu0 }
 0x1f3   : > { %v9383_v31 = vadd.f32 %v7388_v56, %v1825_v18  ;;  %v1993_v60 = vpop.f32.mrb[105].mxu0 }
 0x1f4   : > { %v9388_v47 = vadd.f32 %v1993_v60, %v9321_v0  ;;  %v7389_v62 = vpop.f32.mrb[106].mxu0  ;;  %v9397_v52 = vpop.f32.mrb[120].mxu1 }
 0x1f5   : > { %v9392_v57 = vadd.f32 %v7389_v62, %v1828_v24  ;;  %v1996_v25 = vpop.f32.mrb[107].mxu0  ;;  %v2405_v42 = vpop.f32.mrb[121].mxu1 }
 0x1f6   : > { %v9395_v18 = vadd.f32 %v1996_v25, %v9324_v33  ;;  %v9399_v56 = vpop.f32.mrb[122].mxu1 }
 0x1f7   : > { %11081 = vst [vmem:[#allocation16_spill] sm:$0xff] %v9399_v56  ;;  %v2408_v2 = vpop.f32.mrb[123].mxu1 }
 0x1fa   : > { %v7392_v0 = vpop.f32.mrb[108].mxu0 }
 0x1fb   : > { %v9402_v60 = vadd.f32 %v7392_v0, %v9120_v26  ;;  %v2009_v12 = vpop.f32.mrb[109].mxu0  ;;  %v2932_v0 = vld [vmem:[#allocation2 + $0x40] sm:$0x8] }
 0x1fc   : > { %v9405_v17 = vadd.f32 %v2009_v12, %v9107_v15  ;;  %v7393_v24 = vpop.f32.mrb[110].mxu0  ;;  %v9413_v6 = vpop.f32.mrb[124].mxu1 }
 0x1fd   : > { %v9408_v27 = vadd.f32 %v7393_v24, %v9123_v16  ;;  %v2012_v33 = vpop.f32.mrb[111].mxu0  ;;  %11082 = vst [vmem:[#allocation18_spill] sm:$0xff] %v9413_v6  ;;  %v2413_v25 = vpop.f32.mrb[125].mxu1  ;;  %v2933_v16 = vsel %vm9255_vm7, 0, %v2932_v0  ;;  %v2998_v6 = vld [vmem:[#allocation2 + $0x78] sm:$0x10] }
 0x1fe   : > { %v9411_v62 = vadd.f32 %v2012_v33, %v9113_v20  ;;  %v9415_v42 = vpop.f32.mrb[126].mxu1  ;;  %2934 = vst [vmem:[#allocation2 + $0x40] sm:$0x8] %v2933_v16 }
 0x1ff   : > { %11083 = vst [vmem:[#allocation3_spill] sm:$0xff] %v9415_v42  ;;  %v2416_v2 = vpop.f32.mrb[127].mxu1 }
 0x202   : > { %v7396_v26 = vpop.f32.mrb[112].mxu0 }
 0x203   : > { %v9418_v56 = vadd.f32 %v7396_v26, %v9140_v9  ;;  %v2025_v15 = vpop.f32.mrb[113].mxu0 }
 0x204   : > { %v9423_v12 = vadd.f32 %v2025_v15, %v9129_v36  ;;  %v7397_v20 = vpop.f32.mrb[114].mxu0  ;;  %v9431_v2 = vpop.f32.mrb[128].mxu1  ;;  %v2999_v36 = vsel %vm9248_vm6, 0, %v2998_v6 }
 0x205   : > { %11084 = vst [vmem:[#allocation17_spill] sm:$0xff] %v9418_v56  ;;  %v9426_v24 = vadd.f32 %v7397_v20, %v9143_v30  ;;  %v2028_v33 = vpop.f32.mrb[115].mxu0  ;;  %v2421_v9 = vpop.f32.mrb[129].mxu1  ;;  %v2995_v56 = vld [vmem:[#allocation2 + $0x68] sm:$0x10] }
 0x206   : > { %v9429_v25 = vadd.f32 %v2028_v33, %v9132_v38  ;;  %v9433_v26 = vpop.f32.mrb[130].mxu1  ;;  %v2996_v38 = vsel %vm9248_vm6, 0, %v2995_v56  ;;  %3000 = vst [vmem:[#allocation2 + $0x78] sm:$0x10] %v2999_v36  ;;  %v2935_v36 = vld [vmem:[#allocation2 + $0x50] sm:$0x8] }
 0x207   : > { %11085 = vst [vmem:[#allocation4_spill] sm:$0xff] %v9433_v26  ;;  %v2424_v42 = vpop.f32.mrb[131].mxu1  ;;  %2997 = vst [vmem:[#allocation2 + $0x68] sm:$0x10] %v2996_v38 }
 0x20a   : > { %v7400_v0 = vpop.f32.mrb[116].mxu0 }
 0x20b   : > { %v9438_v15 = vadd.f32 %v7400_v0, %v9157_v4  ;;  %v2041_v30 = vpop.f32.mrb[117].mxu0 }
 0x20c   : > { %v9443_v16 = vadd.f32 %v2041_v30, %v9149_v39  ;;  %v7401_v20 = vpop.f32.mrb[118].mxu0  ;;  %v9451_v6 = vpop.f32.mrb[132].mxu1 }
 0x20d   : > { %v9446_v42 = vadd.f32 %v7401_v20, %v9162_v59  ;;  %v2044_v33 = vpop.f32.mrb[119].mxu0  ;;  %11086 = vst [vmem:[#allocation5_spill] sm:$0xff] %v9451_v6  ;;  %v2429_v4 = vpop.f32.mrb[133].mxu1  ;;  %v2936_v59 = vsel %vm9255_vm7, 0, %v2935_v36 }
 0x20e   : > { %v9449_v9 = vadd.f32 %v2044_v33, %v9151_v29  ;;  %v9453_v0 = vpop.f32.mrb[134].mxu1  ;;  %2937 = vst [vmem:[#allocation2 + $0x50] sm:$0x8] %v2936_v59 }
 0x20f   : > { %11087 = vst [vmem:[#allocation6_spill] sm:$0xff] %v9453_v0  ;;  %v2432_v26 = vpop.f32.mrb[135].mxu1 }
 0x212   : > { %v7404_v56 = vpop.f32.mrb[120].mxu0 }
 0x213   : > { %v9456_v39 = vadd.f32 %v7404_v56, %v9176_v32  ;;  %v2057_v30 = vpop.f32.mrb[121].mxu0 }
 0x214   : > { %v9461_v38 = vadd.f32 %v2057_v30, %v9168_v48  ;;  %v7405_v29 = vpop.f32.mrb[122].mxu0  ;;  %v9469_v4 = vpop.f32.mrb[136].mxu1 }
 0x215   : > { %v9464_v20 = vadd.f32 %v7405_v29, %v9181_v55  ;;  %v2060_v33 = vpop.f32.mrb[123].mxu0  ;;  %v2437_v32 = vpop.f32.mrb[137].mxu1 }
 0x216   : > { %v9467_v26 = vadd.f32 %v2060_v33, %v9170_v37  ;;  %v9471_v56 = vpop.f32.mrb[138].mxu1 }
 0x217   : > { %v2440_v0 = vpop.f32.mrb[139].mxu1 }
 0x218   : > { %11088 = vst [vmem:[#allocation7_spill] sm:$0xff] %v9467_v26 }
 0x21a   : > { %v7408_v6 = vpop.f32.mrb[124].mxu0 }
 0x21b   : > { %v9474_v36 = vadd.f32 %v7408_v6, %v9196_v51  ;;  %v2073_v48 = vpop.f32.mrb[125].mxu0  ;;  %v3004_v6 = vld [vmem:[#allocation2 + $0x98] sm:$0x10] }
 0x21c   : > { %v9477_v30 = vadd.f32 %v2073_v48, %v9190_v10  ;;  %v7409_v55 = vpop.f32.mrb[126].mxu0  ;;  %v9485_v33 = vpop.f32.mrb[140].mxu1  ;;  %v3001_v48 = vld [vmem:[#allocation2 + $0x88] sm:$0x10] }
 0x21d   : > { %11089 = vst [vmem:[#allocation8_spill] sm:$0xff] %v9474_v36  ;;  %v9480_v59 = vadd.f32 %v7409_v55, %v9201_v22  ;;  %v2076_v37 = vpop.f32.mrb[127].mxu0  ;;  %v2445_v32 = vpop.f32.mrb[141].mxu1  ;;  %v3005_v22 = vsel %vm9248_vm6, 0, %v3004_v6  ;;  %v2971_v6 = vld [vmem:[#allocation2 + $0x110] sm:$0x8] }
 0x21e   : > { %v9483_v29 = vadd.f32 %v2076_v37, %v9192_v14  ;;  %v9487_v0 = vpop.f32.mrb[142].mxu1  ;;  %v3002_v37 = vsel %vm9248_vm6, 0, %v3001_v48  ;;  %3006 = vst [vmem:[#allocation2 + $0x98] sm:$0x10] %v3005_v22  ;;  %v2938_v22 = vld [vmem:[#allocation2 + $0x60] sm:$0x8] }
 0x21f   : > { %v2448_v26 = vpop.f32.mrb[143].mxu1  ;;  %3003 = vst [vmem:[#allocation2 + $0x88] sm:$0x10] %v3002_v37 }
 0x220   : > { %11090 = vst [vmem:[#allocation9_spill] sm:$0xff] %v9483_v29  ;;  %v3028_v29 = vld [vmem:[#allocation2 + $0x118] sm:$0x10] }
 0x221   : > { %v3029_v48 = vsel %vm9248_vm6, 0, %v3028_v29 }
 0x222   : > { %v7412_v51 = vpop.f32.mrb[128].mxu0  ;;  %3030 = vst [vmem:[#allocation2 + $0x118] sm:$0x10] %v3029_v48 }
 0x223   : > { %v9490_v36 = vadd.f32 %v7412_v51, %v9211_v19  ;;  %v2089_v10 = vpop.f32.mrb[129].mxu0 }
 0x224   : > { %v9495_v55 = vadd.f32 %v2089_v10, %v9205_v41  ;;  %v7413_v14 = vpop.f32.mrb[130].mxu0  ;;  %v9505_v51 = vpop.f32.mrb[144].mxu1  ;;  %v2972_v10 = vsel %vm9255_vm7, 0, %v2971_v6 }
 0x225   : > { %11091 = vst [vmem:[#allocation19_spill] sm:$0xff] %v9490_v36  ;;  %v9500_v26 = vadd.f32 %v7413_v14, %v9215_v21  ;;  %v2092_v32 = vpop.f32.mrb[131].mxu0  ;;  %v2453_v36 = vpop.f32.mrb[145].mxu1  ;;  %2973 = vst [vmem:[#allocation2 + $0x110] sm:$0x8] %v2972_v10 }
 0x226   : > { %11092 = vst [vmem:[#allocation20_spill] sm:$0xff] %v9495_v55  ;;  %v9503_v19 = vadd.f32 %v2092_v32, %v9207_v28  ;;  %v9507_v41 = vpop.f32.mrb[146].mxu1  ;;  %v2939_v28 = vsel %vm9255_vm7, 0, %v2938_v22  ;;  %v9519_v32 = vld [vmem:[%s10955_s4] ss:$0 sm:$0xff] }
 0x227   : > { %11093 = vst [vmem:[#allocation21_spill] sm:$0xff] %v9500_v26  ;;  %v2456_v21 = vpop.f32.mrb[147].mxu1  ;;  %2940 = vst [vmem:[#allocation2 + $0x60] sm:$0x8] %v2939_v28  ;;  %v9527_v22 = vld [vmem:[%s10956_s5] ss:$0 sm:$0xff] }
 0x228   : > { %11094 = vst [vmem:[#allocation22_spill] sm:$0xff] %v9503_v19 }
 0x22a   : > { %v7432_v14 = vpop.f32.mrb[132].mxu0 }
 0x22b   : > { %v2517_v36 = vadd.f32 %v7432_v14, %v9237_v34  ;;  %v2508_v37 = vpop.f32.mrb[133].mxu0 }
 0x22c   : > { %v2509_v6 = vadd.f32 %v2508_v37, %v9213_v5  ;;  %v7433_v29 = vpop.f32.mrb[134].mxu0  ;;  %v9531_v28 = vpop.f32.mrb[148].mxu1 }
 0x22d   : > { %v2653_v10 = vadd.f32 %v2517_v36, %v9349_v23  ;;  %v2520_v48 = vadd.f32 %v7433_v29, %v9239_v1  ;;  %v2511_v21 = vpop.f32.mrb[135].mxu0  ;;  %v2461_v37 = vpop.f32.mrb[149].mxu1 }
 0x22e   : > { %v2651_v34 = vadd.f32 %v2509_v6, %v9352_v7  ;;  %v2512_v14 = vadd.f32 %v2511_v21, %v9217_v40  ;;  %v9537_v36 = vpop.f32.mrb[150].mxu1  ;;  %v2941_v6 = vld [vmem:[#allocation2 + $0x70] sm:$0x8] }
 0x22f   : > { %v2696_v19 = vmul.f32 %v9519_v32, %v2653_v10  ;;  %v2654_v5 = vadd.f32 %v2520_v48, %v9355_v46  ;;  %11095 = vst [vmem:[#allocation23_spill] sm:$0xff] %v9537_v36  ;;  %v2464_v7 = vpop.f32.mrb[151].mxu1  ;;  %v2942_v46 = vsel %vm9255_vm7, 0, %v2941_v6 }
 0x230   : > { %v2694_v23 = vmul.f32 %v9519_v32, %v2651_v34  ;;  %v2652_v1 = vadd.f32 %v2512_v14, %v9358_v45  ;;  %2943 = vst [vmem:[#allocation2 + $0x70] sm:$0x8] %v2942_v46 }
 0x231   : > { %v2739_v29 = vadd.f32 %v9527_v22, %v2696_v19  ;;  %v2697_v26 = vmul.f32 %v9519_v32, %v2654_v5 }
 0x232   : > { %v2737_v40 = vadd.f32 %v9527_v22, %v2694_v23  ;;  %v2695_v21 = vmul.f32 %v9519_v32, %v2652_v1  ;;  %v7436_v10 = vpop.f32.mrb[136].mxu0 }
 0x233   : > { %v2740_v48 = vadd.f32 %v9527_v22, %v2697_v26  ;;  %v2533_v45 = vadd.f32 %v7436_v10, %v9299_v63  ;;  %v2524_v34 = vpop.f32.mrb[137].mxu0  ;;  %v2775_v37 = vmax.f32 %v2739_v29, 0.0 }
 0x234   : > { %v2738_v19 = vadd.f32 %v9527_v22, %v2695_v21  ;;  %v2525_v14 = vadd.f32 %v2524_v34, %v9277_v44  ;;  %v7437_v5 = vpop.f32.mrb[138].mxu0  ;;  %v2773_v55 = vmax.f32 %v2737_v40, 0.0  ;;  %v9553_v10 = vpop.f32.mrb[152].mxu1  ;;  %v3010_v40 = vld [vmem:[#allocation2 + $0xb8] sm:$0x10] }
 0x235   : > { %v2776_v7 = vmax.f32 %v2740_v48, 0.0  ;;  %v2657_v23 = vadd.f32 %v2533_v45, %v9364_v58  ;;  %v2536_v1 = vadd.f32 %v7437_v5, %v9301_v13  ;;  %v2527_v36 = vpop.f32.mrb[139].mxu0  ;;  %v2469_v29 = vpop.f32.mrb[153].mxu1 }
 0x236   : > { %v2774_v6 = vmax.f32 %v2738_v19, 0.0  ;;  %v2655_v26 = vadd.f32 %v2525_v14, %v9370_v35  ;;  %v2528_v63 = vadd.f32 %v2527_v36, %v9279_v53  ;;  %v9559_v45 = vpop.f32.mrb[154].mxu1  ;;  %v3007_v36 = vld [vmem:[#allocation2 + $0xa8] sm:$0x10]  ;;  %v3011_v19 = vsel %vm9248_vm6, 0, %v3010_v40 }
 0x237   : > { %v2810_v46 = vpack.c.bf16 %v2776_v7, %v2775_v37  ;;  %v2700_v21 = vmul.f32 %v9519_v32, %v2657_v23  ;;  %v2658_v44 = vadd.f32 %v2536_v1, %v9374_v50  ;;  %v2472_v14 = vpop.f32.mrb[155].mxu1  ;;  %3012 = vst [vmem:[#allocation2 + $0xb8] sm:$0x10] %v3011_v19 }
 0x238   : > { %v2809_v48 = vpack.c.bf16 %v2774_v6, %v2773_v55  ;;  %v2698_v58 = vmul.f32 %v9519_v32, %v2655_v26  ;;  %v2656_v13 = vadd.f32 %v2528_v63, %v9377_v54  ;;  %v3008_v54 = vsel %vm9248_vm6, 0, %v3007_v36 }
 0x239   : > { %v2846_v34 = vrot.slane %v2810_v46, 4  ;;  %v2743_v35 = vadd.f32 %v9527_v22, %v2700_v21  ;;  %v2701_v53 = vmul.f32 %v9519_v32, %v2658_v44  ;;  %3009 = vst [vmem:[#allocation2 + $0xa8] sm:$0x10] %v3008_v54  ;;  %v11096_v21 = vmov 0  }
 0x23a   : > { %v2845_v50 = vrot.slane %v2809_v48, 4  ;;  %v2741_v55 = vadd.f32 %v9527_v22, %v2698_v58  ;;  %v2699_v5 = vmul.f32 %v9519_v32, %v2656_v13  ;;  %v7440_v37 = vpop.f32.mrb[140].mxu0  ;;  %v2944_v13 = vld [vmem:[#allocation2 + $0x80] sm:$0x8] }
 0x23b   : > { %2883 = vst [vmem:[#allocation2 + $0x18] ss:$-4 sps:$4 sm:$0xff] %v2846_v34   ;;  %v2744_v7 = vadd.f32 %v9527_v22, %v2701_v53  ;;  %v2549_v23 = vadd.f32 %v7440_v37, %v9329_v43  ;;  %v2540_v1 = vpop.f32.mrb[141].mxu0  ;;  %v2779_v6 = vmax.f32 %v2743_v35, 0.0  ;;  %v11097_v35 = vld [vmem:[#allocation10_spill] sm:$0xff] }
 0x23c   : > { %2881 = vst [vmem:[#allocation2 + $0x8] ss:$-4 sps:$4 sm:$0xff] %v2845_v50   ;;  %v2742_v26 = vadd.f32 %v9527_v22, %v2699_v5  ;;  %v2541_v63 = vadd.f32 %v2540_v1, %v9313_v8  ;;  %v7441_v46 = vpop.f32.mrb[142].mxu0  ;;  %v2777_v44 = vmax.f32 %v2741_v55, 0.0  ;;  %v2945_v8 = vsel %vm9255_vm7, 0, %v2944_v13 }
 0x23d   : > { %3035 = vst [vmem:[#allocation2] sm:$0xff] %v11096_v21  ;;  %3036 = vst [vmem:[#allocation2 + $0x8] sm:$0xff] %v11096_v21  ;;  %v2780_v29 = vmax.f32 %v2744_v7, 0.0  ;;  %v2661_v48 = vadd.f32 %v2549_v23, %v9383_v31  ;;  %v2552_v58 = vadd.f32 %v7441_v46, %v9336_v11  ;;  %v2543_v43 = vpop.f32.mrb[143].mxu0 }
 0x23e   : > { %v2778_v40 = vmax.f32 %v2742_v26, 0.0  ;;  %v2659_v34 = vadd.f32 %v2541_v63, %v9388_v47  ;;  %v2544_v53 = vadd.f32 %v2543_v43, %v11097_v35  ;;  %2946 = vst [vmem:[#allocation2 + $0x80] sm:$0x8] %v2945_v8  ;;  %v11098_v63 = vld [vmem:[#allocation13_spill] sm:$0xff]  ;;  %v11100_v35 = vld [vmem:[#allocation14_spill] sm:$0xff] }
 0x23f   : > { %v2812_v36 = vpack.c.bf16 %v2780_v29, %v2779_v6  ;;  %v2704_v19 = vmul.f32 %v9519_v32, %v2661_v48  ;;  %v2662_v14 = vadd.f32 %v2552_v58, %v9392_v57  ;;  %v11099_v48 = vld [vmem:[#allocation11_spill] sm:$0xff] }
 0x240   : > { %v2811_v50 = vpack.c.bf16 %v2778_v40, %v2777_v44  ;;  %v2702_v31 = vmul.f32 %v9519_v32, %v2659_v34  ;;  %v2660_v11 = vadd.f32 %v2544_v53, %v9395_v18 }
 0x241   : > { %v2848_v55 = vrot.slane %v2812_v36, 4  ;;  %v2747_v5 = vadd.f32 %v9527_v22, %v2704_v19  ;;  %v2705_v47 = vmul.f32 %v9519_v32, %v2662_v14 }
 0x242   : > { %v2847_v37 = vrot.slane %v2811_v50, 4  ;;  %v2745_v54 = vadd.f32 %v9527_v22, %v2702_v31  ;;  %v2703_v7 = vmul.f32 %v9519_v32, %v2660_v11  ;;  %v7444_v23 = vpop.f32.mrb[144].mxu0  ;;  %v9589_v1 = vld [vmem:[#allocation2 + $0x10] sm:$0xf0]  ;;  %v3095_v57 = vld [vmem:[#allocation2 + $0x18] sm:$0x1f] }
 0x243   : > { %2887 = vst [vmem:[#allocation2 + $0x38] ss:$-4 sps:$4 sm:$0xff] %v2848_v55   ;;  %v2783_v6 = vmax.f32 %v2747_v5, 0.0  ;;  %v2748_v26 = vadd.f32 %v9527_v22, %v2705_v47  ;;  %v2565_v18 = vadd.f32 %v7444_v23, %v11098_v63  ;;  %v2556_v46 = vpop.f32.mrb[145].mxu0  ;;  %v3421_v21 = vrot.slane %v9589_v1, 1  ;;  %v11101_v50 = vld [vmem:[#allocation12_spill] sm:$0xff] }
 0x244   : > { %2885 = vst [vmem:[#allocation2 + $0x28] ss:$-4 sps:$4 sm:$0xff] %v2847_v37   ;;  %v2781_v44 = vmax.f32 %v2745_v54, 0.0  ;;  %v2746_v29 = vadd.f32 %v9527_v22, %v2703_v7  ;;  %v2557_v58 = vadd.f32 %v2556_v46, %v11099_v48  ;;  %v7445_v43 = vpop.f32.mrb[146].mxu0  ;;  %v3422_v13 = vrot.slane %v3095_v57, 1 }
 0x245   : > { %v2784_v40 = vmax.f32 %v2748_v26, 0.0  ;;  %v2665_v34 = vadd.f32 %v2565_v18, %v9402_v60  ;;  %v2568_v53 = vadd.f32 %v7445_v43, %v11100_v35  ;;  %v2559_v8 = vpop.f32.mrb[147].mxu0  ;;  %v3128_v36 = vshrl.u32 %v9589_v1, 16 }
 0x246   : > { %v2782_v19 = vmax.f32 %v2746_v29, 0.0  ;;  %v2663_v14 = vadd.f32 %v2557_v58, %v9405_v17  ;;  %v2560_v31 = vadd.f32 %v2559_v8, %v11101_v50  ;;  %v3423_v11 = vsel %vm930_vm0, %v3421_v21, %v3422_v13  ;;  %v11103_v50 = vld [vmem:[#allocation16_spill] sm:$0xff] }
 0x247   : > { %v2814_v55 = vpack.c.bf16 %v2784_v40, %v2783_v6  ;;  %v2708_v5 = vmul.f32 %v9519_v32, %v2665_v34  ;;  %v2666_v47 = vadd.f32 %v2568_v53, %v9408_v27  ;;  %v3548_v37 = vshrl.u32 %v3423_v11, 16 }
 0x248   : > { %v2813_v54 = vpack.c.bf16 %v2782_v19, %v2781_v44  ;;  %v2706_v60 = vmul.f32 %v9519_v32, %v2663_v14  ;;  %v2664_v7 = vadd.f32 %v2560_v31, %v9411_v62  ;;  %v3551_v23 = vshll.u32 %v3423_v11, 16  ;;  %v11102_v19 = vld [vmem:[#allocation17_spill] sm:$0xff] }
 0x249   : > { %v2850_v57 = vrot.slane %v2814_v55, 4  ;;  %v2751_v26 = vadd.f32 %v9527_v22, %v2708_v5  ;;  %v2709_v17 = vmul.f32 %v9519_v32, %v2666_v47  ;;  %v3550_v63 = vrot.slane %v3548_v37, 3  ;;  %v11104_v47 = vld [vmem:[#allocation15_spill] sm:$0xff] }
 0x24a   : > { %v2849_v18 = vrot.slane %v2813_v54, 4  ;;  %v2749_v6 = vadd.f32 %v9527_v22, %v2706_v60  ;;  %v2707_v46 = vmul.f32 %v9519_v32, %v2664_v7  ;;  %v7448_v21 = vpop.f32.mrb[148].mxu0  ;;  %v3553_v27 = vrot.slane %v3551_v23, 4 }
 0x24b   : > { %2891 = vst [vmem:[#allocation2 + $0x58] ss:$-4 sps:$4 sm:$0xff] %v2850_v57   ;;  %v2787_v44 = vmax.f32 %v2751_v26, 0.0  ;;  %v2752_v29 = vadd.f32 %v9527_v22, %v2709_v17  ;;  %v2581_v62 = vadd.f32 %v7448_v21, %v9397_v52  ;;  %v2572_v48 = vpop.f32.mrb[149].mxu0  ;;  %v3556_v58 = vshrl.u32 %v3422_v13, 16 }
 0x24c   : > { %2889 = vst [vmem:[#allocation2 + $0x48] ss:$-4 sps:$4 sm:$0xff] %v2849_v18   ;;  %v2785_v43 = vmax.f32 %v2749_v6, 0.0  ;;  %v2750_v40 = vadd.f32 %v9527_v22, %v2707_v46  ;;  %v2573_v34 = vadd.f32 %v2572_v48, %v9379_v61  ;;  %v7449_v35 = vpop.f32.mrb[150].mxu0  ;;  %v3554_v53 = vor.u32 %v3553_v27, %v3550_v63  ;;  %v3043_v18 = vld [vmem:[#allocation2 + $0x18] sm:$0xf] }
 0x24d   : > { %v2788_v8 = vmax.f32 %v2752_v29, 0.0  ;;  %v2669_v14 = vadd.f32 %v2581_v62, %v11102_v19  ;;  %v2584_v31 = vadd.f32 %v7449_v35, %v11103_v50  ;;  %v2575_v11 = vpop.f32.mrb[151].mxu0  ;;  %v3558_v55 = vrot.slane %v3556_v58, 3  ;;  %v3042_v62 = vld [vmem:[#allocation2 + $0x10] sm:$0xf8] }
 0x24e   : > { %v2786_v5 = vmax.f32 %v2750_v40, 0.0  ;;  %v2667_v52 = vadd.f32 %v2573_v34, %v9423_v12  ;;  %v2576_v37 = vadd.f32 %v2575_v11, %v11104_v47  ;;  %v3559_v54 = vshll.u32 %v3422_v13, 16 }
 0x24f   : > { %v2816_v60 = vpack.c.bf16 %v2788_v8, %v2787_v44  ;;  %v2712_v7 = vmul.f32 %v9519_v32, %v2669_v14  ;;  %v2670_v61 = vadd.f32 %v2584_v31, %v9426_v24  ;;  %v3130_v23 = vshll.u32 %v9589_v1, 16 }
 0x250   : > { %v2815_v57 = vpack.c.bf16 %v2786_v5, %v2785_v43  ;;  %v2710_v26 = vmul.f32 %v9519_v32, %v2667_v52  ;;  %v2668_v17 = vadd.f32 %v2576_v37, %v9429_v25  ;;  %v3561_v63 = vrot.slane %v3559_v54, 4 }
 0x251   : > { %v2852_v6 = vrot.slane %v2816_v60, 4  ;;  %v2755_v12 = vadd.f32 %v9527_v22, %v2712_v7  ;;  %v2713_v46 = vmul.f32 %v9519_v32, %v2670_v61  ;;  %v3132_v13 = vrot.slane %v3130_v23, 1 }
 0x252   : > { %v2851_v21 = vrot.slane %v2815_v57, 4  ;;  %v2753_v27 = vadd.f32 %v9527_v22, %v2710_v26  ;;  %v2711_v24 = vmul.f32 %v9519_v32, %v2668_v17  ;;  %v3562_v44 = vor.u32 %v3561_v63, %v3558_v55  ;;  %v7452_v29 = vpop.f32.mrb[152].mxu0 }
 0x253   : > { %2895 = vst [vmem:[#allocation2 + $0x78] ss:$-4 sps:$4 sm:$0xff] %v2852_v6   ;;  %v2791_v48 = vmax.f32 %v2755_v12, 0.0  ;;  %v2756_v25 = vadd.f32 %v9527_v22, %v2713_v46  ;;  %v3133_v58 = vor.u32 %v3132_v13, %v3128_v36  ;;  %v3135_v43 = vshll.u32 %v3043_v18, 16  ;;  %v2588_v40 = vpop.f32.mrb[153].mxu0 }
 0x254   : > { %2893 = vst [vmem:[#allocation2 + $0x68] ss:$-4 sps:$4 sm:$0xff] %v2851_v21   ;;  %v2789_v34 = vmax.f32 %v2753_v27, 0.0  ;;  %v2754_v35 = vadd.f32 %v9527_v22, %v2711_v24  ;;  %v9632_v8 = vsel %vm2975_vm5, %v3554_v53, %v3562_v44  ;;  %v3139_v19 = vshrl.u32 %v3043_v18, 16  ;;  %v7453_v14 = vpop.f32.mrb[154].mxu0 }
 0x255   : > { %v2792_v50 = vmax.f32 %v2756_v25, 0.0  ;;  %7482 = vmatprep.mubr.bf16.mxu1 %v9632_v8  ;;  %v3137_v31 = vrot.slane %v3135_v43, 1  ;;  %v2597_v11 = vadd.f32 %v7452_v29, %v9431_v2  ;;  %v3519_v55 = vshrl.u32 %v3042_v62, 16  ;;  %v2591_v1 = vpop.f32.mrb[155].mxu0  ;;  %v9639_v18 = vld [vmem:[#allocation2 + $0x20] sm:$0xf0] }
 0x256   : > { %v2790_v36 = vmax.f32 %v2754_v35, 0.0  ;;  %v3522_v5 = vshll.u32 %v3042_v62, 16  ;;  %v3526_v52 = vrot.slane %v3139_v19, 3  ;;  %v3527_v47 = vrot.slane %v3135_v43, 4  ;;  %v3096_v29 = vld [vmem:[#allocation2 + $0x28] sm:$0x1f] }
 0x257   : > { %v2818_v37 = vpack.c.bf16 %v2792_v50, %v2791_v48  ;;  %v3138_v54 = vsel %vm669_vm1, %v3133_v58, %v3137_v31  ;;  %v3141_v60 = vor.u32 %v3139_v19, %v3137_v31  ;;  %v2673_v53 = vadd.f32 %v2597_v11, %v9438_v15  ;;  %v11105_v58 = vld [vmem:[#allocation18_spill] sm:$0xff]  ;;  %v9648_v19 = vld [vmem:[#allocation2 + $0x30] sm:$0xf0] }
 0x258   : > { %v2817_v7 = vpack.c.bf16 %v2790_v36, %v2789_v34  ;;  %v3531_v61 = vshrl.u32 %v3138_v54, 16  ;;  %v3534_v23 = vshll.u32 %v3138_v54, 16  ;;  %v3521_v57 = vrot.slane %v3519_v55, 3  ;;  %v11106_v34 = vld [vmem:[#allocation4_spill] sm:$0xff]  ;;  %v3097_v50 = vld [vmem:[#allocation2 + $0x38] sm:$0x1f] }
 0x259   : > { %v2854_v26 = vrot.slane %v2818_v37, 4  ;;  %v3539_v17 = vshrl.u32 %v3141_v60, 16  ;;  %v3542_v63 = vshll.u32 %v3141_v60, 16  ;;  %v2716_v2 = vmul.f32 %v9519_v32, %v2673_v53  ;;  %v11107_v36 = vld [vmem:[#allocation3_spill] sm:$0xff] }
 0x25a   : > { %v2853_v6 = vrot.slane %v2817_v7, 4  ;;  %v3533_v12 = vrot.slane %v3531_v61, 3  ;;  %v3536_v46 = vrot.slane %v3534_v23, 4  ;;  %v3524_v13 = vrot.slane %v3522_v5, 4  ;;  %v9641_v21 = vpop.f32.mrb[156].mxu0 }
 0x25b   : > { %2899 = vst [vmem:[#allocation2 + $0x98] ss:$-4 sps:$4 sm:$0xff] %v2854_v26   ;;  %v3541_v27 = vrot.slane %v3539_v17, 3  ;;  %v3544_v15 = vrot.slane %v3542_v63, 4  ;;  %v2759_v24 = vadd.f32 %v9527_v22, %v2716_v2  ;;  %v3528_v44 = vor.u32 %v3527_v47, %v3526_v52  ;;  %v9644_v62 = vpop.f32.mrb[157].mxu0 }
 0x25c   : > { %2897 = vst [vmem:[#allocation2 + $0x88] ss:$-4 sps:$4 sm:$0xff] %v2853_v6   ;;  %v3537_v48 = vor.u32 %v3536_v46, %v3533_v12  ;;  %v3525_v25 = vor.u32 %v3524_v13, %v3521_v57  ;;  %v2589_v43 = vadd.f32 %v2588_v40, %v11105_v58  ;;  %v2600_v35 = vadd.f32 %v7453_v14, %v11106_v34  ;;  %v9650_v31 = vpop.f32.mrb[158].mxu0 }
 0x25d   : > { %v3545_v11 = vor.u32 %v3544_v15, %v3541_v27  ;;  %v2795_v55 = vmax.f32 %v2759_v24, 0.0  ;;  %v2592_v5 = vadd.f32 %v2591_v1, %v11107_v36  ;;  %v3424_v52 = vrot.slane %v9639_v18, 1  ;;  %v9654_v47 = vpop.f32.mrb[159].mxu0  ;;  %v7967_v36 = vld [vmem:[%s10954_s3] sm:$0xff]  }
 0x25e   : > { %v9657_v37 = vsel %vm2975_vm5, %v3525_v25, %v3528_v44  ;;  %v2671_v40 = vadd.f32 %v2589_v43, %v9443_v16  ;;  %v2674_v14 = vadd.f32 %v2600_v35, %v9446_v42  ;;  %v3425_v54 = vrot.slane %v3096_v29, 1 }
 0x25f   : > { %v9662_v60 = vsel %vm2975_vm5, %v3537_v48, %v3545_v11  ;;  %v2672_v53 = vadd.f32 %v2592_v5, %v9449_v9  ;;  %v3427_v7 = vrot.slane %v9648_v19, 1  ;;  %v3428_v1 = vrot.slane %v3097_v50, 1 }
 0x260   : > { %4578 = vmatprep.mubr.bf16.mxu0 %v9662_v60  ;;  %v2714_v61 = vmul.f32 %v9519_v32, %v2671_v40  ;;  %v2717_v23 = vmul.f32 %v9519_v32, %v2674_v14  ;;  %v3426_v57 = vsel %vm930_vm0, %v3424_v52, %v3425_v54  ;;  %v3602_v16 = vshrl.u32 %v3425_v54, 16 }
 0x261   : > { %4579 = vmatmul.mubr.bf16.vlgmr.msra.gmra.mrb[168].mxu0 %v9657_v37  ;;  %v2715_v42 = vmul.f32 %v9519_v32, %v2672_v53  ;;  %v3594_v26 = vshrl.u32 %v3426_v57, 16  ;;  %v3597_v17 = vshll.u32 %v3426_v57, 16  ;;  %v3605_v63 = vshll.u32 %v3425_v54, 16  ;;  %v3045_v53 = vld [vmem:[#allocation2 + $0x28] sm:$0xf] }
 0x262   : > { %v2757_v9 = vadd.f32 %v9527_v22, %v2714_v61  ;;  %v2760_v2 = vadd.f32 %v9527_v22, %v2717_v23  ;;  %v3604_v6 = vrot.slane %v3602_v16, 3  ;;  %v3429_v12 = vsel %vm930_vm0, %v3427_v7, %v3428_v1  ;;  %v9675_v46 = vpop.f32.mrb[160].mxu0  ;;  %v7968_v7 = vld [vmem:[%s10954_s3 + $0x48] sm:$0xff]  }
 0x263   : > { %v2758_v13 = vadd.f32 %v9527_v22, %v2715_v42  ;;  %v3596_v27 = vrot.slane %v3594_v26, 3  ;;  %v3599_v15 = vrot.slane %v3597_v17, 4  ;;  %v3607_v24 = vrot.slane %v3605_v63, 4  ;;  %v9678_v44 = vpop.f32.mrb[161].mxu0  ;;  %v3044_v42 = vld [vmem:[#allocation2 + $0x20] sm:$0xf8] }
 0x264   : > { %v2793_v29 = vmax.f32 %v2757_v9, 0.0  ;;  %v2796_v48 = vmax.f32 %v2760_v2, 0.0  ;;  %v3640_v25 = vshrl.u32 %v3429_v12, 16  ;;  %v3643_v58 = vshll.u32 %v3429_v12, 16  ;;  %v9680_v43 = vpop.f32.mrb[162].mxu0  ;;  %v7969_v12 = vld [vmem:[%s10954_s3 + $0x8] sm:$0xff]  }
 0x265   : > { %v2794_v34 = vmax.f32 %v2758_v13, 0.0  ;;  %v3600_v35 = vor.u32 %v3599_v15, %v3596_v27  ;;  %v3608_v50 = vor.u32 %v3607_v24, %v3604_v6  ;;  %v3648_v11 = vshrl.u32 %v3428_v1, 16  ;;  %v9685_v5 = vpop.f32.mrb[163].mxu0  ;;  %v11108_v27 = vld [vmem:[#allocation5_spill] sm:$0xff] }
 0x266   : > { %v2820_v52 = vpack.c.bf16 %v2796_v48, %v2795_v55  ;;  %v3642_v40 = vrot.slane %v3640_v25, 3  ;;  %v3645_v14 = vrot.slane %v3643_v58, 4  ;;  %v3651_v54 = vshll.u32 %v3428_v1, 16 }
 0x267   : > { %v2819_v61 = vpack.c.bf16 %v2794_v34, %v2793_v29  ;;  %v9691_v23 = vsel %vm2975_vm5, %v3600_v35, %v3608_v50  ;;  %v3650_v57 = vrot.slane %v3648_v11, 3  ;;  %v2613_v16 = vadd.f32 %v9641_v21, %v9469_v4  ;;  %v7982_v4 = vld [vmem:[%s10954_s3 + $0x1c0] sm:$0xff]  }
 0x268   : > { %v2856_v26 = vrot.slane %v2820_v52, 4  ;;  %7483 = vmatmul.mubr.bf16.vlgmr.msra.gmra.mrb[156].mxu1 %v9691_v23  ;;  %v3646_v55 = vor.u32 %v3645_v14, %v3642_v40  ;;  %v3653_v17 = vrot.slane %v3651_v54, 4  ;;  %v3143_v1 = vshrl.u32 %v9639_v18, 16  ;;  %v7983_v29 = vld [vmem:[%s10954_s3 + $0x180] sm:$0xff]   ;;  %7174 = vmatprep.subr.bf16.mxu0 %v7982_v4 }
 0x269   : > { %v2855_v63 = vrot.slane %v2819_v61, 4  ;;  %7039 = vmatpush3.bf16.msra.mxu1 %v7967_v36  ;;  %v2677_v9 = vadd.f32 %v2613_v16, %v9456_v39  ;;  %v3145_v2 = vshll.u32 %v9639_v18, 16  ;;  %v3150_v6 = vshll.u32 %v3045_v53, 16  ;;  %v7970_v39 = vld [vmem:[%s10954_s3 + $0x50] sm:$0xff]   ;;  %7175 = vmatpush3.bf16.msra.mxu0 %v7983_v29 }
 0x26a   : > { %2903 = vst [vmem:[#allocation2 + $0xb8] ss:$-4 sps:$4 sm:$0xff] %v2856_v26   ;;  %v3654_v21 = vor.u32 %v3653_v17, %v3650_v57  ;;  %v3154_v13 = vshrl.u32 %v3045_v53, 16  ;;  %v2605_v15 = vadd.f32 %v9644_v62, %v11108_v27  ;;  %v3565_v24 = vshrl.u32 %v3044_v42, 16  ;;  %7040 = vmatprep.subr.bf16.mxu1 %v7968_v7  ;;  %v9710_v18 = vpop.f32.mrb[164].mxu0  ;;  %v7971_v7 = vld [vmem:[%s10954_s3 + $0x10] sm:$0xff]  }
 0x26b   : > { %2901 = vst [vmem:[#allocation2 + $0xa8] ss:$-4 sps:$4 sm:$0xff] %v2855_v63   ;;  %v2720_v48 = vmul.f32 %v9519_v32, %v2677_v9  ;;  %v3147_v25 = vrot.slane %v3145_v2, 1  ;;  %v3152_v58 = vrot.slane %v3150_v6, 1  ;;  %v3568_v34 = vshll.u32 %v3044_v42, 16  ;;  %v9716_v35 = vpop.f32.mrb[165].mxu0 }
 0x26c   : > { %v9719_v62 = vsel %vm2975_vm5, %v3646_v55, %v3654_v21  ;;  %v2675_v50 = vadd.f32 %v2605_v15, %v9461_v38  ;;  %v3567_v11 = vrot.slane %v3565_v24, 3  ;;  %v3572_v36 = vrot.slane %v3154_v13, 3  ;;  %v9722_v52 = vpop.f32.mrb[166].mxu0  ;;  %v7972_v26 = vld [vmem:[%s10954_s3 + $0x58] sm:$0xff]   ;;  %v9748_v27 = vld [vmem:[#allocation2 + $0x40] sm:$0xf0] }
 0x26d   : > { %7486 = vmatprep.mubr.bf16.mxu1 %v9719_v62  ;;  %v9726_v40 = vadd.f32 %v9527_v22, %v2720_v48  ;;  %v3148_v14 = vor.u32 %v3147_v25, %v3143_v1  ;;  %v3156_v54 = vor.u32 %v3154_v13, %v3152_v58  ;;  %v3570_v53 = vrot.slane %v3568_v34, 4  ;;  %7041 = vmatpush3.bf16.msra.mxu1 %v7969_v12  ;;  %v9731_v61 = vpop.f32.mrb[167].mxu0  ;;  %v7973_v15 = vld [vmem:[%s10954_s3 + $0x18] sm:$0xff]   ;;  %v7974_v24 = vld [vmem:[%s10954_s3 + $0x60] sm:$0xff]  }
 0x26e   : > { %v2718_v38 = vmul.f32 %v9519_v32, %v2675_v50  ;;  %v3573_v57 = vrot.slane %v3150_v6, 4  ;;  %v2616_v16 = vadd.f32 %v9650_v31, %v9471_v56  ;;  %v3158_v42 = vshrl.u32 %v9648_v19, 16  ;;  %7042 = vmatprep.subr.bf16.mxu1 %v7970_v39  ;;  %v9745_v56 = vld [vmem:[#allocation2 + $0x38] sm:$0xf] }
 0x26f   : > { %v2799_v55 = vmax.f32 %v9726_v40, 0.0  ;;  %v3153_v17 = vsel %vm669_vm1, %v3148_v14, %v3152_v58  ;;  %v3585_v1 = vshrl.u32 %v3156_v54, 16  ;;  %v3588_v63 = vshll.u32 %v3156_v54, 16  ;;  %v3098_v58 = vld [vmem:[#allocation2 + $0x48] sm:$0x1f] }
 0x270   : > { %v3577_v9 = vshrl.u32 %v3153_v17, 16  ;;  %v3580_v2 = vshll.u32 %v3153_v17, 16  ;;  %v9743_v6 = vadd.f32 %v9527_v22, %v2718_v38  ;;  %v3571_v12 = vor.u32 %v3570_v53, %v3567_v11  ;;  %v11109_v53 = vld [vmem:[#allocation6_spill] sm:$0xff] }
 0x271   : > { %v3587_v31 = vrot.slane %v3585_v1, 3  ;;  %v3590_v4 = vrot.slane %v3588_v63, 4  ;;  %v3574_v21 = vor.u32 %v3573_v57, %v3572_v36  ;;  %v2678_v13 = vadd.f32 %v2616_v16, %v9464_v20  ;;  %7043 = vmatpush3.bf16.msra.mxu1 %v7971_v7  ;;  %v9763_v36 = vld [vmem:[#allocation2 + $0x50] sm:$0xf0]  ;;  %v11110_v63 = vld [vmem:[#allocation7_spill] sm:$0xff] }
 0x272   : > { %v3579_v39 = vrot.slane %v3577_v9, 3  ;;  %v3582_v29 = vrot.slane %v3580_v2, 4  ;;  %v2797_v48 = vmax.f32 %v9743_v6, 0.0  ;;  %v3160_v25 = vshll.u32 %v9648_v19, 16  ;;  %7044 = vmatprep.subr.bf16.mxu1 %v7972_v26  ;;  %v7975_v26 = vld [vmem:[%s10954_s3 + $0x20] sm:$0xff]   ;;  %v7976_v2 = vld [vmem:[%s10954_s3 + $0x68] sm:$0xff]  }
 0x273   : > { %v3591_v20 = vor.u32 %v3590_v4, %v3587_v31  ;;  %v9759_v34 = vsel %vm2975_vm5, %v3571_v12, %v3574_v21  ;;  %v2721_v50 = vmul.f32 %v9519_v32, %v2678_v13  ;;  %v3165_v11 = vshll.u32 %v9745_v56, 16 }
 0x274   : > { %v3583_v40 = vor.u32 %v3582_v29, %v3579_v39  ;;  %v3162_v14 = vrot.slane %v3160_v25, 1  ;;  %v3169_v54 = vshrl.u32 %v9745_v56, 16  ;;  %v2608_v7 = vadd.f32 %v9654_v47, %v11109_v53 }
 0x275   : > { %v2764_v19 = vadd.f32 %v9527_v22, %v2721_v50  ;;  %v3167_v38 = vrot.slane %v3165_v11, 1  ;;  %v3430_v57 = vrot.slane %v9748_v27, 1  ;;  %v3431_v16 = vrot.slane %v3098_v58, 1  ;;  %7045 = vmatpush3.bf16.msra.mxu1 %v7973_v15 }
 0x276   : > { %v9776_v17 = vsel %vm2975_vm5, %v3583_v40, %v3591_v20  ;;  %v3163_v1 = vor.u32 %v3162_v14, %v3158_v42  ;;  %v2676_v9 = vadd.f32 %v2608_v7, %v11110_v63  ;;  %v3433_v47 = vrot.slane %v9763_v36, 1  ;;  %7046 = vmatprep.subr.bf16.mxu1 %v7974_v24  ;;  %v7977_v20 = vld [vmem:[%s10954_s3 + $0x28] sm:$0xff]   ;;  %v3099_v7 = vld [vmem:[#allocation2 + $0x58] sm:$0x1f] }
 0x277   : > { %4586 = vmatprep.mubr.bf16.mxu0 %v9776_v17  ;;  %v2800_v12 = vmax.f32 %v2764_v19, 0.0  ;;  %v3171_v31 = vor.u32 %v3169_v54, %v3167_v38  ;;  %v3432_v4 = vsel %vm930_vm0, %v3430_v57, %v3431_v16  ;;  %v3694_v21 = vshrl.u32 %v3431_v16, 16  ;;  %v7978_v19 = vld [vmem:[%s10954_s3 + $0x70] sm:$0xff]  }
 0x278   : > { %4587 = vmatmul.mubr.bf16.gmra.mrb[172].mxu0 %v9759_v34  ;;  %v3168_v42 = vsel %vm669_vm1, %v3163_v1, %v3167_v38  ;;  %v2719_v13 = vmul.f32 %v9519_v32, %v2676_v9  ;;  %v3686_v15 = vshrl.u32 %v3432_v4, 16  ;;  %v3689_v24 = vshll.u32 %v3432_v4, 16 }
 0x279   : > { %v2822_v39 = vpack.c.bf16 %v2800_v12, %v2799_v55  ;;  %v3623_v29 = vshrl.u32 %v3168_v42, 16  ;;  %v3626_v25 = vshll.u32 %v3168_v42, 16  ;;  %v3631_v58 = vshrl.u32 %v3171_v31, 16  ;;  %7047 = vmatpush3.bf16.msra.mxu1 %v7975_v26  ;;  %v3046_v26 = vld [vmem:[#allocation2 + $0x30] sm:$0xf8] }
 0x27a   : > { %v3634_v50 = vshll.u32 %v3171_v31, 16  ;;  %v2762_v40 = vadd.f32 %v9527_v22, %v2719_v13  ;;  %v3688_v14 = vrot.slane %v3686_v15, 3  ;;  %v3691_v53 = vrot.slane %v3689_v24, 4  ;;  %7048 = vmatprep.subr.bf16.mxu1 %v7976_v2  ;;  %v7979_v15 = vld [vmem:[%s10954_s3 + $0x30] sm:$0xff]  }
 0x27b   : > { %v2858_v55 = vrot.slane %v2822_v39, 4  ;;  %v3625_v38 = vrot.slane %v3623_v29, 3  ;;  %v3628_v57 = vrot.slane %v3626_v25, 4  ;;  %v3633_v1 = vrot.slane %v3631_v58, 3 }
 0x27c   : > { %v3636_v63 = vrot.slane %v3634_v50, 4  ;;  %v2798_v9 = vmax.f32 %v2762_v40, 0.0  ;;  %v3692_v12 = vor.u32 %v3691_v53, %v3688_v14  ;;  %v3696_v4 = vrot.slane %v3694_v21, 3  ;;  %v11111_v53 = vld [vmem:[#allocation8_spill] sm:$0xff] }
 0x27d   : > { %2907 = vst [vmem:[#allocation2 + $0xd8] ss:$-4 sps:$4 sm:$0xff] %v2858_v55   ;;  %v3629_v31 = vor.u32 %v3628_v57, %v3625_v38  ;;  %v3697_v42 = vshll.u32 %v3431_v16, 16  ;;  %v3434_v13 = vrot.slane %v3099_v7, 1  ;;  %v2629_v2 = vadd.f32 %v9675_v46, %v9505_v51  ;;  %7049 = vmatpush3.bf16.msra.mxu1 %v7977_v20  ;;  %v7980_v16 = vld [vmem:[%s10954_s3 + $0x78] sm:$0xff]   ;;  %v7985_v51 = vld [vmem:[%s10954_s3 + $0x1c8] sm:$0xff]  }
 0x27e   : > { %v3637_v24 = vor.u32 %v3636_v63, %v3633_v1  ;;  %v2821_v39 = vpack.c.bf16 %v2798_v9, %v2797_v48  ;;  %v2621_v29 = vadd.f32 %v9678_v44, %v9485_v33  ;;  %v3611_v21 = vshrl.u32 %v3046_v26, 16  ;;  %7050 = vmatprep.subr.bf16.mxu1 %v7978_v19  ;;  %7176 = vmatprep.subr.bf16.mxu0 %v7985_v51  ;;  %v7984_v1 = vld [vmem:[%s10954_s3 + $0x80] sm:$0xff]  }
 0x27f   : > { %v3699_v46 = vrot.slane %v3697_v42, 4  ;;  %v3435_v25 = vsel %vm930_vm0, %v3433_v47, %v3434_v13  ;;  %v3740_v58 = vshrl.u32 %v3434_v13, 16  ;;  %v3743_v20 = vshll.u32 %v3434_v13, 16  ;;  %v7981_v47 = vld [vmem:[%s10954_s3 + $0x38] sm:$0xff]  }
 0x280   : > { %v9814_v6 = vsel %vm2975_vm5, %v3629_v31, %v3637_v24  ;;  %v2857_v48 = vrot.slane %v2821_v39, 4  ;;  %v3732_v33 = vshrl.u32 %v3435_v25, 16  ;;  %v3735_v44 = vshll.u32 %v3435_v25, 16  ;;  %v3100_v25 = vld [vmem:[#allocation2 + $0x68] sm:$0x1f] }
 0x281   : > { %4594 = vmatprep.mubr.bf16.mxu0 %v9814_v6  ;;  %v3700_v50 = vor.u32 %v3699_v46, %v3696_v4  ;;  %v3742_v40 = vrot.slane %v3740_v58, 3  ;;  %v3745_v14 = vrot.slane %v3743_v20, 4  ;;  %v2681_v7 = vadd.f32 %v2629_v2, %v11111_v53  ;;  %7051 = vmatpush3.bf16.msra.mxu1 %v7979_v15  ;;  %v9835_v15 = vld [vmem:[#allocation2 + $0x48] sm:$0xf]  ;;  %v9854_v58 = vld [vmem:[#allocation2 + $0x70] sm:$0xf0] }
 0x282   : > { %2905 = vst [vmem:[#allocation2 + $0xc8] ss:$-4 sps:$4 sm:$0xff] %v2857_v48   ;;  %v3734_v19 = vrot.slane %v3732_v33, 3  ;;  %v3737_v55 = vrot.slane %v3735_v44, 4  ;;  %v2679_v38 = vadd.f32 %v2621_v29, %v9477_v30  ;;  %v3613_v57 = vrot.slane %v3611_v21, 3  ;;  %7052 = vmatprep.subr.bf16.mxu1 %v7980_v16  ;;  %v7986_v29 = vld [vmem:[%s10954_s3 + $0x188] sm:$0xff]  }
 0x283   : > { %v9826_v63 = vsel %vm2975_vm5, %v3692_v12, %v3700_v50  ;;  %v3746_v9 = vor.u32 %v3745_v14, %v3742_v40  ;;  %v2724_v4 = vmul.f32 %v9519_v32, %v2681_v7  ;;  %v3614_v31 = vshll.u32 %v3046_v26, 16  ;;  %v9849_v16 = vld [vmem:[#allocation2 + $0x60] sm:$0xf0]  ;;  %7177 = vmatpush3.bf16.msra.mxu0 %v7986_v29  ;;  %v3101_v44 = vld [vmem:[#allocation2 + $0x78] sm:$0x1f]  ;;  %v11114_v7 = vld [vmem:[#allocation9_spill] sm:$0xff] }
 0x284   : > { %11112 = vst [vmem:[#allocation10_spill] sm:$0xff] %v9826_v63  ;;  %7487 = vmatmul.mubr.bf16.gmra.mrb[160].mxu1 %v9826_v63  ;;  %v3738_v42 = vor.u32 %v3737_v55, %v3734_v19  ;;  %v2722_v13 = vmul.f32 %v9519_v32, %v2679_v38  ;;  %v3618_v30 = vrot.slane %v3169_v54, 3  ;;  %v3619_v2 = vrot.slane %v3165_v11, 4 }
 0x285   : > { %v2767_v12 = vadd.f32 %v9527_v22, %v2724_v4  ;;  %v3616_v24 = vrot.slane %v3614_v31, 4  ;;  %v2632_v39 = vadd.f32 %v9680_v43, %v9507_v41  ;;  %v3173_v26 = vshrl.u32 %v9748_v27, 16  ;;  %7053 = vmatpush3.bf16.msra.mxu1 %v7981_v47 }
 0x286   : > { %v9845_v54 = vsel %vm2975_vm5, %v3738_v42, %v3746_v9  ;;  %v2765_v56 = vadd.f32 %v9527_v22, %v2722_v13  ;;  %v3620_v11 = vor.u32 %v3619_v2, %v3618_v30  ;;  %v3175_v21 = vshll.u32 %v9748_v27, 16  ;;  %7514 = vmatprep.subr.bf16.mxu1 %v7984_v1 }
 0x287   : > { %11113 = vst [vmem:[#allocation13_spill] sm:$0xff] %v9845_v54  ;;  %7490 = vmatprep.mubr.bf16.mxu1 %v9845_v54  ;;  %v2803_v41 = vmax.f32 %v2767_v12, 0.0  ;;  %v3617_v43 = vor.u32 %v3616_v24, %v3613_v57  ;;  %v2682_v51 = vadd.f32 %v2632_v39, %v9480_v59  ;;  %v3180_v46 = vshll.u32 %v9835_v15, 16 }
 0x288   : > { %v2801_v20 = vmax.f32 %v2765_v56, 0.0  ;;  %v3177_v48 = vrot.slane %v3175_v21, 1  ;;  %v3184_v33 = vshrl.u32 %v9835_v15, 16  ;;  %v2624_v27 = vadd.f32 %v9685_v5, %v9487_v0  ;;  %v11119_v15 = vld [vmem:[#allocation21_spill] sm:$0xff] }
 0x289   : > { %v9860_v50 = vsel %vm2975_vm5, %v3617_v43, %v3620_v11  ;;  %v2725_v40 = vmul.f32 %v9519_v32, %v2682_v51  ;;  %v3182_v59 = vrot.slane %v3180_v46, 1  ;;  %v3436_v14 = vrot.slane %v9849_v16, 1 }
 0x28a   : > { %4595 = vmatmul.mubr.bf16.gmra.mrb[176].mxu0 %v9860_v50  ;;  %v3178_v53 = vor.u32 %v3177_v48, %v3173_v26  ;;  %v2680_v47 = vadd.f32 %v2624_v27, %v11114_v7  ;;  %v3437_v19 = vrot.slane %v3100_v25, 1  ;;  %v3439_v55 = vrot.slane %v9854_v58, 1 }
 0x28b   : > { %v2768_v0 = vadd.f32 %v9527_v22, %v2725_v40  ;;  %v3186_v5 = vor.u32 %v3184_v33, %v3182_v59  ;;  %v3440_v38 = vrot.slane %v3101_v44, 1  ;;  %v2645_v57 = vadd.f32 %v9710_v18, %v9553_v10  ;;  %v7988_v10 = vld [vmem:[%s10954_s3 + $0x1d0] sm:$0xff]  }
 0x28c   : > { %v3183_v1 = vsel %vm669_vm1, %v3178_v53, %v3182_v59  ;;  %v2723_v9 = vmul.f32 %v9519_v32, %v2680_v47  ;;  %v3438_v4 = vsel %vm930_vm0, %v3436_v14, %v3437_v19  ;;  %v3786_v31 = vshrl.u32 %v3437_v19, 16  ;;  %7178 = vmatprep.subr.bf16.mxu0 %v7988_v10 }
 0x28d   : > { %v2804_v42 = vmax.f32 %v2768_v0, 0.0  ;;  %v3669_v13 = vshrl.u32 %v3183_v1, 16  ;;  %v3672_v30 = vshll.u32 %v3183_v1, 16  ;;  %v3677_v2 = vshrl.u32 %v3186_v5, 16  ;;  %v3048_v0 = vld [vmem:[#allocation2 + $0x40] sm:$0xf8] }
 0x28e   : > { %v3680_v12 = vshll.u32 %v3186_v5, 16  ;;  %v2766_v24 = vadd.f32 %v9527_v22, %v2723_v9  ;;  %v3778_v39 = vshrl.u32 %v3438_v4, 16  ;;  %v3781_v26 = vshll.u32 %v3438_v4, 16  ;;  %v11115_v4 = vld [vmem:[#allocation19_spill] sm:$0xff] }
 0x28f   : > { %v2824_v18 = vpack.c.bf16 %v2804_v42, %v2803_v41  ;;  %v3671_v29 = vrot.slane %v3669_v13, 3  ;;  %v3674_v56 = vrot.slane %v3672_v30, 4  ;;  %v3679_v32 = vrot.slane %v3677_v2, 3  ;;  %v8032_v2 = vld [vmem:[%s10955_s4] ss:$0 sm:$0xff] }
 0x290   : > { %v3682_v11 = vrot.slane %v3680_v12, 4  ;;  %v2802_v21 = vmax.f32 %v2766_v24, 0.0  ;;  %v3780_v43 = vrot.slane %v3778_v39, 3  ;;  %v3783_v51 = vrot.slane %v3781_v26, 4 }
 0x291   : > { %v2860_v25 = vrot.slane %v2824_v18, 4  ;;  %v3675_v48 = vor.u32 %v3674_v56, %v3671_v29  ;;  %v3788_v27 = vrot.slane %v3786_v31, 3  ;;  %v3789_v44 = vshll.u32 %v3437_v19, 16  ;;  %v8033_v29 = vld [vmem:[%s10956_s5] ss:$0 sm:$0xff] }
 0x292   : > { %v3683_v22 = vor.u32 %v3682_v11, %v3679_v32  ;;  %v2823_v40 = vpack.c.bf16 %v2802_v21, %v2801_v20  ;;  %v3784_v59 = vor.u32 %v3783_v51, %v3780_v43  ;;  %v3441_v14 = vsel %vm930_vm0, %v3439_v55, %v3440_v38  ;;  %v7989_v55 = vld [vmem:[%s10954_s3 + $0x190] sm:$0xff]   ;;  %v11117_v32 = vld [vmem:[#allocation20_spill] sm:$0xff]  ;;  %v9905_v11 = vld [vmem:[#allocation2 + $0x58] sm:$0xf] }
 0x293   : > { %2911 = vst [vmem:[#allocation2 + $0xf8] ss:$-4 sps:$4 sm:$0xff] %v2860_v25   ;;  %v3791_v53 = vrot.slane %v3789_v44, 4  ;;  %v3824_v41 = vshrl.u32 %v3441_v14, 16  ;;  %v3827_v7 = vshll.u32 %v3441_v14, 16  ;;  %v3832_v47 = vshrl.u32 %v3440_v38, 16  ;;  %7179 = vmatpush3.bf16.msra.mxu0 %v7989_v55 }
 0x294   : > { %v9883_v5 = vsel %vm2975_vm5, %v3675_v48, %v3683_v22  ;;  %v2859_v1 = vrot.slane %v2823_v40, 4  ;;  %v3835_v9 = vshll.u32 %v3440_v38, 16  ;;  %v2685_v42 = vadd.f32 %v2645_v57, %v11115_v4  ;;  %v9916_v22 = vld [vmem:[#allocation2 + $0x80] sm:$0xf0] }
 0x295   : > { %4602 = vmatprep.mubr.bf16.mxu0 %v9883_v5  ;;  %v3792_v19 = vor.u32 %v3791_v53, %v3788_v27  ;;  %v3826_v20 = vrot.slane %v3824_v41, 3  ;;  %v3829_v31 = vrot.slane %v3827_v7, 4  ;;  %v3834_v13 = vrot.slane %v3832_v47, 3  ;;  %v11120_v7 = vld [vmem:[#allocation23_spill] sm:$0xff] }
 0x296   : > { %2909 = vst [vmem:[#allocation2 + $0xe8] ss:$-4 sps:$4 sm:$0xff] %v2859_v1   ;;  %v3837_v30 = vrot.slane %v3835_v9, 4  ;;  %v2728_v12 = vmul.f32 %v8032_v2, %v2685_v42  ;;  %v2637_v38 = vadd.f32 %v9716_v35, %v9531_v28  ;;  %v3657_v57 = vshrl.u32 %v3048_v0, 16 }
 0x297   : > { %v9896_v24 = vsel %vm2975_vm5, %v3784_v59, %v3792_v19  ;;  %v3830_v39 = vor.u32 %v3829_v31, %v3826_v20  ;;  %v3660_v26 = vshll.u32 %v3048_v0, 16  ;;  %v3664_v10 = vrot.slane %v3184_v33, 3  ;;  %v9924_v0 = vld [vmem:[#allocation2 + $0x90] sm:$0xf0]  ;;  %v11121_v31 = vld [vmem:[#allocation22_spill] sm:$0xff] }
 0x298   : > { %11116 = vst [vmem:[#allocation11_spill] sm:$0xff] %v9896_v24  ;;  %7491 = vmatmul.mubr.bf16.gmra.mrb[164].mxu1 %v9896_v24  ;;  %v3838_v18 = vor.u32 %v3837_v30, %v3834_v13  ;;  %v2771_v56 = vadd.f32 %v8033_v29, %v2728_v12  ;;  %v2683_v28 = vadd.f32 %v2637_v38, %v11117_v32  ;;  %v3659_v35 = vrot.slane %v3657_v57, 3  ;;  %v7992_v30 = vld [vmem:[%s10954_s3 + $0x198] sm:$0xff]  }
 0x299   : > { %v3662_v21 = vrot.slane %v3660_v26, 4  ;;  %v3665_v43 = vrot.slane %v3180_v46, 4  ;;  %v2648_v33 = vadd.f32 %v9722_v52, %v9559_v45  ;;  %v3188_v51 = vshrl.u32 %v9763_v36, 16  ;;  %v3102_v45 = vld [vmem:[#allocation2 + $0x88] sm:$0x1f] }
 0x29a   : > { %v9913_v25 = vsel %vm2975_vm5, %v3830_v39, %v3838_v18  ;;  %v2807_v48 = vmax.f32 %v2771_v56, 0.0  ;;  %v2726_v27 = vmul.f32 %v8032_v2, %v2683_v28  ;;  %v3190_v44 = vshll.u32 %v9763_v36, 16  ;;  %v3103_v36 = vld [vmem:[#allocation2 + $0x98] sm:$0x1f] }
 0x29b   : > { %11118 = vst [vmem:[#allocation14_spill] sm:$0xff] %v9913_v25  ;;  %7494 = vmatprep.mubr.bf16.mxu1 %v9913_v25  ;;  %v3663_v40 = vor.u32 %v3662_v21, %v3659_v35  ;;  %v3666_v59 = vor.u32 %v3665_v43, %v3664_v10  ;;  %v2686_v46 = vadd.f32 %v2648_v33, %v11119_v15  ;;  %v3195_v14 = vshll.u32 %v9905_v11, 16 }
 0x29c   : > { %v2769_v52 = vadd.f32 %v8033_v29, %v2726_v27  ;;  %v3192_v53 = vrot.slane %v3190_v44, 1  ;;  %v3199_v41 = vshrl.u32 %v9905_v11, 16  ;;  %v2640_v47 = vadd.f32 %v9731_v61, %v11120_v7  ;;  %v7991_v61 = vld [vmem:[%s10954_s3 + $0x1d8] sm:$0xff]  }
 0x29d   : > { %v9927_v1 = vsel %vm2975_vm5, %v3663_v40, %v3666_v59  ;;  %v2729_v9 = vmul.f32 %v8032_v2, %v2686_v46  ;;  %v3197_v4 = vrot.slane %v3195_v14, 1  ;;  %v3442_v42 = vrot.slane %v9916_v22, 1  ;;  %7180 = vmatprep.subr.bf16.mxu0 %v7991_v61 }
 0x29e   : > { %v2805_v19 = vmax.f32 %v2769_v52, 0.0  ;;  %4603 = vmatmul.mubr.bf16.gmra.mrb[180].mxu0 %v9927_v1  ;;  %v3193_v20 = vor.u32 %v3192_v53, %v3188_v51  ;;  %v2684_v13 = vadd.f32 %v2640_v47, %v11121_v31  ;;  %v3443_v55 = vrot.slane %v3102_v45, 1  ;;  %v7994_v31 = vld [vmem:[%s10954_s3 + $0x1a0] sm:$0xff]  }
 0x29f   : > { %v2772_v12 = vadd.f32 %v8033_v29, %v2729_v9  ;;  %v3201_v38 = vor.u32 %v3199_v41, %v3197_v4  ;;  %v3445_v57 = vrot.slane %v9924_v0, 1  ;;  %v3446_v39 = vrot.slane %v3103_v36, 1  ;;  %7181 = vmatpush3.bf16.msra.mxu0 %v7992_v30  ;;  %v3050_v9 = vld [vmem:[#allocation2 + $0x50] sm:$0xf8] }
 0x2a0   : > { %v3198_v26 = vsel %vm669_vm1, %v3193_v20, %v3197_v4  ;;  %v2727_v10 = vmul.f32 %v8032_v2, %v2684_v13  ;;  %v3444_v18 = vsel %vm930_vm0, %v3442_v42, %v3443_v55  ;;  %v3878_v56 = vshrl.u32 %v3443_v55, 16  ;;  %v7993_v4 = vld [vmem:[%s10954_s3 + $0x1e0] sm:$0xff]   ;;  %v7996_v13 = vld [vmem:[%s10954_s3 + $0x1e8] sm:$0xff]  }
 0x2a1   : > { %v2808_v32 = vmax.f32 %v2772_v12, 0.0  ;;  %v3715_v28 = vshrl.u32 %v3198_v26, 16  ;;  %v3718_v35 = vshll.u32 %v3198_v26, 16  ;;  %v3723_v21 = vshrl.u32 %v3201_v38, 16  ;;  %7182 = vmatprep.subr.bf16.mxu0 %v7993_v4 }
 0x2a2   : > { %v3726_v43 = vshll.u32 %v3201_v38, 16  ;;  %v2770_v33 = vadd.f32 %v8033_v29, %v2727_v10  ;;  %v3870_v51 = vshrl.u32 %v3444_v18, 16  ;;  %v3873_v27 = vshll.u32 %v3444_v18, 16  ;;  %v8034_v38 = vld [vmem:[#allocation2] sm:$0xff]  ;;  %v9958_v18 = vld [vmem:[#allocation2 + $0x68] sm:$0xf] }
 0x2a3   : > { %v2826_v44 = vpack.c.bf16 %v2808_v32, %v2807_v48  ;;  %v3717_v40 = vrot.slane %v3715_v28, 3  ;;  %v3720_v59 = vrot.slane %v3718_v35, 4  ;;  %v3725_v15 = vrot.slane %v3723_v21, 3  ;;  %7183 = vmatpush3.bf16.msra.mxu0 %v7994_v31 }
 0x2a4   : > { %v3728_v46 = vrot.slane %v3726_v43, 4  ;;  %v2806_v45 = vmax.f32 %v2770_v33, 0.0  ;;  %v3872_v2 = vrot.slane %v3870_v51, 3  ;;  %v3875_v52 = vrot.slane %v3873_v27, 4  ;;  %v9964_v43 = vld [vmem:[#allocation2 + $0xa0] sm:$0xf0]  ;;  %7184 = vmatprep.subr.bf16.mxu0 %v7996_v13 }
 0x2a5   : > { %v2862_v53 = vrot.slane %v2826_v44, 4  ;;  %v3721_v7 = vor.u32 %v3720_v59, %v3717_v40  ;;  %v3880_v47 = vrot.slane %v3878_v56, 3  ;;  %v3881_v36 = vshll.u32 %v3443_v55, 16  ;;  %v7997_v56 = vld [vmem:[%s10954_s3 + $0x1a8] sm:$0xff]  }
 0x2a6   : > { %v3729_v29 = vor.u32 %v3728_v46, %v3725_v15  ;;  %v2825_v42 = vpack.c.bf16 %v2806_v45, %v2805_v19  ;;  %v3876_v20 = vor.u32 %v3875_v52, %v3872_v2  ;;  %v3447_v48 = vsel %vm930_vm0, %v3445_v57, %v3446_v39  ;;  %v3104_v44 = vld [vmem:[#allocation2 + $0xa8] sm:$0x1f] }
 0x2a7   : > { %2915 = vst [vmem:[#allocation2 + $0x118] ss:$-4 sps:$4 sm:$0xff] %v2862_v53   ;;  %v3883_v55 = vrot.slane %v3881_v36, 4  ;;  %v3916_v61 = vshrl.u32 %v3447_v48, 16  ;;  %v3919_v30 = vshll.u32 %v3447_v48, 16  ;;  %v3924_v12 = vshrl.u32 %v3446_v39, 16  ;;  %7185 = vmatpush3.bf16.msra.mxu0 %v7997_v56 }
 0x2a8   : > { %3038 = vst [vmem:[#allocation2 + $0x110] sm:$0xff] %v8034_v38  ;;  %3039 = vst [vmem:[#allocation2 + $0x118] sm:$0xff] %v8034_v38  ;;  %v9956_v19 = vsel %vm2975_vm5, %v3721_v7, %v3729_v29  ;;  %v2861_v57 = vrot.slane %v2825_v42, 4  ;;  %v3927_v26 = vshll.u32 %v3446_v39, 16  ;;  %v3703_v10 = vshrl.u32 %v3050_v9, 16  ;;  %v8000_v48 = vld [vmem:[%s10954_s3 + $0x1f8] sm:$0xff]  }
 0x2a9   : > { %4610 = vmatprep.mubr.bf16.mxu0 %v9956_v19  ;;  %v3884_v32 = vor.u32 %v3883_v55, %v3880_v47  ;;  %v3918_v28 = vrot.slane %v3916_v61, 3  ;;  %v3921_v35 = vrot.slane %v3919_v30, 4  ;;  %v3926_v21 = vrot.slane %v3924_v12, 3  ;;  %v9977_v7 = vld [vmem:[#allocation2 + $0xb0] sm:$0xf0] }
 0x2aa   : > { %2913 = vst [vmem:[#allocation2 + $0x108] ss:$-4 sps:$4 sm:$0xff] %v2861_v57   ;;  %v3929_v33 = vrot.slane %v3927_v26, 4  ;;  %v3705_v39 = vrot.slane %v3703_v10, 3  ;;  %v3706_v51 = vshll.u32 %v3050_v9, 16  ;;  %v3710_v27 = vrot.slane %v3199_v41, 3 }
 0x2ab   : > { %v9969_v40 = vsel %vm2975_vm5, %v3876_v20, %v3884_v32  ;;  %v3922_v59 = vor.u32 %v3921_v35, %v3918_v28  ;;  %v3711_v15 = vrot.slane %v3195_v14, 4  ;;  %v3203_v46 = vshrl.u32 %v9849_v16, 16  ;;  %v7998_v14 = vld [vmem:[%s10954_s3 + $0x1f0] sm:$0xff]   ;;  %v3105_v20 = vld [vmem:[#allocation2 + $0xb8] sm:$0x1f] }
 0x2ac   : > { %11122 = vst [vmem:[#allocation12_spill] sm:$0xff] %v9969_v40  ;;  %7495 = vmatmul.mubr.bf16.gmra.mrb[168].mxu1 %v9969_v40  ;;  %v3930_v45 = vor.u32 %v3929_v33, %v3926_v21  ;;  %v3708_v2 = vrot.slane %v3706_v51, 4  ;;  %v3205_v52 = vshll.u32 %v9849_v16, 16  ;;  %v3210_v53 = vshll.u32 %v9958_v18, 16  ;;  %v7999_v9 = vld [vmem:[%s10954_s3 + $0x1b0] sm:$0xff]   ;;  %7186 = vmatprep.subr.bf16.mxu0 %v7998_v14  ;;  %v8001_v26 = vld [vmem:[%s10954_s3 + $0x1b8] sm:$0xff]  }
 0x2ad   : > { %v3712_v41 = vor.u32 %v3711_v15, %v3710_v27  ;;  %v3214_v47 = vshrl.u32 %v9958_v18, 16  ;;  %v3448_v36 = vrot.slane %v9964_v43, 1  ;;  %v3449_v11 = vrot.slane %v3104_v44, 1  ;;  %7187 = vmatpush3.bf16.msra.mxu0 %v7999_v9 }
 0x2ae   : > { %v9988_v16 = vsel %vm2975_vm5, %v3922_v59, %v3930_v45  ;;  %v3709_v4 = vor.u32 %v3708_v2, %v3705_v39  ;;  %v3207_v29 = vrot.slane %v3205_v52, 1  ;;  %v3212_v42 = vrot.slane %v3210_v53, 1  ;;  %7188 = vmatprep.subr.bf16.mxu0 %v8000_v48  ;;  %v3052_v52 = vld [vmem:[#allocation2 + $0x60] sm:$0xf8] }
 0x2af   : > { %11123 = vst [vmem:[#allocation17_spill] sm:$0xff] %v9988_v16  ;;  %7498 = vmatprep.mubr.bf16.mxu1 %v9988_v16  ;;  %v3450_v31 = vsel %vm930_vm0, %v3448_v36, %v3449_v11  ;;  %v3970_v13 = vshrl.u32 %v3449_v11, 16  ;;  %v3973_v55 = vshll.u32 %v3449_v11, 16  ;;  %v3451_v61 = vrot.slane %v9977_v7, 1 }
 0x2b0   : > { %v9999_v30 = vsel %vm2975_vm5, %v3709_v4, %v3712_v41  ;;  %v3208_v12 = vor.u32 %v3207_v29, %v3203_v46  ;;  %v3216_v38 = vor.u32 %v3214_v47, %v3212_v42  ;;  %v3962_v57 = vshrl.u32 %v3450_v31, 16 }
 0x2b1   : > { %4611 = vmatmul.mubr.bf16.gmra.mrb[184].mxu0 %v9999_v30  ;;  %v3965_v10 = vshll.u32 %v3450_v31, 16  ;;  %v3972_v56 = vrot.slane %v3970_v13, 3  ;;  %v3975_v32 = vrot.slane %v3973_v55, 4  ;;  %v3452_v28 = vrot.slane %v3105_v20, 1  ;;  %v3013_v55 = vld [vmem:[#allocation2 + $0xc8] sm:$0x10] }
 0x2b2   : > { %v3213_v35 = vsel %vm669_vm1, %v3208_v12, %v3212_v42  ;;  %v3769_v21 = vshrl.u32 %v3216_v38, 16  ;;  %v3772_v33 = vshll.u32 %v3216_v38, 16  ;;  %v3964_v39 = vrot.slane %v3962_v57, 3  ;;  %7189 = vmatpush3.bf16.msra.mxu0 %v8001_v26  ;;  %v3055_v26 = vld [vmem:[#allocation2 + $0x78] sm:$0xf] }
 0x2b3   : > { %v3761_v51 = vshrl.u32 %v3213_v35, 16  ;;  %v3764_v27 = vshll.u32 %v3213_v35, 16  ;;  %v3967_v44 = vrot.slane %v3965_v10, 4  ;;  %v3976_v59 = vor.u32 %v3975_v32, %v3972_v56  ;;  %v3016_v10 = vld [vmem:[#allocation2 + $0xd8] sm:$0x10] }
 0x2b4   : > { %v3771_v15 = vrot.slane %v3769_v21, 3  ;;  %v3774_v46 = vrot.slane %v3772_v33, 4  ;;  %v3453_v45 = vsel %vm930_vm0, %v3451_v61, %v3452_v28  ;;  %v4016_v2 = vshrl.u32 %v3452_v28, 16  ;;  %v10017_v21 = vld [vmem:[#allocation2 + $0xc0] sm:$0xf0] }
 0x2b5   : > { %v3763_v41 = vrot.slane %v3761_v51, 3  ;;  %v3766_v36 = vrot.slane %v3764_v27, 4  ;;  %v3968_v11 = vor.u32 %v3967_v44, %v3964_v39  ;;  %v4008_v14 = vshrl.u32 %v3453_v45, 16  ;;  %v10021_v27 = vld [vmem:[#allocation2 + $0xd0] sm:$0xf0] }
 0x2b6   : > { %v3775_v9 = vor.u32 %v3774_v46, %v3771_v15  ;;  %v4011_v4 = vshll.u32 %v3453_v45, 16  ;;  %v4018_v29 = vrot.slane %v4016_v2, 3  ;;  %v4019_v42 = vshll.u32 %v3452_v28, 16  ;;  %v3054_v44 = vld [vmem:[#allocation2 + $0x70] sm:$0xf8] }
 0x2b7   : > { %v3767_v20 = vor.u32 %v3766_v36, %v3763_v41  ;;  %v10008_v48 = vsel %vm2975_vm5, %v3968_v11, %v3976_v59  ;;  %v4010_v31 = vrot.slane %v4008_v14, 3  ;;  %v3749_v13 = vshrl.u32 %v3052_v52, 16  ;;  %v10033_v14 = vld [vmem:[#allocation2 + $0x88] sm:$0xf] }
 0x2b8   : > { %11124 = vst [vmem:[#allocation16_spill] sm:$0xff] %v10008_v48  ;;  %7499 = vmatmul.mubr.bf16.gmra.mrb[172].mxu1 %v10008_v48  ;;  %v4013_v61 = vrot.slane %v4011_v4, 4  ;;  %v4021_v12 = vrot.slane %v4019_v42, 4  ;;  %v3752_v38 = vshll.u32 %v3052_v52, 16  ;;  %v3756_v57 = vrot.slane %v3214_v47, 3 }
 0x2b9   : > { %v10012_v56 = vsel %vm2975_vm5, %v3767_v20, %v3775_v9  ;;  %v3751_v32 = vrot.slane %v3749_v13, 3  ;;  %v3757_v28 = vrot.slane %v3210_v53, 4  ;;  %v3218_v35 = vshrl.u32 %v9854_v58, 16 }
 0x2ba   : > { %4618 = vmatprep.mubr.bf16.mxu0 %v10012_v56  ;;  %v4014_v33 = vor.u32 %v4013_v61, %v4010_v31  ;;  %v4022_v39 = vor.u32 %v4021_v12, %v4018_v29  ;;  %v3754_v51 = vrot.slane %v3752_v38, 4  ;;  %v3220_v47 = vshll.u32 %v9854_v58, 16 }
 0x2bb   : > { %v3758_v59 = vor.u32 %v3757_v28, %v3756_v57  ;;  %v3225_v15 = vshll.u32 %v3055_v26, 16  ;;  %v3229_v46 = vshrl.u32 %v3055_v26, 16  ;;  %v3014_v18 = vsel %vm9248_vm6, 0, %v3013_v55 }
 0x2bc   : > { %v10026_v53 = vsel %vm2975_vm5, %v4014_v33, %v4022_v39  ;;  %v3755_v45 = vor.u32 %v3754_v51, %v3751_v32  ;;  %v3222_v2 = vrot.slane %v3220_v47, 1  ;;  %3015 = vst [vmem:[#allocation2 + $0xc8] sm:$0x10] %v3014_v18  ;;  %v3454_v52 = vrot.slane %v10017_v21, 1  ;;  %v3019_v47 = vld [vmem:[#allocation2 + $0xe8] sm:$0x10] }
 0x2bd   : > { %11125 = vst [vmem:[#allocation15_spill] sm:$0xff] %v10026_v53  ;;  %7502 = vmatprep.mubr.bf16.mxu1 %v10026_v53  ;;  %v3227_v58 = vrot.slane %v3225_v15, 1  ;;  %v3017_v41 = vsel %vm9248_vm6, 0, %v3016_v10  ;;  %v3457_v36 = vrot.slane %v10021_v27, 1  ;;  %v3795_v11 = vshrl.u32 %v3054_v44, 16 }
 0x2be   : > { %v10036_v9 = vsel %vm2975_vm5, %v3755_v45, %v3758_v59  ;;  %v3223_v4 = vor.u32 %v3222_v2, %v3218_v35  ;;  %3018 = vst [vmem:[#allocation2 + $0xd8] sm:$0x10] %v3017_v41  ;;  %v3798_v29 = vshll.u32 %v3054_v44, 16  ;;  %v3802_v42 = vrot.slane %v3229_v46, 3  ;;  %v10045_v44 = vld [vmem:[#allocation2 + $0xe0] sm:$0xf0] }
 0x2bf   : > { %4619 = vmatmul.mubr.bf16.gmra.mrb[188].mxu0 %v10036_v9  ;;  %v3231_v20 = vor.u32 %v3229_v46, %v3227_v58  ;;  %v3797_v31 = vrot.slane %v3795_v11, 3  ;;  %v3803_v13 = vrot.slane %v3225_v15, 4  ;;  %v3233_v55 = vshrl.u32 %v9916_v22, 16 }
 0x2c0   : > { %v3228_v61 = vsel %vm669_vm1, %v3223_v4, %v3227_v58  ;;  %v3800_v12 = vrot.slane %v3798_v29, 4  ;;  %v3235_v38 = vshll.u32 %v9916_v22, 16  ;;  %v3240_v57 = vshll.u32 %v10033_v14, 16 }
 0x2c1   : > { %v3807_v26 = vshrl.u32 %v3228_v61, 16  ;;  %v3810_v10 = vshll.u32 %v3228_v61, 16  ;;  %v3815_v32 = vshrl.u32 %v3231_v20, 16  ;;  %v3818_v28 = vshll.u32 %v3231_v20, 16 }
 0x2c2   : > { %v3801_v35 = vor.u32 %v3800_v12, %v3797_v31  ;;  %v3804_v33 = vor.u32 %v3803_v13, %v3802_v42  ;;  %v3237_v39 = vrot.slane %v3235_v38, 1  ;;  %v3242_v51 = vrot.slane %v3240_v57, 1 }
 0x2c3   : > { %v3809_v59 = vrot.slane %v3807_v26, 3  ;;  %v3812_v15 = vrot.slane %v3810_v10, 4  ;;  %v3817_v46 = vrot.slane %v3815_v32, 3  ;;  %v3820_v18 = vrot.slane %v3818_v28, 4  ;;  %v3106_v22 = vld [vmem:[#allocation2 + $0xc8] sm:$0x1f] }
 0x2c4   : > { %v3455_v45 = vrot.slane %v3106_v22, 1  ;;  %v10048_v2 = vsel %vm2975_vm5, %v3801_v35, %v3804_v33  ;;  %v3238_v58 = vor.u32 %v3237_v39, %v3233_v55  ;;  %v3244_v41 = vshrl.u32 %v10033_v14, 16 }
 0x2c5   : > { %v3813_v11 = vor.u32 %v3812_v15, %v3809_v59  ;;  %v3821_v4 = vor.u32 %v3820_v18, %v3817_v46  ;;  %v3107_v29 = vld [vmem:[#allocation2 + $0xd8] sm:$0x1f]  ;;  %v3020_v42 = vsel %vm9248_vm6, 0, %v3019_v47  ;;  %v3460_v20 = vrot.slane %v10045_v44, 1 }
 0x2c6   : > { %v3456_v31 = vsel %vm930_vm0, %v3454_v52, %v3455_v45  ;;  %v4062_v13 = vshrl.u32 %v3455_v45, 16  ;;  %v4065_v61 = vshll.u32 %v3455_v45, 16  ;;  %v3458_v12 = vrot.slane %v3107_v29, 1  ;;  %3021 = vst [vmem:[#allocation2 + $0xe8] sm:$0x10] %v3020_v42 }
 0x2c7   : > { %v10056_v38 = vsel %vm2975_vm5, %v3813_v11, %v3821_v4  ;;  %v4054_v55 = vshrl.u32 %v3456_v31, 16  ;;  %v4057_v26 = vshll.u32 %v3456_v31, 16  ;;  %v3243_v10 = vsel %vm669_vm1, %v3238_v58, %v3242_v51  ;;  %v3022_v45 = vld [vmem:[#allocation2 + $0xf8] sm:$0x10]  ;;  %v3056_v42 = vld [vmem:[#allocation2 + $0x80] sm:$0xf8] }
 0x2c8   : > { %4626 = vmatprep.mubr.bf16.mxu0 %v10056_v38  ;;  %v4064_v32 = vrot.slane %v4062_v13, 3  ;;  %v4067_v28 = vrot.slane %v4065_v61, 4  ;;  %v3459_v35 = vsel %vm930_vm0, %v3457_v36, %v3458_v12  ;;  %v4108_v33 = vshrl.u32 %v3458_v12, 16 }
 0x2c9   : > { %v4056_v39 = vrot.slane %v4054_v55, 3  ;;  %v4059_v52 = vrot.slane %v4057_v26, 4  ;;  %v4100_v47 = vshrl.u32 %v3459_v35, 16  ;;  %v4103_v59 = vshll.u32 %v3459_v35, 16  ;;  %4627 = vmatmul.mubr.bf16.gmra.mrb[192].mxu0 %v10048_v2  ;;  %v10062_v55 = vld [vmem:[#allocation2 + $0xf0] sm:$0xf0] }
 0x2ca   : > { %v4068_v15 = vor.u32 %v4067_v28, %v4064_v32  ;;  %v4110_v46 = vrot.slane %v4108_v33, 3  ;;  %v4111_v18 = vshll.u32 %v3458_v12, 16  ;;  %v3246_v22 = vor.u32 %v3244_v41, %v3242_v51 }
 0x2cb   : > { %v4060_v11 = vor.u32 %v4059_v52, %v4056_v39  ;;  %v4102_v58 = vrot.slane %v4100_v47, 3  ;;  %v4105_v4 = vrot.slane %v4103_v59, 4  ;;  %v3853_v29 = vshrl.u32 %v3243_v10, 16 }
 0x2cc   : > { %v4113_v31 = vrot.slane %v4111_v18, 4  ;;  %v3856_v13 = vshll.u32 %v3243_v10, 16  ;;  %v3861_v36 = vshrl.u32 %v3246_v22, 16  ;;  %v3864_v61 = vshll.u32 %v3246_v22, 16 }
 0x2cd   : > { %v10065_v26 = vsel %vm2975_vm5, %v4060_v11, %v4068_v15  ;;  %v4106_v35 = vor.u32 %v4105_v4, %v4102_v58  ;;  %v3855_v32 = vrot.slane %v3853_v29, 3  ;;  %v3108_v28 = vld [vmem:[#allocation2 + $0xe8] sm:$0x1f]  ;;  %v3023_v51 = vsel %vm9248_vm6, 0, %v3022_v45 }
 0x2ce   : > { %11126 = vst [vmem:[#allocation18_spill] sm:$0xff] %v10065_v26  ;;  %7503 = vmatmul.mubr.bf16.gmra.mrb[176].mxu1 %v10065_v26  ;;  %v4114_v12 = vor.u32 %v4113_v31, %v4110_v46  ;;  %v3858_v33 = vrot.slane %v3856_v13, 4  ;;  %v3863_v39 = vrot.slane %v3861_v36, 3  ;;  %v3866_v52 = vrot.slane %v3864_v61, 4  ;;  %3024 = vst [vmem:[#allocation2 + $0xf8] sm:$0x10] %v3023_v51 }
 0x2cf   : > { %v3461_v10 = vrot.slane %v3108_v28, 1  ;;  %v3463_v47 = vrot.slane %v10062_v55, 1  ;;  %v3841_v59 = vshrl.u32 %v3056_v42, 16  ;;  %v3844_v18 = vshll.u32 %v3056_v42, 16  ;;  %v3059_v42 = vld [vmem:[#allocation2 + $0x98] sm:$0xf] }
 0x2d0   : > { %v10072_v15 = vsel %vm2975_vm5, %v4106_v35, %v4114_v12  ;;  %v3859_v22 = vor.u32 %v3858_v33, %v3855_v32  ;;  %v3867_v11 = vor.u32 %v3866_v52, %v3863_v39  ;;  %v3848_v58 = vrot.slane %v3244_v41, 3  ;;  %v2947_v28 = vld [vmem:[#allocation2 + $0x90] sm:$0x8]  ;;  %v3025_v51 = vld [vmem:[#allocation2 + $0x108] sm:$0x10] }
 0x2d1   : > { %11127 = vst [vmem:[#allocation4_spill] sm:$0xff] %v10072_v15  ;;  %7506 = vmatprep.mubr.bf16.mxu1 %v10072_v15  ;;  %v3462_v45 = vsel %vm930_vm0, %v3460_v20, %v3461_v10  ;;  %v4154_v46 = vshrl.u32 %v3461_v10, 16  ;;  %v4157_v4 = vshll.u32 %v3461_v10, 16  ;;  %v3843_v29 = vrot.slane %v3841_v59, 3  ;;  %v10084_v10 = vld [vmem:[#allocation2 + $0x100] sm:$0xf0] }
 0x2d2   : > { %v10077_v31 = vsel %vm2975_vm5, %v3859_v22, %v3867_v11  ;;  %v4146_v13 = vshrl.u32 %v3462_v45, 16  ;;  %v4149_v36 = vshll.u32 %v3462_v45, 16  ;;  %v3846_v61 = vrot.slane %v3844_v18, 4 }
 0x2d3   : > { %4634 = vmatprep.mubr.bf16.mxu0 %v10077_v31  ;;  %v4156_v35 = vrot.slane %v4154_v46, 3  ;;  %v4159_v32 = vrot.slane %v4157_v4, 4  ;;  %v3849_v41 = vrot.slane %v3240_v57, 4  ;;  %v3248_v20 = vshrl.u32 %v9924_v0, 16 }
 0x2d4   : > { %v4148_v12 = vrot.slane %v4146_v13, 3  ;;  %v4151_v33 = vrot.slane %v4149_v36, 4  ;;  %v3847_v39 = vor.u32 %v3846_v61, %v3843_v29  ;;  %v3250_v52 = vshll.u32 %v9924_v0, 16 }
 0x2d5   : > { %v4160_v59 = vor.u32 %v4159_v32, %v4156_v35  ;;  %v3109_v18 = vld [vmem:[#allocation2 + $0xf8] sm:$0x1f]  ;;  %v3850_v22 = vor.u32 %v3849_v41, %v3848_v58  ;;  %v3255_v11 = vshll.u32 %v3059_v42, 16  ;;  %v3259_v45 = vshrl.u32 %v3059_v42, 16 }
 0x2d6   : > { %v4152_v46 = vor.u32 %v4151_v33, %v4148_v12  ;;  %v3464_v4 = vrot.slane %v3109_v18, 1  ;;  %v3252_v15 = vrot.slane %v3250_v52, 1  ;;  %v3026_v14 = vsel %vm9248_vm6, 0, %v3025_v51 }
 0x2d7   : > { %v10089_v57 = vsel %vm2975_vm5, %v3847_v39, %v3850_v22  ;;  %v3257_v13 = vrot.slane %v3255_v11, 1  ;;  %3027 = vst [vmem:[#allocation2 + $0x108] sm:$0x10] %v3026_v14  ;;  %v3466_v0 = vrot.slane %v10084_v10, 1  ;;  %v2948_v29 = vsel %vm9255_vm7, 0, %v2947_v28 }
 0x2d8   : > { %v10095_v58 = vsel %vm2975_vm5, %v4152_v46, %v4160_v59  ;;  %v3465_v36 = vsel %vm930_vm0, %v3463_v47, %v3464_v4  ;;  %v4200_v61 = vshrl.u32 %v3464_v4, 16  ;;  %v4203_v42 = vshll.u32 %v3464_v4, 16  ;;  %4635 = vmatmul.mubr.bf16.gmra.mrb[196].mxu0 %v10089_v57  ;;  %2949 = vst [vmem:[#allocation2 + $0x90] sm:$0x8] %v2948_v29  ;;  %v10101_v14 = vld [vmem:[#allocation2 + $0xa8] sm:$0xf] }
 0x2d9   : > { %11128 = vst [vmem:[#allocation3_spill] sm:$0xff] %v10095_v58  ;;  %7507 = vmatmul.mubr.bf16.gmra.mrb[180].mxu1 %v10095_v58  ;;  %v4192_v3 = vshrl.u32 %v3465_v36, 16  ;;  %v4195_v35 = vshll.u32 %v3465_v36, 16  ;;  %v3253_v32 = vor.u32 %v3252_v15, %v3248_v20  ;;  %v3261_v41 = vor.u32 %v3259_v45, %v3257_v13 }
 0x2da   : > { %v4202_v51 = vrot.slane %v4200_v61, 3  ;;  %v4205_v12 = vrot.slane %v4203_v42, 4  ;;  %v3894_v33 = vrot.slane %v3259_v45, 3  ;;  %v3895_v28 = vrot.slane %v3255_v11, 4 }
 0x2db   : > { %v4194_v39 = vrot.slane %v4192_v3, 3  ;;  %v4197_v52 = vrot.slane %v4195_v35, 4  ;;  %v3258_v59 = vsel %vm669_vm1, %v3253_v32, %v3257_v13  ;;  %v3907_v47 = vshrl.u32 %v3261_v41, 16 }
 0x2dc   : > { %v4206_v18 = vor.u32 %v4205_v12, %v4202_v51  ;;  %v3899_v22 = vshrl.u32 %v3258_v59, 16  ;;  %v3902_v46 = vshll.u32 %v3258_v59, 16  ;;  %v3910_v4 = vshll.u32 %v3261_v41, 16 }
 0x2dd   : > { %v4198_v29 = vor.u32 %v4197_v52, %v4194_v39  ;;  %v3909_v58 = vrot.slane %v3907_v47, 3  ;;  %v3896_v36 = vor.u32 %v3895_v28, %v3894_v33  ;;  %v3263_v15 = vshrl.u32 %v9964_v43, 16  ;;  %v3041_v47 = vld [vmem:[#allocation2 + $0x8] sm:$0xf] }
 0x2de   : > { %v3901_v20 = vrot.slane %v3899_v22, 3  ;;  %v3904_v61 = vrot.slane %v3902_v46, 4  ;;  %v3912_v45 = vrot.slane %v3910_v4, 4  ;;  %v3110_v11 = vld [vmem:[#allocation2 + $0x108] sm:$0x1f]  ;;  %v3265_v42 = vshll.u32 %v9964_v43, 16 }
 0x2df   : > { %v10106_v13 = vsel %vm2975_vm5, %v4198_v29, %v4206_v18  ;;  %v3467_v3 = vrot.slane %v3110_v11, 1  ;;  %v3058_v35 = vld [vmem:[#allocation2 + $0x90] sm:$0xf8]  ;;  %v10998_v32 = vshll.u32 %v10101_v14, 16  ;;  %v10115_v29 = vld [vmem:[#allocation2] sm:$0xf0] }
 0x2e0   : > { %11129 = vst [vmem:[#allocation5_spill] sm:$0xff] %v10106_v13  ;;  %7510 = vmatprep.mubr.bf16.mxu1 %v10106_v13  ;;  %v3905_v51 = vor.u32 %v3904_v61, %v3901_v20  ;;  %v3913_v12 = vor.u32 %v3912_v45, %v3909_v58  ;;  %v3887_v33 = vshrl.u32 %v3058_v35, 16  ;;  %v3890_v28 = vshll.u32 %v3058_v35, 16 }
 0x2e1   : > { %v3468_v39 = vsel %vm930_vm0, %v3466_v0, %v3467_v3  ;;  %v4342_v52 = vshrl.u32 %v3467_v3, 16  ;;  %v4345_v59 = vshll.u32 %v3467_v3, 16  ;;  %v3267_v43 = vrot.slane %v3265_v42, 1 }
 0x2e2   : > { %v10113_v18 = vsel %vm2975_vm5, %v3905_v51, %v3913_v12  ;;  %v4334_v22 = vshrl.u32 %v3468_v39, 16  ;;  %v4337_v46 = vshll.u32 %v3468_v39, 16  ;;  %v3889_v4 = vrot.slane %v3887_v33, 3 }
 0x2e3   : > { %4642 = vmatprep.mubr.bf16.mxu0 %v10113_v18  ;;  %v4344_v20 = vrot.slane %v4342_v52, 3  ;;  %v4347_v58 = vrot.slane %v4345_v59, 4  ;;  %v3892_v61 = vrot.slane %v3890_v28, 4  ;;  %v3268_v45 = vor.u32 %v3267_v43, %v3263_v15  ;;  %v3040_v15 = vld [vmem:[#allocation2] sm:$0xf8] }
 0x2e4   : > { %v4336_v11 = vrot.slane %v4334_v22, 3  ;;  %v4339_v0 = vrot.slane %v4337_v46, 4  ;;  %v3272_v42 = vrot.slane %v10998_v32, 1  ;;  %v3113_v3 = vshrl.u32 %v10115_v29, 16 }
 0x2e5   : > { %v4348_v35 = vor.u32 %v4347_v58, %v4344_v20  ;;  %v3893_v51 = vor.u32 %v3892_v61, %v3889_v4  ;;  %v3115_v12 = vshll.u32 %v10115_v29, 16  ;;  %v3120_v33 = vshll.u32 %v3041_v47, 16 }
 0x2e6   : > { %v4340_v39 = vor.u32 %v4339_v0, %v4336_v11  ;;  %v3273_v41 = vsel %vm669_vm1, %v3268_v45, %v3272_v42  ;;  %v11130_v52 = vshrl.u32 %v10101_v14, 16  ;;  %v3124_v28 = vshrl.u32 %v3041_v47, 16 }
 0x2e7   : > { %v10126_v43 = vsel %vm2975_vm5, %v3893_v51, %v3896_v36  ;;  %v3945_v22 = vshrl.u32 %v3273_v41, 16  ;;  %v3948_v46 = vshll.u32 %v3273_v41, 16  ;;  %v3117_v32 = vrot.slane %v3115_v12, 1  ;;  %v2950_v41 = vld [vmem:[#allocation2 + $0xa0] sm:$0x8] }
 0x2e8   : > { %v3276_v59 = vor.u32 %v11130_v52, %v3272_v42  ;;  %v10129_v20 = vsel %vm2975_vm5, %v4340_v39, %v4348_v35  ;;  %4643 = vmatmul.mubr.bf16.gmra.mrb[200].mxu0 %v10126_v43  ;;  %v3122_v61 = vrot.slane %v3120_v33, 1  ;;  %v3473_v0 = vshrl.u32 %v3040_v15, 16 }
 0x2e9   : > { %11131 = vst [vmem:[#allocation6_spill] sm:$0xff] %v10129_v20  ;;  %7511 = vmatmul.mubr.bf16.gmra.mrb[184].mxu1 %v10129_v20  ;;  %v3947_v45 = vrot.slane %v3945_v22, 3  ;;  %v3950_v11 = vrot.slane %v3948_v46, 4  ;;  %v3118_v47 = vor.u32 %v3117_v32, %v3113_v3  ;;  %v3476_v52 = vshll.u32 %v3040_v15, 16 }
 0x2ea   : > { %v3953_v4 = vshrl.u32 %v3276_v59, 16  ;;  %v3956_v58 = vshll.u32 %v3276_v59, 16  ;;  %v3126_v51 = vor.u32 %v3124_v28, %v3122_v61  ;;  %v3475_v39 = vrot.slane %v3473_v0, 3 }
 0x2eb   : > { %v3951_v12 = vor.u32 %v3950_v11, %v3947_v45  ;;  %v3123_v35 = vsel %vm669_vm1, %v3118_v47, %v3122_v61  ;;  %v3480_v13 = vrot.slane %v3124_v28, 3  ;;  %v3478_v20 = vrot.slane %v3476_v52, 4 }
 0x2ec   : > { %v3955_v42 = vrot.slane %v3953_v4, 3  ;;  %v3958_v36 = vrot.slane %v3956_v58, 4  ;;  %v3485_v53 = vshrl.u32 %v3123_v35, 16  ;;  %v3488_v59 = vshll.u32 %v3123_v35, 16  ;;  %v3063_v58 = vld [vmem:[#allocation2 + $0xb8] sm:$0xf] }
 0x2ed   : > { %v3493_v48 = vshrl.u32 %v3126_v51, 16  ;;  %v3496_v16 = vshll.u32 %v3126_v51, 16  ;;  %v3481_v22 = vrot.slane %v3120_v33, 4  ;;  %v2951_v32 = vsel %vm9255_vm7, 0, %v2950_v41  ;;  %v2953_v33 = vld [vmem:[#allocation2 + $0xb0] sm:$0x8] }
 0x2ee   : > { %v3959_v26 = vor.u32 %v3958_v36, %v3955_v42  ;;  %v3487_v15 = vrot.slane %v3485_v53, 3  ;;  %v3490_v46 = vrot.slane %v3488_v59, 4  ;;  %2952 = vst [vmem:[#allocation2 + $0xa0] sm:$0x8] %v2951_v32  ;;  %v3479_v61 = vor.u32 %v3478_v20, %v3475_v39 }
 0x2ef   : > { %v3495_v4 = vrot.slane %v3493_v48, 3  ;;  %v3498_v28 = vrot.slane %v3496_v16, 4  ;;  %v3482_v45 = vor.u32 %v3481_v22, %v3480_v13  ;;  %v11132_v11 = vshrl.u32 %v10101_v14, 16  ;;  %v10150_v16 = vld [vmem:[#allocation2 + $0xc8] sm:$0xf] }
 0x2f0   : > { %v10137_v3 = vsel %vm2975_vm5, %v3951_v12, %v3959_v26  ;;  %v3491_v0 = vor.u32 %v3490_v46, %v3487_v15  ;;  %v11133_v42 = vshll.u32 %v10101_v14, 16  ;;  %v3280_v53 = vshll.u32 %v9977_v7, 16  ;;  %v2956_v12 = vld [vmem:[#allocation2 + $0xc0] sm:$0x8]  ;;  %v7987_v22 = vld [vmem:[%s10954_s3 + $0x88] sm:$0xff]  }
 0x2f1   : > { %4650 = vmatprep.mubr.bf16.mxu0 %v10137_v3  ;;  %v10142_v47 = vrot.slane %v11132_v11, 3  ;;  %v3499_v48 = vor.u32 %v3498_v28, %v3495_v4  ;;  %v3278_v36 = vshrl.u32 %v9977_v7, 16  ;;  %v3285_v51 = vshll.u32 %v3063_v58, 16 }
 0x2f2   : > { %v10146_v26 = vrot.slane %v11133_v42, 4  ;;  %v3289_v52 = vshrl.u32 %v3063_v58, 16  ;;  %v3483_v13 = vsel %vm2975_vm5, %v3479_v61, %v3482_v45  ;;  %v3282_v41 = vrot.slane %v3280_v53, 1 }
 0x2f3   : > { %v2954_v14 = vsel %vm9255_vm7, 0, %v2953_v33  ;;  %v3500_v35 = vsel %vm2975_vm5, %v3491_v0, %v3499_v48  ;;  %v3287_v39 = vrot.slane %v3285_v51, 1  ;;  %v10160_v7 = vrot.slane %v3285_v51, 4 }
 0x2f4   : > { %v3942_v20 = vor.u32 %v10146_v26, %v10142_v47  ;;  %2955 = vst [vmem:[#allocation2 + $0xb0] sm:$0x8] %v2954_v14  ;;  %v10158_v59 = vrot.slane %v3289_v52, 3  ;;  %5044 = vmatprep.mubr.bf16.mxu1 %v3500_v35  ;;  %v3283_v32 = vor.u32 %v3282_v41, %v3278_v36  ;;  %v3293_v15 = vshrl.u32 %v10017_v21, 16  ;;  %v8035_v47 = vld [vmem:[%s10954_s3 + $0x80] sm:$0xff]  }
 0x2f5   : > { %v3295_v46 = vshll.u32 %v10017_v21, 16  ;;  %v3300_v4 = vshll.u32 %v10150_v16, 16  ;;  %5045 = vmatmul.mubr.bf16.vlgmr.msra.gmra.mrb[188].mxu1 %v3483_v13  ;;  %v3060_v58 = vld [vmem:[#allocation2 + $0xa0] sm:$0xf8]  ;;  %v3291_v28 = vor.u32 %v3289_v52, %v3287_v39  ;;  %v3304_v45 = vshrl.u32 %v10150_v16, 16 }
 0x2f6   : > { %v2957_v11 = vsel %vm9255_vm7, 0, %v2956_v12  ;;  %5052 = vmatprep.mubr.bf16.mxu1 %v9662_v60  ;;  %7515 = vmatpush3.bf16.msra.mxu1 %v8035_v47  ;;  %v3933_v21 = vshrl.u32 %v3060_v58, 16  ;;  %v3936_v33 = vshll.u32 %v3060_v58, 16  ;;  %v3288_v0 = vsel %vm669_vm1, %v3283_v32, %v3287_v39  ;;  %v7990_v60 = vld [vmem:[%s10954_s3 + $0x90] sm:$0xff]  }
 0x2f7   : > { %v3297_v42 = vrot.slane %v3295_v46, 1  ;;  %2958 = vst [vmem:[#allocation2 + $0xc0] sm:$0x8] %v2957_v11  ;;  %v3991_v26 = vshrl.u32 %v3288_v0, 16  ;;  %v3994_v53 = vshll.u32 %v3288_v0, 16  ;;  %v3999_v48 = vshrl.u32 %v3291_v28, 16  ;;  %7516 = vmatprep.subr.bf16.mxu1 %v7987_v22 }
 0x2f8   : > { %v4002_v36 = vshll.u32 %v3291_v28, 16  ;;  %v3935_v51 = vrot.slane %v3933_v21, 3  ;;  %v3938_v52 = vrot.slane %v3936_v33, 4  ;;  %v3302_v13 = vrot.slane %v3300_v4, 1 }
 0x2f9   : > { %v3298_v16 = vor.u32 %v3297_v42, %v3293_v15  ;;  %v3993_v41 = vrot.slane %v3991_v26, 3  ;;  %v3996_v14 = vrot.slane %v3994_v53, 4  ;;  %v4001_v12 = vrot.slane %v3999_v48, 3  ;;  %v3067_v26 = vld [vmem:[#allocation2 + $0xd8] sm:$0xf] }
 0x2fa   : > { %v4004_v35 = vrot.slane %v4002_v36, 4  ;;  %v3939_v39 = vor.u32 %v3938_v52, %v3935_v51  ;;  %v3306_v58 = vor.u32 %v3304_v45, %v3302_v13  ;;  %7517 = vmatpush3.bf16.msra.mxu1 %v7987_v22  ;;  %v10182_v28 = vrot.slane %v3304_v45, 3  ;;  %v7995_v53 = vld [vmem:[%s10954_s3 + $0x98] sm:$0xff]  }
 0x2fb   : > { %v3062_v32 = vld [vmem:[#allocation2 + $0xb0] sm:$0xf8]  ;;  %v3303_v46 = vsel %vm669_vm1, %v3298_v16, %v3302_v13  ;;  %v3997_v11 = vor.u32 %v3996_v14, %v3993_v41  ;;  %7518 = vmatprep.subr.bf16.mxu1 %v7990_v60 }
 0x2fc   : > { %v4005_v47 = vor.u32 %v4004_v35, %v4001_v12  ;;  %v3979_v0 = vshrl.u32 %v3062_v32, 16  ;;  %v3982_v61 = vshll.u32 %v3062_v32, 16  ;;  %v10185_v15 = vsel %vm2975_vm5, %v3939_v39, %v3942_v20  ;;  %v2959_v39 = vld [vmem:[#allocation2 + $0xd0] sm:$0x8] }
 0x2fd   : > { %v4037_v21 = vshrl.u32 %v3303_v46, 16  ;;  %v4040_v33 = vshll.u32 %v3303_v46, 16  ;;  %v4045_v42 = vshrl.u32 %v3306_v58, 16  ;;  %4651 = vmatmul.mubr.bf16.gmra.mrb[204].mxu0 %v10185_v15  ;;  %5053 = vmatmul.mubr.bf16.gmra.mrb[192].mxu1 %v9657_v37  ;;  %v4048_v36 = vshll.u32 %v3306_v58, 16  ;;  %v8002_v58 = vld [vmem:[%s10954_s3 + $0xa0] sm:$0xff]  }
 0x2fe   : > { %v10192_v22 = vsel %vm2975_vm5, %v3997_v11, %v4005_v47  ;;  %v3981_v45 = vrot.slane %v3979_v0, 3  ;;  %v3984_v48 = vrot.slane %v3982_v61, 4  ;;  %v3064_v20 = vld [vmem:[#allocation2 + $0xc0] sm:$0xf8]  ;;  %5060 = vmatprep.mubr.bf16.mxu1 %v9776_v17  ;;  %v4033_v35 = vrot.slane %v3300_v4, 4  ;;  %7519 = vmatpush3.bf16.msra.mxu1 %v7990_v60 }
 0x2ff   : > { %4658 = vmatprep.mubr.bf16.mxu0 %v10192_v22  ;;  %v4039_v51 = vrot.slane %v4037_v21, 3  ;;  %v4042_v52 = vrot.slane %v4040_v33, 4  ;;  %v4047_v16 = vrot.slane %v4045_v42, 3  ;;  %v4025_v13 = vshrl.u32 %v3064_v20, 16  ;;  %7520 = vmatprep.subr.bf16.mxu1 %v7995_v53  ;;  %v2962_v21 = vld [vmem:[#allocation2 + $0xe0] sm:$0x8] }
 0x300   : > { %v3985_v41 = vor.u32 %v3984_v48, %v3981_v45  ;;  %v4050_v14 = vrot.slane %v4048_v36, 4  ;;  %v4028_v12 = vshll.u32 %v3064_v20, 16  ;;  %v3310_v61 = vshll.u32 %v10021_v27, 16  ;;  %v10204_v45 = vld [vmem:[#allocation2 + $0xe8] sm:$0xf] }
 0x301   : > { %v4043_v32 = vor.u32 %v4042_v52, %v4039_v51  ;;  %v4027_v37 = vrot.slane %v4025_v13, 3  ;;  %v3315_v46 = vshll.u32 %v3067_v26, 16  ;;  %v3308_v0 = vshrl.u32 %v10021_v27, 16 }
 0x302   : > { %v4051_v11 = vor.u32 %v4050_v14, %v4047_v16  ;;  %v4030_v47 = vrot.slane %v4028_v12, 4  ;;  %v3312_v33 = vrot.slane %v3310_v61, 1  ;;  %v3319_v4 = vshrl.u32 %v3067_v26, 16  ;;  %7521 = vmatpush3.bf16.msra.mxu1 %v7995_v53 }
 0x303   : > { %v3317_v42 = vrot.slane %v3315_v46, 1  ;;  %v2960_v60 = vsel %vm9255_vm7, 0, %v2959_v39  ;;  %v11134_v48 = vor.u32 %v10160_v7, %v10158_v59  ;;  %v4034_v27 = vor.u32 %v4033_v35, %v10182_v28  ;;  %7522 = vmatprep.subr.bf16.mxu1 %v8002_v58  ;;  %v8003_v59 = vld [vmem:[%s10954_s3 + $0xa8] sm:$0xff]  }
 0x304   : > { %v10213_v20 = vsel %vm2975_vm5, %v4043_v32, %v4051_v11  ;;  %v4031_v51 = vor.u32 %v4030_v47, %v4027_v37  ;;  %2961 = vst [vmem:[#allocation2 + $0xd0] sm:$0x8] %v2960_v60  ;;  %v3313_v26 = vor.u32 %v3312_v33, %v3308_v0  ;;  %v10216_v16 = vrot.slane %v3315_v46, 4  ;;  %v8004_v0 = vld [vmem:[%s10954_s3 + $0xb0] sm:$0xff]  }
 0x305   : > { %v10210_v36 = vsel %vm2975_vm5, %v3985_v41, %v11134_v48  ;;  %v3321_v52 = vor.u32 %v3319_v4, %v3317_v42  ;;  %v3325_v13 = vshll.u32 %v10045_v44, 16  ;;  %5061 = vmatmul.mubr.bf16.gmra.mrb[196].mxu1 %v9759_v34  ;;  %v10224_v7 = vrot.slane %v3319_v4, 3 }
 0x306   : > { %4659 = vmatmul.mubr.bf16.gmra.mrb[208].mxu0 %v10210_v36  ;;  %v3323_v28 = vshrl.u32 %v10045_v44, 16  ;;  %v3330_v53 = vshll.u32 %v10204_v45, 16  ;;  %v2963_v41 = vsel %vm9255_vm7, 0, %v2962_v21  ;;  %5068 = vmatprep.mubr.bf16.mxu1 %v9814_v6  ;;  %v3318_v14 = vsel %vm669_vm1, %v3313_v26, %v3317_v42 }
 0x307   : > { %4666 = vmatprep.mubr.bf16.mxu0 %v10213_v20  ;;  %v4091_v12 = vshrl.u32 %v3321_v52, 16  ;;  %v4094_v35 = vshll.u32 %v3321_v52, 16  ;;  %v3334_v39 = vshrl.u32 %v10204_v45, 16  ;;  %2964 = vst [vmem:[#allocation2 + $0xe0] sm:$0x8] %v2963_v41  ;;  %v4083_v32 = vshrl.u32 %v3318_v14, 16  ;;  %7523 = vmatpush3.bf16.msra.mxu1 %v8002_v58 }
 0x308   : > { %v4086_v37 = vshll.u32 %v3318_v14, 16  ;;  %v3327_v61 = vrot.slane %v3325_v13, 1  ;;  %v3332_v44 = vrot.slane %v3330_v53, 1  ;;  %v10237_v46 = vsel %vm2975_vm5, %v4031_v51, %v4034_v27  ;;  %7524 = vmatprep.subr.bf16.mxu1 %v8003_v59  ;;  %v10247_v14 = vld [vmem:[#allocation2 + $0xf8] sm:$0xf] }
 0x309   : > { %v4093_v11 = vrot.slane %v4091_v12, 3  ;;  %v4096_v47 = vrot.slane %v4094_v35, 4  ;;  %v4085_v21 = vrot.slane %v4083_v32, 3  ;;  %v4080_v26 = vor.u32 %v10216_v16, %v10224_v7  ;;  %v8005_v16 = vld [vmem:[%s10954_s3 + $0xb8] sm:$0xff]  }
 0x30a   : > { %v4088_v33 = vrot.slane %v4086_v37, 4  ;;  %v3328_v42 = vor.u32 %v3327_v61, %v3323_v28  ;;  %v3336_v4 = vor.u32 %v3334_v39, %v3332_v44  ;;  %v3338_v58 = vshrl.u32 %v10062_v55, 16 }
 0x30b   : > { %v4097_v60 = vor.u32 %v4096_v47, %v4093_v11  ;;  %v3066_v48 = vld [vmem:[#allocation2 + $0xd0] sm:$0xf8]  ;;  %v3340_v51 = vshll.u32 %v10062_v55, 16  ;;  %7525 = vmatpush3.bf16.msra.mxu1 %v8003_v59  ;;  %v3353_v45 = vshrl.u32 %v10084_v10, 16 }
 0x30c   : > { %v4089_v27 = vor.u32 %v4088_v33, %v4085_v21  ;;  %v4071_v52 = vshrl.u32 %v3066_v48, 16  ;;  %v4074_v13 = vshll.u32 %v3066_v48, 16  ;;  %v3333_v41 = vsel %vm669_vm1, %v3328_v42, %v3332_v44  ;;  %7526 = vmatprep.subr.bf16.mxu1 %v8004_v0  ;;  %v2965_v33 = vld [vmem:[#allocation2 + $0xf0] sm:$0x8] }
 0x30d   : > { %v4129_v12 = vshrl.u32 %v3333_v41, 16  ;;  %v4132_v28 = vshll.u32 %v3333_v41, 16  ;;  %v4137_v35 = vshrl.u32 %v3336_v4, 16  ;;  %v4140_v32 = vshll.u32 %v3336_v4, 16  ;;  %5069 = vmatmul.mubr.bf16.gmra.mrb[200].mxu1 %v9860_v50 }
 0x30e   : > { %4667 = vmatmul.mubr.bf16.gmra.mrb[212].mxu0 %v10237_v46  ;;  %v10254_v55 = vsel %vm2975_vm5, %v4089_v27, %v4097_v60  ;;  %v4073_v7 = vrot.slane %v4071_v52, 3  ;;  %v4076_v37 = vrot.slane %v4074_v13, 4  ;;  %v3068_v61 = vld [vmem:[#allocation2 + $0xe0] sm:$0xf8]  ;;  %v3342_v59 = vrot.slane %v3340_v51, 1  ;;  %5076 = vmatprep.mubr.bf16.mxu1 %v9883_v5 }
 0x30f   : > { %4674 = vmatprep.mubr.bf16.mxu0 %v10254_v55  ;;  %v4131_v44 = vrot.slane %v4129_v12, 3  ;;  %v4134_v11 = vrot.slane %v4132_v28, 4  ;;  %v4139_v47 = vrot.slane %v4137_v35, 3  ;;  %v4142_v21 = vrot.slane %v4140_v32, 4  ;;  %7527 = vmatpush3.bf16.msra.mxu1 %v8004_v0  ;;  %v10260_v13 = vld [vmem:[#allocation2 + $0x108] sm:$0xf] }
 0x310   : > { %v4077_v42 = vor.u32 %v4076_v37, %v4073_v7  ;;  %v4117_v4 = vshrl.u32 %v3068_v61, 16  ;;  %v4120_v48 = vshll.u32 %v3068_v61, 16  ;;  %v3343_v41 = vor.u32 %v3342_v59, %v3338_v58  ;;  %7528 = vmatprep.subr.bf16.mxu1 %v8005_v16  ;;  %v10265_v51 = vld [vmem:[%s10954_s3 + $0x200] sm:$0xff]  }
 0x311   : > { %v4135_v60 = vor.u32 %v4134_v11, %v4131_v44  ;;  %v4143_v27 = vor.u32 %v4142_v21, %v4139_v47  ;;  %v3345_v52 = vshll.u32 %v10247_v14, 16  ;;  %v4124_v12 = vrot.slane %v3334_v39, 3  ;;  %v2968_v39 = vld [vmem:[#allocation2 + $0x100] sm:$0x8] }
 0x312   : > { %v2966_v28 = vsel %vm9255_vm7, 0, %v2965_v33  ;;  %v10270_v35 = vsel %vm2975_vm5, %v4077_v42, %v4080_v26  ;;  %v4125_v0 = vrot.slane %v3330_v53, 4  ;;  %v3349_v32 = vshrl.u32 %v10247_v14, 16 }
 0x313   : > { %v3347_v58 = vrot.slane %v3345_v52, 1  ;;  %2967 = vst [vmem:[#allocation2 + $0xf0] sm:$0x8] %v2966_v28  ;;  %v4119_v7 = vrot.slane %v4117_v4, 3  ;;  %v4122_v37 = vrot.slane %v4120_v48, 4  ;;  %v3355_v61 = vshll.u32 %v10084_v10, 16  ;;  %7529 = vmatpush3.bf16.msra.mxu1 %v8005_v16 }
 0x314   : > { %v11018_v59 = vshll.u32 %v10260_v13, 16  ;;  %v10278_v44 = vsel %vm2975_vm5, %v4135_v60, %v4143_v27  ;;  %7562 = vmatprep.subr.bf16.mxu1 %v10265_v51  ;;  %v3364_v21 = vshrl.u32 %v10260_v13, 16  ;;  %v2969_v42 = vsel %vm9255_vm7, 0, %v2968_v39 }
 0x315   : > { %v3348_v26 = vsel %vm669_vm1, %v3343_v41, %v3347_v58  ;;  %v3351_v11 = vor.u32 %v3349_v32, %v3347_v58  ;;  %5077 = vmatmul.mubr.bf16.gmra.mrb[204].mxu1 %v9927_v1  ;;  %v3357_v47 = vrot.slane %v3355_v61, 1  ;;  %v4126_v4 = vor.u32 %v4125_v0, %v4124_v12  ;;  %2970 = vst [vmem:[#allocation2 + $0x100] sm:$0x8] %v2969_v42 }
 0x316   : > { %4675 = vmatmul.mubr.bf16.gmra.mrb[216].mxu0 %v10270_v35  ;;  %v4175_v53 = vshrl.u32 %v3348_v26, 16  ;;  %v4178_v14 = vshll.u32 %v3348_v26, 16  ;;  %5084 = vmatprep.mubr.bf16.mxu1 %v9956_v19  ;;  %v3362_v10 = vrot.slane %v11018_v59, 1  ;;  %v4123_v41 = vor.u32 %v4122_v37, %v4119_v7 }
 0x317   : > { %4682 = vmatprep.mubr.bf16.mxu0 %v10278_v44  ;;  %v4183_v16 = vshrl.u32 %v3351_v11, 16  ;;  %v4186_v33 = vshll.u32 %v3351_v11, 16  ;;  %v3358_v27 = vor.u32 %v3357_v47, %v3353_v45  ;;  %v4170_v25 = vrot.slane %v3349_v32, 3 }
 0x318   : > { %v4177_v48 = vrot.slane %v4175_v53, 3  ;;  %v4180_v60 = vrot.slane %v4178_v14, 4  ;;  %v3366_v61 = vor.u32 %v3364_v21, %v3362_v10  ;;  %v4171_v49 = vrot.slane %v3345_v52, 4 }
 0x319   : > { %v4185_v28 = vrot.slane %v4183_v16, 3  ;;  %v4188_v58 = vrot.slane %v4186_v33, 4  ;;  %v3363_v11 = vsel %vm669_vm1, %v3358_v27, %v3362_v10  ;;  %v10294_v45 = vsel %vm2975_vm5, %v4123_v41, %v4126_v4 }
 0x31a   : > { %v4181_v26 = vor.u32 %v4180_v60, %v4177_v48  ;;  %v3070_v40 = vld [vmem:[#allocation2 + $0xf0] sm:$0xf8]  ;;  %v4317_v63 = vshrl.u32 %v3363_v11, 16  ;;  %v4320_v39 = vshll.u32 %v3363_v11, 16  ;;  %v4325_v12 = vshrl.u32 %v3366_v61, 16 }
 0x31b   : > { %v4189_v24 = vor.u32 %v4188_v58, %v4185_v28  ;;  %v4163_v54 = vshrl.u32 %v3070_v40, 16  ;;  %v4166_v59 = vshll.u32 %v3070_v40, 16  ;;  %v4328_v0 = vshll.u32 %v3366_v61, 16 }
 0x31c   : > { %v4319_v32 = vrot.slane %v4317_v63, 3  ;;  %v4322_v14 = vrot.slane %v4320_v39, 4  ;;  %v4327_v40 = vrot.slane %v4325_v12, 3  ;;  %v3072_v52 = vld [vmem:[#allocation2 + $0x100] sm:$0xf8]  ;;  %v4172_v33 = vor.u32 %v4171_v49, %v4170_v25 }
 0x31d   : > { %v10297_v7 = vsel %vm2975_vm5, %v4181_v26, %v4189_v24  ;;  %v4165_v37 = vrot.slane %v4163_v54, 3  ;;  %v4168_v53 = vrot.slane %v4166_v59, 4  ;;  %5085 = vmatmul.mubr.bf16.gmra.mrb[208].mxu1 %v9999_v30  ;;  %v4330_v47 = vrot.slane %v4328_v0, 4  ;;  %v3094_v39 = vld [vmem:[#allocation2 + $0x8] sm:$0x1f] }
 0x31e   : > { %4683 = vmatmul.mubr.bf16.gmra.mrb[220].mxu0 %v10294_v45  ;;  %5092 = vmatprep.mubr.bf16.mxu1 %v10012_v56  ;;  %v4305_v10 = vshrl.u32 %v3072_v52, 16  ;;  %v4308_v24 = vshll.u32 %v3072_v52, 16  ;;  %v4323_v42 = vor.u32 %v4322_v14, %v4319_v32  ;;  %v4312_v59 = vrot.slane %v3364_v21, 3 }
 0x31f   : > { %4690 = vmatprep.mubr.bf16.mxu0 %v10297_v7  ;;  %v4169_v16 = vor.u32 %v4168_v53, %v4165_v37  ;;  %v4331_v54 = vor.u32 %v4330_v47, %v4327_v40  ;;  %v11135_v60 = vshll.u32 %v10260_v13, 16 }
 0x320   : > { %v4307_v48 = vrot.slane %v4305_v10, 3  ;;  %v4310_v63 = vrot.slane %v4308_v24, 4 }
 0x321   : > { %v10304_v4 = vsel %vm2975_vm5, %v4169_v16, %v4172_v33  ;;  %v4313_v27 = vrot.slane %v11135_v60, 4  ;;  %v10310_v41 = vsel %vm2975_vm5, %v4323_v42, %v4331_v54  ;;  %v11138_v60 = vld [vmem:[#allocation11_spill] sm:$0xff] }
 0x322   : > { %v4311_v25 = vor.u32 %v4310_v63, %v4307_v48  ;;  %v10398_v63 = vld [vmem:[#allocation2 + $0x110] sm:$0xf0] }
 0x323   : > { %v4314_v21 = vor.u32 %v4313_v27, %v4312_v59 }
 0x325   : > { %5093 = vmatmul.mubr.bf16.gmra.mrb[212].mxu1 %v10036_v9  ;;  %v10316_v28 = vsel %vm2975_vm5, %v4311_v25, %v4314_v21 }
 0x326   : > { %4691 = vmatmul.mubr.bf16.gmra.mrb[224].mxu0 %v10304_v4  ;;  %5100 = vmatprep.mubr.bf16.mxu1 %v10056_v38 }
 0x327   : > { %4698 = vmatprep.mubr.bf16.mxu0 %v10310_v41 }
 0x32d   : > { %5101 = vmatmul.mubr.bf16.gmra.mrb[216].mxu1 %v10048_v2 }
 0x32e   : > { %4699 = vmatmul.mubr.bf16.gmra.mrb[228].mxu0 %v10316_v28  ;;  %5108 = vmatprep.mubr.bf16.mxu1 %v10077_v31 }
 0x32f   : > { %5608 = vmatprep.mubr.bf16.mxu0 %v9776_v17 }
 0x334   : > { %v6918_v13 = vpop.f32.mrb[168].mxu0 }
 0x335   : > { %5109 = vmatmul.mubr.bf16.gmra.mrb[220].mxu1 %v10089_v57  ;;  %v6919_v58 = vpop.f32.mrb[169].mxu0 }
 0x336   : > { %5609 = vmatmul.mubr.bf16.vlgmr.msra.gmra.mrb[232].mxu0 %v9759_v34  ;;  %5116 = vmatprep.mubr.bf16.mxu1 %v10113_v18  ;;  %v10326_v61 = vadd.f32 %v6919_v58, %v6918_v13  ;;  %v6921_v26 = vpop.f32.mrb[170].mxu0  ;;  %v8012_v13 = vld [vmem:[%s10954_s3 + $0x230] sm:$0xff]   ;;  %v3075_v58 = vld [vmem:[#allocation2 + $0x118] sm:$0xf] }
 0x337   : > { %5616 = vmatprep.mubr.bf16.mxu0 %v9814_v6  ;;  %v6922_v11 = vpop.f32.mrb[171].mxu0 }
 0x338   : > { %v10328_v49 = vadd.f32 %v6922_v11, %v6921_v26  ;;  %v3370_v26 = vshll.u32 %v10398_v63, 16  ;;  %v3375_v11 = vshll.u32 %v3075_v58, 16 }
 0x33d   : > { %5117 = vmatmul.mubr.bf16.gmra.mrb[224].mxu1 %v10126_v43 }
 0x33e   : > { %5617 = vmatmul.mubr.bf16.gmra.mrb[236].mxu0 %v9860_v50  ;;  %5124 = vmatprep.mubr.bf16.mxu1 %v10137_v3 }
 0x33f   : > { %5624 = vmatprep.mubr.bf16.mxu0 %v9883_v5 }
 0x345   : > { %5125 = vmatmul.mubr.bf16.gmra.mrb[228].mxu1 %v10185_v15 }
 0x346   : > { %5625 = vmatmul.mubr.bf16.gmra.mrb[240].mxu0 %v9927_v1  ;;  %5132 = vmatprep.mubr.bf16.mxu1 %v10192_v22 }
 0x347   : > { %5632 = vmatprep.mubr.bf16.mxu0 %v9956_v19  ;;  %v3418_v19 = vrot.slane %v10115_v29, 1 }
 0x34b   : > { %v6924_v34 = vpop.f32.mrb[172].mxu0 }
 0x34c   : > { %v6925_v17 = vpop.f32.mrb[173].mxu0 }
 0x34d   : > { %5133 = vmatmul.mubr.bf16.gmra.mrb[232].mxu1 %v10210_v36  ;;  %v10340_v6 = vadd.f32 %v6925_v17, %v6924_v34  ;;  %v6927_v50 = vpop.f32.mrb[174].mxu0  ;;  %v3372_v34 = vrot.slane %v3370_v26, 1  ;;  %v8013_v17 = vld [vmem:[%s10954_s3 + $0x238] sm:$0xff]   ;;  %v11146_v26 = vld [vmem:[#allocation3_spill] sm:$0xff] }
 0x34e   : > { %5633 = vmatmul.mubr.bf16.gmra.mrb[244].mxu0 %v9999_v30  ;;  %5140 = vmatprep.mubr.bf16.mxu1 %v10213_v20  ;;  %v6928_v5 = vpop.f32.mrb[175].mxu0  ;;  %v3419_v30 = vrot.slane %v3094_v39, 1  ;;  %v3377_v39 = vrot.slane %v3375_v11, 1 }
 0x34f   : > { %5640 = vmatprep.mubr.bf16.mxu0 %v10012_v56  ;;  %v10344_v1 = vadd.f32 %v6928_v5, %v6927_v50  ;;  %v11139_v50 = vld [vmem:[#allocation14_spill] sm:$0xff]  ;;  %v11140_v5 = vld [vmem:[#allocation12_spill] sm:$0xff] }
 0x350   : > { %v3420_v12 = vsel %vm930_vm0, %v3418_v19, %v3419_v30  ;;  %v3513_v53 = vshll.u32 %v3419_v30, 16  ;;  %v3379_v19 = vshrl.u32 %v3075_v58, 16 }
 0x351   : > { %v3505_v37 = vshll.u32 %v3420_v12, 16 }
 0x352   : > { %v3515_v16 = vrot.slane %v3513_v53, 4  ;;  %v11142_v53 = vld [vmem:[#allocation16_spill] sm:$0xff] }
 0x355   : > { %5141 = vmatmul.mubr.bf16.gmra.mrb[236].mxu1 %v10237_v46 }
 0x356   : > { %5641 = vmatmul.mubr.bf16.gmra.mrb[248].mxu0 %v10036_v9  ;;  %5148 = vmatprep.mubr.bf16.mxu1 %v10254_v55  ;;  %v3502_v9 = vshrl.u32 %v3420_v12, 16 }
 0x357   : > { %5648 = vmatprep.mubr.bf16.mxu0 %v10056_v38  ;;  %v3510_v38 = vshrl.u32 %v3419_v30, 16 }
 0x358   : > { %v3504_v47 = vrot.slane %v3502_v9, 3 }
 0x359   : > { %v3512_v52 = vrot.slane %v3510_v38, 3  ;;  %v11141_v38 = vld [vmem:[#allocation17_spill] sm:$0xff] }
 0x35b   : > { %v3516_v33 = vor.u32 %v3515_v16, %v3512_v52 }
 0x35d   : > { %5149 = vmatmul.mubr.bf16.gmra.mrb[240].mxu1 %v10270_v35  ;;  %v6930_v56 = vpop.f32.mrb[176].mxu0 }
 0x35e   : > { %5649 = vmatmul.mubr.bf16.gmra.mrb[252].mxu0 %v10048_v2  ;;  %5156 = vmatprep.mubr.bf16.mxu1 %v10278_v44  ;;  %v6931_v0 = vpop.f32.mrb[177].mxu0  ;;  %v3507_v2 = vrot.slane %v3505_v37, 4 }
 0x35f   : > { %5656 = vmatprep.mubr.bf16.mxu0 %v10077_v31  ;;  %v10356_v32 = vadd.f32 %v6931_v0, %v6930_v56  ;;  %v6933_v29 = vpop.f32.mrb[178].mxu0  ;;  %v3381_v56 = vor.u32 %v3379_v19, %v3377_v39 }
 0x360   : > { %v6934_v14 = vpop.f32.mrb[179].mxu0  ;;  %v3508_v31 = vor.u32 %v3507_v2, %v3504_v47 }
 0x361   : > { %v10358_v40 = vadd.f32 %v6934_v14, %v6933_v29  ;;  %v5355_v2 = vshrl.u32 %v3381_v56, 16  ;;  %v5358_v52 = vshll.u32 %v3381_v56, 16 }
 0x362   : > { %v3517_v10 = vsel %vm2975_vm5, %v3508_v31, %v3516_v33 }
 0x363   : > { %v5357_v33 = vrot.slane %v5355_v2, 3 }
 0x365   : > { %5157 = vmatmul.mubr.bf16.gmra.mrb[244].mxu1 %v10294_v45 }
 0x366   : > { %5657 = vmatmul.mubr.bf16.gmra.mrb[0].mxu0 %v10089_v57  ;;  %5164 = vmatprep.mubr.bf16.mxu1 %v10297_v7 }
 0x367   : > { %5664 = vmatprep.mubr.bf16.mxu0 %v10113_v18  ;;  %v8007_v18 = vld [vmem:[%s10954_s3 + $0x208] sm:$0xff]  }
 0x36d   : > { %5165 = vmatmul.mubr.bf16.gmra.mrb[248].mxu1 %v10304_v4 }
 0x36e   : > { %5665 = vmatmul.mubr.bf16.gmra.mrb[4].mxu0 %v10126_v43  ;;  %7530 = vmatprep.mubr.bf16.mxu1 %v3517_v10  ;;  %v5360_v10 = vrot.slane %v5358_v52, 4 }
 0x36f   : > { %5672 = vmatprep.mubr.bf16.mxu0 %v10137_v3  ;;  %v8008_v3 = vld [vmem:[%s10954_s3 + $0x210] sm:$0xff]  }
 0x371   : > { %v6936_v24 = vpop.f32.mrb[180].mxu0 }
 0x372   : > { %v6937_v42 = vpop.f32.mrb[181].mxu0 }
 0x373   : > { %v10368_v57 = vadd.f32 %v6937_v42, %v6936_v24  ;;  %v6939_v54 = vpop.f32.mrb[182].mxu0  ;;  %v3074_v24 = vld [vmem:[#allocation2 + $0x110] sm:$0xf8] }
 0x374   : > { %v6940_v59 = vpop.f32.mrb[183].mxu0 }
 0x375   : > { %7531 = vmatmul.mubr.bf16.vlgmr.msra.gmra.mrb[156].mxu1 %v9632_v8  ;;  %v10375_v43 = vadd.f32 %v6940_v59, %v6939_v54  ;;  %v11136_v8 = vld [vmem:[#allocation10_spill] sm:$0xff]  ;;  %v5338_v59 = vshll.u32 %v3074_v24, 16 }
 0x376   : > { %5673 = vmatmul.mubr.bf16.gmra.mrb[8].mxu0 %v10185_v15  ;;  %7534 = vmatprep.mubr.bf16.mxu1 %v9691_v23  ;;  %v8009_v15 = vld [vmem:[%s10954_s3 + $0x218] sm:$0xff]  }
 0x377   : > { %5680 = vmatprep.mubr.bf16.mxu0 %v10192_v22  ;;  %7563 = vmatpush3.bf16.msra.mxu1 %v10265_v51  ;;  %v8010_v22 = vld [vmem:[%s10954_s3 + $0x220] sm:$0xff]   ;;  %v8011_v51 = vld [vmem:[%s10954_s3 + $0x228] sm:$0xff]  }
 0x378   : > { %7564 = vmatprep.subr.bf16.mxu1 %v8007_v18 }
 0x37b   : > { %7565 = vmatpush3.bf16.msra.mxu1 %v8007_v18  ;;  %v5335_v18 = vshrl.u32 %v3074_v24, 16 }
 0x37c   : > { %7566 = vmatprep.subr.bf16.mxu1 %v8008_v3 }
 0x37d   : > { %7535 = vmatmul.mubr.bf16.gmra.mrb[160].mxu1 %v9719_v62 }
 0x37e   : > { %5681 = vmatmul.mubr.bf16.gmra.mrb[12].mxu0 %v10210_v36  ;;  %7538 = vmatprep.mubr.bf16.mxu1 %v11136_v8  ;;  %v11137_v36 = vld [vmem:[#allocation13_spill] sm:$0xff] }
 0x37f   : > { %5688 = vmatprep.mubr.bf16.mxu0 %v10213_v20  ;;  %7567 = vmatpush3.bf16.msra.mxu1 %v8008_v3 }
 0x380   : > { %7568 = vmatprep.subr.bf16.mxu1 %v8009_v15 }
 0x383   : > { %7569 = vmatpush3.bf16.msra.mxu1 %v8009_v15 }
 0x384   : > { %7570 = vmatprep.subr.bf16.mxu1 %v8010_v22  ;;  %v6942_v48 = vpop.f32.mrb[184].mxu0 }
 0x385   : > { %7539 = vmatmul.mubr.bf16.gmra.mrb[164].mxu1 %v11137_v36  ;;  %v6943_v20 = vpop.f32.mrb[185].mxu0 }
 0x386   : > { %5689 = vmatmul.mubr.bf16.gmra.mrb[16].mxu0 %v10237_v46  ;;  %7542 = vmatprep.mubr.bf16.mxu1 %v11138_v60  ;;  %v10402_v27 = vadd.f32 %v6943_v20, %v6942_v48  ;;  %v6945_v25 = vpop.f32.mrb[186].mxu0 }
 0x387   : > { %5696 = vmatprep.mubr.bf16.mxu0 %v10254_v55  ;;  %7571 = vmatpush3.bf16.msra.mxu1 %v8010_v22  ;;  %v6946_v21 = vpop.f32.mrb[187].mxu0  ;;  %v3368_v55 = vshrl.u32 %v10398_v63, 16 }
 0x388   : > { %7572 = vmatprep.subr.bf16.mxu1 %v8011_v51  ;;  %v10407_v46 = vadd.f32 %v6946_v21, %v6945_v25  ;;  %v5342_v25 = vrot.slane %v3379_v19, 3  ;;  %v5343_v21 = vrot.slane %v3375_v11, 4  ;;  %v11147_v19 = vld [vmem:[#allocation5_spill] sm:$0xff] }
 0x389   : > { %v3373_v30 = vor.u32 %v3372_v34, %v3368_v55 }
 0x38a   : > { %v5344_v34 = vor.u32 %v5343_v21, %v5342_v25 }
 0x38b   : > { %7573 = vmatpush3.bf16.msra.mxu1 %v8011_v51  ;;  %v3378_v0 = vsel %vm669_vm1, %v3373_v30, %v3377_v39  ;;  %v5361_v51 = vor.u32 %v5360_v10, %v5357_v33 }
 0x38c   : > { %7574 = vmatprep.subr.bf16.mxu1 %v8012_v13  ;;  %v5347_v14 = vshrl.u32 %v3378_v0, 16  ;;  %v5350_v47 = vshll.u32 %v3378_v0, 16 }
 0x38d   : > { %7543 = vmatmul.mubr.bf16.gmra.mrb[168].mxu1 %v11139_v50 }
 0x38e   : > { %5697 = vmatmul.mubr.bf16.gmra.mrb[20].mxu0 %v10270_v35  ;;  %7546 = vmatprep.mubr.bf16.mxu1 %v11140_v5  ;;  %v5349_v16 = vrot.slane %v5347_v14, 3  ;;  %v5352_v31 = vrot.slane %v5350_v47, 4 }
 0x38f   : > { %5704 = vmatprep.mubr.bf16.mxu0 %v10278_v44  ;;  %7575 = vmatpush3.bf16.msra.mxu1 %v8012_v13  ;;  %v5340_v13 = vrot.slane %v5338_v59, 4 }
 0x390   : > { %7576 = vmatprep.subr.bf16.mxu1 %v8013_v17  ;;  %v5353_v22 = vor.u32 %v5352_v31, %v5349_v16 }
 0x392   : > { %v6948_v12 = vpop.f32.mrb[188].mxu0  ;;  %v5362_v58 = vsel %vm2975_vm5, %v5353_v22, %v5361_v51  ;;  %v3469_v22 = vrot.slane %v10398_v63, 1 }
 0x393   : > { %v6949_v9 = vpop.f32.mrb[189].mxu0  ;;  %7577 = vmatpush3.bf16.msra.mxu1 %v8013_v17 }
 0x394   : > { %v10419_v37 = vadd.f32 %v6949_v9, %v6948_v12  ;;  %v6951_v35 = vpop.f32.mrb[190].mxu0 }
 0x395   : > { %7547 = vmatmul.mubr.bf16.gmra.mrb[172].mxu1 %v11141_v38  ;;  %v6952_v44 = vpop.f32.mrb[191].mxu0 }
 0x396   : > { %5705 = vmatmul.mubr.bf16.gmra.mrb[24].mxu0 %v10294_v45  ;;  %7550 = vmatprep.mubr.bf16.mxu1 %v11142_v53  ;;  %v10425_v29 = vadd.f32 %v6952_v44, %v6951_v35  ;;  %v11143_v45 = vld [vmem:[#allocation15_spill] sm:$0xff] }
 0x397   : > { %5712 = vmatprep.mubr.bf16.mxu0 %v10297_v7  ;;  %v11144_v7 = vld [vmem:[#allocation18_spill] sm:$0xff] }
 0x39c   : > { %v6954_v42 = vpop.f32.mrb[192].mxu0 }
 0x39d   : > { %7551 = vmatmul.mubr.bf16.gmra.mrb[176].mxu1 %v11143_v45  ;;  %v6955_v54 = vpop.f32.mrb[193].mxu0 }
 0x39e   : > { %5713 = vmatmul.mubr.bf16.gmra.mrb[28].mxu0 %v10304_v4  ;;  %7554 = vmatprep.mubr.bf16.mxu1 %v11144_v7  ;;  %v10431_v3 = vadd.f32 %v6955_v54, %v6954_v42  ;;  %v6957_v15 = vpop.f32.mrb[194].mxu0  ;;  %v5337_v4 = vrot.slane %v5335_v18, 3 }
 0x39f   : > { %5720 = vmatprep.mubr.bf16.mxu0 %v10310_v41  ;;  %v6958_v48 = vpop.f32.mrb[195].mxu0  ;;  %v11145_v41 = vld [vmem:[#allocation4_spill] sm:$0xff] }
 0x3a0   : > { %v10433_v20 = vadd.f32 %v6958_v48, %v6957_v15  ;;  %v5341_v55 = vor.u32 %v5340_v13, %v5337_v4  ;;  %v3111_v15 = vld [vmem:[#allocation2 + $0x118] sm:$0x1f] }
 0x3a1   : > { %v3470_v51 = vrot.slane %v3111_v15, 1 }
 0x3a2   : > { %v5345_v17 = vsel %vm2975_vm5, %v5341_v55, %v5344_v34 }
 0x3a5   : > { %7555 = vmatmul.mubr.bf16.gmra.mrb[180].mxu1 %v11145_v41 }
 0x3a6   : > { %5721 = vmatmul.mubr.bf16.gmra.mrb[32].mxu0 %v10316_v28  ;;  %7558 = vmatprep.mubr.bf16.mxu1 %v11146_v26 }
 0x3a7   : > { %5728 = vmatprep.mubr.bf16.mxu0 %v5362_v58 }
 0x3ab   : > { %v6960_v39 = vpop.f32.mrb[196].mxu0 }
 0x3ac   : > { %v6961_v30 = vpop.f32.mrb[197].mxu0 }
 0x3ad   : > { %7559 = vmatmul.mubr.bf16.gmra.mrb[184].mxu1 %v11147_v19  ;;  %v10441_v11 = vadd.f32 %v6961_v30, %v6960_v39  ;;  %v6963_v12 = vpop.f32.mrb[198].mxu0  ;;  %v5372_v39 = vshrl.u32 %v3470_v51, 16  ;;  %v5375_v30 = vshll.u32 %v3470_v51, 16 }
 0x3ae   : > { %5729 = vmatmul.mubr.bf16.gmra.mrb[36].mxu0 %v5345_v17  ;;  %7578 = vmatprep.mubr.bf16.mxu1 %v9691_v23  ;;  %v6964_v28 = vpop.f32.mrb[199].mxu0 }
 0x3af   : > { %v10444_v56 = vadd.f32 %v6964_v28, %v6963_v12 }
 0x3b5   : > { %7579 = vmatmul.mubr.bf16.vlgmr.msra.gmra.mrb[156].mxu1 %v9719_v62 }
 0x3b6   : > { %7582 = vmatprep.mubr.bf16.mxu1 %v11136_v8 }
 0x3bb   : > { %v6966_v9 = vpop.f32.mrb[200].mxu0 }
 0x3bc   : > { %v6967_v0 = vpop.f32.mrb[201].mxu0 }
 0x3bd   : > { %7583 = vmatmul.mubr.bf16.gmra.mrb[160].mxu1 %v11137_v36  ;;  %v10449_v35 = vadd.f32 %v6967_v0, %v6966_v9  ;;  %v6969_v44 = vpop.f32.mrb[202].mxu0 }
 0x3be   : > { %7586 = vmatprep.mubr.bf16.mxu1 %v11138_v60  ;;  %v6970_v14 = vpop.f32.mrb[203].mxu0 }
 0x3bf   : > { %v10452_v47 = vadd.f32 %v6970_v14, %v6969_v44 }
 0x3c5   : > { %7587 = vmatmul.mubr.bf16.gmra.mrb[164].mxu1 %v11139_v50 }
 0x3c6   : > { %7590 = vmatprep.mubr.bf16.mxu1 %v11140_v5 }
 0x3c8   : > { %v7054_v23 = vpop.f32.mrb[188].mxu1 }
 0x3c9   : > { %v7055_v62 = vpop.f32.mrb[189].mxu1 }
 0x3ca   : > { %v7056_v2 = vadd.f32 %v7055_v62, %v7054_v23  ;;  %v7057_v8 = vpop.f32.mrb[190].mxu1  ;;  %v5374_v62 = vrot.slane %v5372_v39, 3 }
 0x3cb   : > { %v7058_v52 = vpop.f32.mrb[191].mxu1 }
 0x3cc   : > { %v10457_v16 = vadd.f32 %v7056_v2, %v10326_v61  ;;  %v7059_v36 = vadd.f32 %v7058_v52, %v7057_v8  ;;  %v5377_v2 = vrot.slane %v5375_v30, 4 }
 0x3cd   : > { %7591 = vmatmul.mubr.bf16.gmra.mrb[168].mxu1 %v11141_v38 }
 0x3ce   : > { %v10461_v60 = vadd.f32 %v7059_v36, %v10328_v49  ;;  %7594 = vmatprep.mubr.bf16.mxu1 %v11142_v53 }
 0x3d0   : > { %v6972_v31 = vpop.f32.mrb[204].mxu0  ;;  %v7060_v50 = vpop.f32.mrb[192].mxu1 }
 0x3d1   : > { %v6973_v33 = vpop.f32.mrb[205].mxu0  ;;  %v7061_v5 = vpop.f32.mrb[193].mxu1 }
 0x3d2   : > { %v10464_v10 = vadd.f32 %v6973_v33, %v6972_v31  ;;  %v6975_v24 = vpop.f32.mrb[206].mxu0  ;;  %v7062_v42 = vadd.f32 %v7061_v5, %v7060_v50  ;;  %v7063_v54 = vpop.f32.mrb[194].mxu1 }
 0x3d3   : > { %v6976_v18 = vpop.f32.mrb[207].mxu0  ;;  %v7064_v61 = vpop.f32.mrb[195].mxu1 }
 0x3d4   : > { %v10466_v59 = vadd.f32 %v6976_v18, %v6975_v24  ;;  %v10469_v38 = vadd.f32 %v7062_v42, %v10340_v6  ;;  %v7065_v49 = vadd.f32 %v7064_v61, %v7063_v54  ;;  %v11148_v42 = vld [vmem:[#allocation6_spill] sm:$0xff]  ;;  %v5378_v18 = vor.u32 %v5377_v2, %v5374_v62 }
 0x3d5   : > { %7595 = vmatmul.mubr.bf16.gmra.mrb[172].mxu1 %v11143_v45  ;;  %v3471_v45 = vsel %vm930_vm0, %v3469_v22, %v3470_v51 }
 0x3d6   : > { %v10473_v53 = vadd.f32 %v7065_v49, %v10344_v1  ;;  %7598 = vmatprep.mubr.bf16.mxu1 %v11144_v7  ;;  %v5364_v28 = vshrl.u32 %v3471_v45, 16  ;;  %v5367_v9 = vshll.u32 %v3471_v45, 16 }
 0x3d8   : > { %v7066_v25 = vpop.f32.mrb[196].mxu1  ;;  %v5366_v36 = vrot.slane %v5364_v28, 3  ;;  %v5369_v31 = vrot.slane %v5367_v9, 4 }
 0x3d9   : > { %v6978_v48 = vpop.f32.mrb[208].mxu0  ;;  %v7067_v4 = vpop.f32.mrb[197].mxu1 }
 0x3da   : > { %v6979_v21 = vpop.f32.mrb[209].mxu0  ;;  %v7068_v58 = vadd.f32 %v7067_v4, %v7066_v25  ;;  %v7069_v55 = vpop.f32.mrb[198].mxu1  ;;  %v5370_v54 = vor.u32 %v5369_v31, %v5366_v36 }
 0x3db   : > { %v10477_v13 = vadd.f32 %v6979_v21, %v6978_v48  ;;  %v6981_v6 = vpop.f32.mrb[210].mxu0  ;;  %v7070_v17 = vpop.f32.mrb[199].mxu1 }
 0x3dc   : > { %v6982_v34 = vpop.f32.mrb[211].mxu0  ;;  %v10483_v7 = vadd.f32 %v7068_v58, %v10356_v32  ;;  %v7071_v63 = vadd.f32 %v7070_v17, %v7069_v55  ;;  %v5379_v21 = vsel %vm2975_vm5, %v5370_v54, %v5378_v18 }
 0x3dd   : > { %v10480_v1 = vadd.f32 %v6982_v34, %v6981_v6  ;;  %7599 = vmatmul.mubr.bf16.gmra.mrb[176].mxu1 %v11145_v41 }
 0x3de   : > { %v10487_v12 = vadd.f32 %v7071_v63, %v10358_v40  ;;  %7602 = vmatprep.mubr.bf16.mxu1 %v11146_v26 }
 0x3e0   : > { %v7072_v44 = vpop.f32.mrb[200].mxu1 }
 0x3e1   : > { %v6984_v0 = vpop.f32.mrb[212].mxu0  ;;  %v7073_v23 = vpop.f32.mrb[201].mxu1 }
 0x3e2   : > { %v6985_v14 = vpop.f32.mrb[213].mxu0  ;;  %v7074_v52 = vadd.f32 %v7073_v23, %v7072_v44  ;;  %v7075_v41 = vpop.f32.mrb[202].mxu1 }
 0x3e3   : > { %v10490_v32 = vadd.f32 %v6985_v14, %v6984_v0  ;;  %v6987_v8 = vpop.f32.mrb[214].mxu0  ;;  %v7076_v40 = vpop.f32.mrb[203].mxu1 }
 0x3e4   : > { %v6988_v50 = vpop.f32.mrb[215].mxu0  ;;  %v10495_v26 = vadd.f32 %v7074_v52, %v10368_v57  ;;  %v7077_v5 = vadd.f32 %v7076_v40, %v7075_v41 }
 0x3e5   : > { %v10492_v33 = vadd.f32 %v6988_v50, %v6987_v8  ;;  %7603 = vmatmul.mubr.bf16.gmra.mrb[180].mxu1 %v11147_v19 }
 0x3e6   : > { %v10499_v24 = vadd.f32 %v7077_v5, %v10375_v43  ;;  %7606 = vmatprep.mubr.bf16.mxu1 %v11148_v42 }
 0x3e8   : > { %v7078_v49 = vpop.f32.mrb[204].mxu1 }
 0x3e9   : > { %v6990_v61 = vpop.f32.mrb[216].mxu0  ;;  %v7079_v22 = vpop.f32.mrb[205].mxu1 }
 0x3ea   : > { %v6991_v15 = vpop.f32.mrb[217].mxu0  ;;  %v7080_v25 = vadd.f32 %v7079_v22, %v7078_v49  ;;  %v7081_v57 = vpop.f32.mrb[206].mxu1 }
 0x3eb   : > { %v10502_v51 = vadd.f32 %v6991_v15, %v6990_v61  ;;  %v6993_v48 = vpop.f32.mrb[218].mxu0  ;;  %v7082_v19 = vpop.f32.mrb[207].mxu1 }
 0x3ec   : > { %v6994_v4 = vpop.f32.mrb[219].mxu0  ;;  %v10508_v43 = vadd.f32 %v7080_v25, %v10402_v27  ;;  %v7083_v58 = vadd.f32 %v7082_v19, %v7081_v57 }
 0x3ed   : > { %v10505_v6 = vadd.f32 %v6994_v4, %v6993_v48  ;;  %7607 = vmatmul.mubr.bf16.gmra.mrb[184].mxu1 %v5379_v21 }
 0x3ee   : > { %v10511_v55 = vadd.f32 %v7083_v58, %v10407_v46 }
 0x3f0   : > { %v7084_v17 = vpop.f32.mrb[208].mxu1 }
 0x3f1   : > { %v6996_v34 = vpop.f32.mrb[220].mxu0  ;;  %v7085_v63 = vpop.f32.mrb[209].mxu1 }
 0x3f2   : > { %v6997_v45 = vpop.f32.mrb[221].mxu0  ;;  %v7086_v28 = vadd.f32 %v7085_v63, %v7084_v17  ;;  %v7087_v9 = vpop.f32.mrb[210].mxu1 }
 0x3f3   : > { %v10513_v39 = vadd.f32 %v6997_v45, %v6996_v34  ;;  %v6999_v30 = vpop.f32.mrb[222].mxu0  ;;  %v7088_v44 = vpop.f32.mrb[211].mxu1 }
 0x3f4   : > { %v7000_v0 = vpop.f32.mrb[223].mxu0  ;;  %v10518_v27 = vadd.f32 %v7086_v28, %v10419_v37  ;;  %v7089_v23 = vadd.f32 %v7088_v44, %v7087_v9 }
 0x3f5   : > { %v10515_v14 = vadd.f32 %v7000_v0, %v6999_v30 }
 0x3f6   : > { %v10521_v46 = vadd.f32 %v7089_v23, %v10425_v29 }
 0x3f8   : > { %v7090_v2 = vpop.f32.mrb[212].mxu1 }
 0x3f9   : > { %v7002_v62 = vpop.f32.mrb[224].mxu0  ;;  %v7091_v52 = vpop.f32.mrb[213].mxu1 }
 0x3fa   : > { %v7003_v8 = vpop.f32.mrb[225].mxu0  ;;  %v7092_v31 = vadd.f32 %v7091_v52, %v7090_v2  ;;  %v7093_v50 = vpop.f32.mrb[214].mxu1 }
 0x3fb   : > { %v10523_v41 = vadd.f32 %v7003_v8, %v7002_v62  ;;  %v7005_v36 = vpop.f32.mrb[226].mxu0  ;;  %v7094_v5 = vpop.f32.mrb[215].mxu1 }
 0x3fc   : > { %v7006_v40 = vpop.f32.mrb[227].mxu0  ;;  %v10528_v37 = vadd.f32 %v7092_v31, %v10431_v3  ;;  %v7095_v54 = vadd.f32 %v7094_v5, %v7093_v50 }
 0x3fd   : > { %v10525_v42 = vadd.f32 %v7006_v40, %v7005_v36 }
 0x3fe   : > { %v10531_v29 = vadd.f32 %v7095_v54, %v10433_v20 }
 0x400   : > { %v7096_v61 = vpop.f32.mrb[216].mxu1 }
 0x401   : > { %v7008_v18 = vpop.f32.mrb[228].mxu0  ;;  %v7097_v15 = vpop.f32.mrb[217].mxu1 }
 0x402   : > { %v7009_v49 = vpop.f32.mrb[229].mxu0  ;;  %v7098_v25 = vadd.f32 %v7097_v15, %v7096_v61  ;;  %v7099_v57 = vpop.f32.mrb[218].mxu1 }
 0x403   : > { %v10533_v22 = vadd.f32 %v7009_v49, %v7008_v18  ;;  %v7011_v48 = vpop.f32.mrb[230].mxu0  ;;  %v7100_v4 = vpop.f32.mrb[219].mxu1 }
 0x404   : > { %v7012_v21 = vpop.f32.mrb[231].mxu0  ;;  %v10538_v3 = vadd.f32 %v7098_v25, %v10441_v11  ;;  %v7101_v58 = vadd.f32 %v7100_v4, %v7099_v57 }
 0x405   : > { %v10535_v19 = vadd.f32 %v7012_v21, %v7011_v48 }
 0x406   : > { %v10541_v20 = vadd.f32 %v7101_v58, %v10444_v56 }
 0x408   : > { %v7102_v17 = vpop.f32.mrb[220].mxu1 }
 0x409   : > { %v7190_v34 = vpop.f32.mrb[232].mxu0  ;;  %v7103_v63 = vpop.f32.mrb[221].mxu1 }
 0x40a   : > { %v7191_v45 = vpop.f32.mrb[233].mxu0  ;;  %v7104_v9 = vadd.f32 %v7103_v63, %v7102_v17  ;;  %v7105_v0 = vpop.f32.mrb[222].mxu1 }
 0x40b   : > { %v7192_v30 = vadd.f32 %v7191_v45, %v7190_v34  ;;  %v7193_v28 = vpop.f32.mrb[234].mxu0  ;;  %v7106_v23 = vpop.f32.mrb[223].mxu1 }
 0x40c   : > { %v7194_v44 = vpop.f32.mrb[235].mxu0  ;;  %v10544_v2 = vadd.f32 %v7104_v9, %v10449_v35  ;;  %v7107_v11 = vadd.f32 %v7106_v23, %v7105_v0 }
 0x40d   : > { %v7195_v62 = vadd.f32 %v7194_v44, %v7193_v28  ;;  %v10547_v8 = vadd.f32 %v10457_v16, %v7192_v30 }
 0x40e   : > { %v10550_v56 = vadd.f32 %v7107_v11, %v10452_v47 }
 0x40f   : > { %v10553_v52 = vadd.f32 %v10461_v60, %v7195_v62 }
 0x410   : > { %v7108_v31 = vpop.f32.mrb[224].mxu1 }
 0x411   : > { %v7196_v36 = vpop.f32.mrb[236].mxu0  ;;  %v7109_v40 = vpop.f32.mrb[225].mxu1 }
 0x412   : > { %v7197_v50 = vpop.f32.mrb[237].mxu0  ;;  %v7110_v18 = vadd.f32 %v7109_v40, %v7108_v31  ;;  %v7111_v61 = vpop.f32.mrb[226].mxu1 }
 0x413   : > { %v7198_v5 = vadd.f32 %v7197_v50, %v7196_v36  ;;  %v7199_v54 = vpop.f32.mrb[238].mxu0  ;;  %v7112_v49 = vpop.f32.mrb[227].mxu1 }
 0x414   : > { %v7200_v35 = vpop.f32.mrb[239].mxu0  ;;  %v10556_v16 = vadd.f32 %v7110_v18, %v10464_v10  ;;  %v7113_v48 = vadd.f32 %v7112_v49, %v7111_v61 }
 0x415   : > { %v7201_v15 = vadd.f32 %v7200_v35, %v7199_v54  ;;  %v10559_v47 = vadd.f32 %v10469_v38, %v7198_v5 }
 0x416   : > { %v10562_v60 = vadd.f32 %v7113_v48, %v10466_v59 }
 0x417   : > { %v10565_v25 = vadd.f32 %v10473_v53, %v7201_v15 }
 0x418   : > { %v7114_v21 = vpop.f32.mrb[228].mxu1 }
 0x419   : > { %v7202_v57 = vpop.f32.mrb[240].mxu0  ;;  %v7115_v58 = vpop.f32.mrb[229].mxu1 }
 0x41a   : > { %v7203_v4 = vpop.f32.mrb[241].mxu0  ;;  %v7116_v45 = vadd.f32 %v7115_v58, %v7114_v21  ;;  %v7117_v63 = vpop.f32.mrb[230].mxu1 }
 0x41b   : > { %v7204_v34 = vadd.f32 %v7203_v4, %v7202_v57  ;;  %v7205_v17 = vpop.f32.mrb[242].mxu0  ;;  %v7118_v30 = vpop.f32.mrb[231].mxu1 }
 0x41c   : > { %v7206_v10 = vpop.f32.mrb[243].mxu0  ;;  %v10568_v38 = vadd.f32 %v7116_v45, %v10477_v13  ;;  %v7119_v9 = vadd.f32 %v7118_v30, %v7117_v63 }
 0x41d   : > { %v7207_v28 = vadd.f32 %v7206_v10, %v7205_v17  ;;  %v10571_v59 = vadd.f32 %v10483_v7, %v7204_v34 }
 0x41e   : > { %v10574_v53 = vadd.f32 %v7119_v9, %v10480_v1 }
 0x41f   : > { %v10577_v0 = vadd.f32 %v10487_v12, %v7207_v28 }
 0x420   : > { %v7120_v23 = vpop.f32.mrb[232].mxu1 }
 0x421   : > { %v7208_v44 = vpop.f32.mrb[244].mxu0  ;;  %v7121_v11 = vpop.f32.mrb[233].mxu1 }
 0x422   : > { %v7209_v62 = vpop.f32.mrb[245].mxu0  ;;  %v7122_v50 = vadd.f32 %v7121_v11, %v7120_v23  ;;  %v7123_v40 = vpop.f32.mrb[234].mxu1 }
 0x423   : > { %v7210_v36 = vadd.f32 %v7209_v62, %v7208_v44  ;;  %v7211_v31 = vpop.f32.mrb[246].mxu0  ;;  %v7124_v5 = vpop.f32.mrb[235].mxu1 }
 0x424   : > { %v7212_v13 = vpop.f32.mrb[247].mxu0  ;;  %v10580_v7 = vadd.f32 %v7122_v50, %v10490_v32  ;;  %v7125_v18 = vadd.f32 %v7124_v5, %v7123_v40 }
 0x425   : > { %v7213_v54 = vadd.f32 %v7212_v13, %v7211_v31  ;;  %v10583_v1 = vadd.f32 %v10495_v26, %v7210_v36 }
 0x426   : > { %v10586_v12 = vadd.f32 %v7125_v18, %v10492_v33 }
 0x427   : > { %v10589_v61 = vadd.f32 %v10499_v24, %v7213_v54 }
 0x428   : > { %v7126_v49 = vpop.f32.mrb[236].mxu1 }
 0x429   : > { %v7214_v35 = vpop.f32.mrb[248].mxu0  ;;  %v7127_v48 = vpop.f32.mrb[237].mxu1 }
 0x42a   : > { %v7215_v15 = vpop.f32.mrb[249].mxu0  ;;  %v7128_v4 = vadd.f32 %v7127_v48, %v7126_v49  ;;  %v7129_v58 = vpop.f32.mrb[238].mxu1 }
 0x42b   : > { %v7216_v57 = vadd.f32 %v7215_v15, %v7214_v35  ;;  %v7217_v21 = vpop.f32.mrb[250].mxu0  ;;  %v7130_v34 = vpop.f32.mrb[239].mxu1 }
 0x42c   : > { %v7218_v32 = vpop.f32.mrb[251].mxu0  ;;  %v10592_v26 = vadd.f32 %v7128_v4, %v10502_v51  ;;  %v7131_v45 = vadd.f32 %v7130_v34, %v7129_v58 }
 0x42d   : > { %v7219_v17 = vadd.f32 %v7218_v32, %v7217_v21  ;;  %v10595_v33 = vadd.f32 %v10508_v43, %v7216_v57 }
 0x42e   : > { %v10598_v24 = vadd.f32 %v7131_v45, %v10505_v6 }
 0x42f   : > { %v10601_v63 = vadd.f32 %v10511_v55, %v7219_v17 }
 0x430   : > { %v7132_v30 = vpop.f32.mrb[240].mxu1 }
 0x431   : > { %v7220_v10 = vpop.f32.mrb[252].mxu0  ;;  %v7133_v9 = vpop.f32.mrb[241].mxu1 }
 0x432   : > { %v7221_v28 = vpop.f32.mrb[253].mxu0  ;;  %v7134_v62 = vadd.f32 %v7133_v9, %v7132_v30  ;;  %v7135_v11 = vpop.f32.mrb[242].mxu1 }
 0x433   : > { %v7222_v44 = vadd.f32 %v7221_v28, %v7220_v10  ;;  %v7223_v23 = vpop.f32.mrb[254].mxu0  ;;  %v7136_v36 = vpop.f32.mrb[243].mxu1 }
 0x434   : > { %v7224_v51 = vpop.f32.mrb[255].mxu0  ;;  %v10604_v43 = vadd.f32 %v7134_v62, %v10513_v39  ;;  %v7137_v50 = vadd.f32 %v7136_v36, %v7135_v11 }
 0x435   : > { %v7225_v31 = vadd.f32 %v7224_v51, %v7223_v23  ;;  %v10607_v6 = vadd.f32 %v10518_v27, %v7222_v44 }
 0x436   : > { %v10610_v55 = vadd.f32 %v7137_v50, %v10515_v14 }
 0x437   : > { %v10613_v40 = vadd.f32 %v10521_v46, %v7225_v31 }
 0x438   : > { %v7138_v5 = vpop.f32.mrb[244].mxu1 }
 0x439   : > { %v7226_v13 = vpop.f32.mrb[0].mxu0  ;;  %v7139_v18 = vpop.f32.mrb[245].mxu1 }
 0x43a   : > { %v7227_v54 = vpop.f32.mrb[1].mxu0  ;;  %v7140_v15 = vadd.f32 %v7139_v18, %v7138_v5  ;;  %v7141_v48 = vpop.f32.mrb[246].mxu1 }
 0x43b   : > { %v7228_v35 = vadd.f32 %v7227_v54, %v7226_v13  ;;  %v7229_v49 = vpop.f32.mrb[2].mxu0  ;;  %v7142_v57 = vpop.f32.mrb[247].mxu1 }
 0x43c   : > { %v7230_v39 = vpop.f32.mrb[3].mxu0  ;;  %v10616_v27 = vadd.f32 %v7140_v15, %v10523_v41  ;;  %v7143_v4 = vadd.f32 %v7142_v57, %v7141_v48 }
 0x43d   : > { %v7231_v21 = vadd.f32 %v7230_v39, %v7229_v49  ;;  %v10619_v14 = vadd.f32 %v10528_v37, %v7228_v35 }
 0x43e   : > { %v10622_v46 = vadd.f32 %v7143_v4, %v10525_v42 }
 0x43f   : > { %v10625_v58 = vadd.f32 %v10531_v29, %v7231_v21 }
 0x440   : > { %v7144_v34 = vpop.f32.mrb[248].mxu1 }
 0x441   : > { %v7232_v32 = vpop.f32.mrb[4].mxu0  ;;  %v7145_v45 = vpop.f32.mrb[249].mxu1 }
 0x442   : > { %v7233_v17 = vpop.f32.mrb[5].mxu0  ;;  %v7146_v28 = vadd.f32 %v7145_v45, %v7144_v34  ;;  %v7147_v9 = vpop.f32.mrb[250].mxu1 }
 0x443   : > { %v7234_v10 = vadd.f32 %v7233_v17, %v7232_v32  ;;  %v7235_v30 = vpop.f32.mrb[6].mxu0  ;;  %v7148_v44 = vpop.f32.mrb[251].mxu1 }
 0x444   : > { %v7236_v41 = vpop.f32.mrb[7].mxu0  ;;  %v10628_v37 = vadd.f32 %v7146_v28, %v10533_v22  ;;  %v7149_v62 = vadd.f32 %v7148_v44, %v7147_v9 }
 0x445   : > { %v7237_v23 = vadd.f32 %v7236_v41, %v7235_v30  ;;  %v10631_v42 = vadd.f32 %v10538_v3, %v7234_v10 }
 0x446   : > { %v10634_v29 = vadd.f32 %v7149_v62, %v10535_v19 }
 0x447   : > { %v10637_v11 = vadd.f32 %v10541_v20, %v7237_v23 }
 0x449   : > { %v7238_v51 = vpop.f32.mrb[8].mxu0 }
 0x44a   : > { %v7239_v36 = vpop.f32.mrb[9].mxu0 }
 0x44b   : > { %v7240_v31 = vadd.f32 %v7239_v36, %v7238_v51  ;;  %v7241_v50 = vpop.f32.mrb[10].mxu0 }
 0x44c   : > { %v7242_v13 = vpop.f32.mrb[11].mxu0 }
 0x44d   : > { %v7243_v5 = vadd.f32 %v7242_v13, %v7241_v50  ;;  %v10640_v54 = vadd.f32 %v10544_v2, %v7240_v31 }
 0x44f   : > { %v10643_v22 = vadd.f32 %v10550_v56, %v7243_v5 }
 0x451   : > { %v7244_v3 = vpop.f32.mrb[12].mxu0 }
 0x452   : > { %v7245_v18 = vpop.f32.mrb[13].mxu0 }
 0x453   : > { %v7246_v35 = vadd.f32 %v7245_v18, %v7244_v3  ;;  %v7247_v19 = vpop.f32.mrb[14].mxu0 }
 0x454   : > { %v7248_v49 = vpop.f32.mrb[15].mxu0 }
 0x455   : > { %v7249_v15 = vadd.f32 %v7248_v49, %v7247_v19  ;;  %v10646_v20 = vadd.f32 %v10556_v16, %v7246_v35 }
 0x457   : > { %v10649_v48 = vadd.f32 %v10562_v60, %v7249_v15 }
 0x459   : > { %v7250_v39 = vpop.f32.mrb[16].mxu0 }
 0x45a   : > { %v7251_v57 = vpop.f32.mrb[17].mxu0 }
 0x45b   : > { %v7252_v21 = vadd.f32 %v7251_v57, %v7250_v39  ;;  %v7253_v2 = vpop.f32.mrb[18].mxu0  ;;  %v8036_v57 = vld [vmem:[%s8202_s16 + $0x20] sm:$0x1] }
 0x45c   : > { %v7254_v4 = vpop.f32.mrb[19].mxu0 }
 0x45d   : > { %v7255_v32 = vadd.f32 %v7254_v4, %v7253_v2  ;;  %v10652_v56 = vadd.f32 %v10568_v38, %v7252_v21  ;;  %v6010_v21 = vunpack.c.l.bf16 %v8036_v57  ;;  %v8037_v2 = vld [vmem:[%s8202_s16 + $0x2c] sm:$0x1] }
 0x45e   : > { %v6013_v4 = vunpack.c.l.bf16 %v8037_v2 }
 0x45f   : > { %v10655_v34 = vadd.f32 %v10574_v53, %v7255_v32 }
 0x461   : > { %v7256_v17 = vpop.f32.mrb[20].mxu0 }
 0x462   : > { %v7257_v45 = vpop.f32.mrb[21].mxu0 }
 0x463   : > { %v7258_v10 = vadd.f32 %v7257_v45, %v7256_v17  ;;  %v7259_v16 = vpop.f32.mrb[22].mxu0 }
 0x464   : > { %v7260_v30 = vpop.f32.mrb[23].mxu0 }
 0x465   : > { %v7261_v28 = vadd.f32 %v7260_v30, %v7259_v16  ;;  %v10658_v60 = vadd.f32 %v10580_v7, %v7258_v10  ;;  %v10685_v16 = vrot.slane %v6010_v21, 1  ;;  %v8040_v30 = vld [vmem:[%s8202_s16 + $0x50] sm:$0x1] }
 0x467   : > { %v10661_v9 = vadd.f32 %v10586_v12, %v7261_v28  ;;  %v6022_v28 = vunpack.c.l.bf16 %v8040_v30  ;;  %v8049_v30 = vld [vmem:[%s8202_s16 + $0xa4] sm:$0x1] }
 0x469   : > { %v7262_v41 = vpop.f32.mrb[24].mxu0  ;;  %v10703_v2 = vrot.slane %v6022_v28, 1  ;;  %v8051_v28 = vld [vmem:[%s8202_s16 + $0x3c] sm:$0xff]  }
 0x46a   : > { %v7263_v44 = vpop.f32.mrb[25].mxu0 }
 0x46b   : > { %v7264_v23 = vadd.f32 %v7263_v44, %v7262_v41  ;;  %v7265_v38 = vpop.f32.mrb[26].mxu0 }
 0x46c   : > { %v7266_v62 = vpop.f32.mrb[27].mxu0 }
 0x46d   : > { %v7267_v51 = vadd.f32 %v7266_v62, %v7265_v38  ;;  %v10664_v53 = vadd.f32 %v10592_v26, %v7264_v23  ;;  %v8041_v38 = vld [vmem:[%s8202_s16 + $0x5c] sm:$0x1] }
 0x46e   : > { %v6025_v62 = vunpack.c.l.bf16 %v8041_v38  ;;  %v8050_v38 = vld [vmem:[%s8202_s16 + $0xb0] sm:$0x1] }
 0x46f   : > { %v10667_v36 = vadd.f32 %v10598_v24, %v7267_v51 }
 0x471   : > { %v7268_v31 = vpop.f32.mrb[28].mxu0 }
 0x472   : > { %v7269_v50 = vpop.f32.mrb[29].mxu0 }
 0x473   : > { %v7270_v7 = vadd.f32 %v7269_v50, %v7268_v31  ;;  %v7271_v13 = vpop.f32.mrb[30].mxu0  ;;  %v8042_v31 = vld [vmem:[%s8202_s16 + $0x68] sm:$0x1] }
 0x474   : > { %v7272_v12 = vpop.f32.mrb[31].mxu0  ;;  %v6028_v50 = vunpack.c.l.bf16 %v8042_v31  ;;  %v6046_v31 = vunpack.c.l.bf16 %v8050_v38 }
 0x475   : > { %v7273_v5 = vadd.f32 %v7272_v12, %v7271_v13  ;;  %v10670_v3 = vadd.f32 %v10604_v43, %v7270_v7  ;;  %v8038_v43 = vld [vmem:[%s8202_s16 + $0x38] sm:$0x1]  ;;  %v8043_v7 = vld [vmem:[%s8202_s16 + $0x74] sm:$0x1] }
 0x476   : > { %v6016_v32 = vunpack.c.l.bf16 %v8038_v43  ;;  %v6031_v13 = vunpack.c.l.bf16 %v8043_v7 }
 0x477   : > { %v10673_v18 = vadd.f32 %v10610_v55, %v7273_v5  ;;  %v8039_v55 = vld [vmem:[%s8202_s16 + $0x44] sm:$0x1] }
 0x478   : > { %v6019_v17 = vunpack.c.l.bf16 %v8039_v55  ;;  %v10690_v44 = vrot.slane %v6016_v32, 1  ;;  %v8044_v5 = vld [vmem:[%s8202_s16 + $0x24] sm:$0xff]   ;;  %v8048_v32 = vld [vmem:[%s8202_s16 + $0x18] sm:$0xff]  }
 0x479   : > { %v7274_v26 = vpop.f32.mrb[32].mxu0  ;;  %v6008_v55 = vunpack.c.l.bf16 %v8048_v32 }
 0x47a   : > { %v7275_v35 = vpop.f32.mrb[33].mxu0  ;;  %v10692_v23 = vrot.slane %v6019_v17, 1  ;;  %v6009_v17 = vunpack.c.h.bf16 %v8048_v32 }
 0x47b   : > { %v7276_v24 = vadd.f32 %v7275_v35, %v7274_v26  ;;  %v7277_v19 = vpop.f32.mrb[34].mxu0  ;;  %v6011_v26 = vunpack.c.l.bf16 %v8044_v5  ;;  %v6012_v35 = vunpack.c.h.bf16 %v8044_v5  ;;  %v10717_v5 = vrot.slane %v6031_v13, 1 }
 0x47c   : > { %v7278_v49 = vpop.f32.mrb[35].mxu0  ;;  %v6106_v32 = vrot.slane %v6009_v17, 1 }
 0x47d   : > { %v7279_v15 = vadd.f32 %v7278_v49, %v7277_v19  ;;  %v10676_v39 = vadd.f32 %v10616_v27, %v7276_v24  ;;  %v10687_v27 = vrot.slane %v6013_v4, 1  ;;  %v8045_v24 = vld [vmem:[%s8202_s16 + $0x80] sm:$0x1]  ;;  %v8046_v49 = vld [vmem:[%s8202_s16 + $0x8c] sm:$0x1] }
 0x47e   : > { %v6034_v19 = vunpack.c.l.bf16 %v8045_v24  ;;  %v8047_v4 = vld [vmem:[%s8202_s16 + $0x98] sm:$0x1] }
 0x47f   : > { %11149 = vst [vmem:[#allocation7_spill] sm:$0xff] %v10676_v39  ;;  %v10683_v45 = vadd.f32 %v10622_v46, %v7279_v15  ;;  %v6037_v15 = vunpack.c.l.bf16 %v8046_v49  ;;  %v6040_v43 = vunpack.c.l.bf16 %v8047_v4  ;;  %v10726_v4 = vld [vmem:[%s10957_s6] ss:$0 sm:$0xff] }
 0x480   : > { %v10719_v24 = vrot.slane %v6034_v19, 1  ;;  %v10733_v19 = vrot.slane %v6046_v31, 1 }
 0x481   : > { %11150 = vst [vmem:[#allocation8_spill] sm:$0xff] %v10683_v45  ;;  %v7280_v10 = vpop.f32.mrb[36].mxu0 }
 0x482   : > { %v7281_v41 = vpop.f32.mrb[37].mxu0 }
 0x483   : > { %v7282_v51 = vadd.f32 %v7281_v41, %v7280_v10  ;;  %v7283_v46 = vpop.f32.mrb[38].mxu0  ;;  %v10707_v10 = vrot.slane %v6025_v62, 1  ;;  %v6043_v41 = vunpack.c.l.bf16 %v8049_v30  ;;  %v10721_v62 = vrot.slane %v6037_v15, 1  ;;  %v10736_v15 = vld [vmem:[%s8202_s16 + $0xbc] sm:$0x1] }
 0x484   : > { %v7284_v12 = vpop.f32.mrb[39].mxu0 }
 0x485   : > { %v7285_v57 = vadd.f32 %v7284_v12, %v7283_v46  ;;  %v10701_v21 = vadd.f32 %v10628_v37, %v7282_v51  ;;  %v10714_v46 = vrot.slane %v6028_v50, 1  ;;  %v6110_v37 = vrot.slane %v6011_v26, 1 }
 0x486   : > { %v6111_v51 = vrot.slane %v6012_v35, 1  ;;  %v6017_v12 = vunpack.c.l.bf16 %v8051_v28  ;;  %v10728_v50 = vrot.slane %v6040_v43, 1  ;;  %v10731_v13 = vrot.slane %v6043_v41, 1  ;;  %v10742_v43 = vld [vmem:[%s10958_s7] ss:$0 sm:$0xff] }
 0x487   : > { %11151 = vst [vmem:[#allocation9_spill] sm:$0xff] %v10701_v21  ;;  %v10712_v7 = vadd.f32 %v10634_v29, %v7285_v57  ;;  %v6018_v29 = vunpack.c.h.bf16 %v8051_v28  ;;  %v6105_v57 = vrot.slane %v6008_v55, 1 }
 0x488   : > { %v7580_v49 = vpop.f32.mrb[156].mxu1  ;;  %v6112_v17 = vsel %vm930_vm0, %v6110_v37, %v6111_v51  ;;  %v6120_v28 = vrot.slane %v6017_v12, 1  ;;  %v6114_v12 = vsel %vm930_vm0, %v6111_v51, %v10687_v27 }
 0x489   : > { %11152 = vst [vmem:[#allocation19_spill] sm:$0xff] %v10712_v7  ;;  %v7644_v26 = vadd.f32 %v10559_v47, %v7580_v49  ;;  %v5771_v35 = vpop.f32.mrb[157].mxu1  ;;  %v6121_v45 = vrot.slane %v6018_v29, 1  ;;  %v8053_v7 = vld [vmem:[%s8202_s16 + $0x30] sm:$0xff]  }
 0x48a   : > { %v7647_v47 = vadd.f32 %v10547_v8, %v5771_v35  ;;  %v7581_v38 = vpop.f32.mrb[158].mxu1  ;;  %v6014_v39 = vunpack.c.l.bf16 %v8053_v7  ;;  %v6107_v35 = vsel %vm930_vm0, %v6105_v57, %v6106_v32  ;;  %v6015_v37 = vunpack.c.h.bf16 %v8053_v7 }
 0x48b   : > { %v5939_v55 = vmul.f32 %v7644_v26, %v10726_v4  ;;  %v7650_v41 = vadd.f32 %v10565_v25, %v7581_v38  ;;  %v5774_v31 = vpop.f32.mrb[159].mxu1  ;;  %v8054_v38 = vld [vmem:[%s8202_s16 + $0x54] sm:$0xff]   ;;  %v6122_v57 = vsel %vm930_vm0, %v6120_v28, %v6121_v45 }
 0x48c   : > { %v5937_v49 = vmul.f32 %v7647_v47, %v10726_v4  ;;  %v7653_v30 = vadd.f32 %v10553_v52, %v5774_v31  ;;  %v6023_v52 = vunpack.c.l.bf16 %v8054_v38  ;;  %v6024_v21 = vunpack.c.h.bf16 %v8054_v38 }
 0x48d   : > { %v5978_v8 = vadd.f32 %v10742_v43, %v5939_v55  ;;  %v5940_v26 = vmul.f32 %v7650_v41, %v10726_v4  ;;  %v6109_v55 = vsel %vm930_vm0, %v6106_v32, %v10685_v16  ;;  %v6116_v32 = vrot.slane %v6015_v37, 1 }
 0x48e   : > { %v5976_v25 = vadd.f32 %v10742_v43, %v5937_v49  ;;  %v5938_v47 = vmul.f32 %v7653_v30, %v10726_v4  ;;  %v6115_v30 = vrot.slane %v6014_v39, 1 }
 0x48f   : > { %v6219_v29 = vadd.f32 %v6112_v17, %v5978_v8  ;;  %v5979_v31 = vadd.f32 %v10742_v43, %v5940_v26 }
 0x490   : > { %v6217_v7 = vadd.f32 %v6107_v35, %v5976_v25  ;;  %v5977_v27 = vadd.f32 %v10742_v43, %v5938_v47  ;;  %v7584_v51 = vpop.f32.mrb[160].mxu1  ;;  %v6130_v25 = vrot.slane %v6023_v52, 1 }
 0x491   : > { %v6251_v17 = vmax.f32 %v6219_v29, 0.0  ;;  %v6220_v41 = vadd.f32 %v6114_v12, %v5979_v31  ;;  %v7656_v49 = vadd.f32 %v10583_v1, %v7584_v51  ;;  %v5787_v16 = vpop.f32.mrb[161].mxu1  ;;  %v6131_v29 = vrot.slane %v6024_v21, 1 }
 0x492   : > { %v6249_v8 = vmax.f32 %v6217_v7, 0.0  ;;  %v6218_v26 = vadd.f32 %v6109_v55, %v5977_v27  ;;  %v7659_v38 = vadd.f32 %v10571_v59, %v5787_v16  ;;  %v7585_v35 = vpop.f32.mrb[162].mxu1  ;;  %v8055_v55 = vld [vmem:[%s8202_s16 + $0x48] sm:$0xff]   ;;  %v6117_v7 = vsel %vm930_vm0, %v6115_v30, %v6116_v32 }
 0x493   : > { %6283 = vst [vmem:[%s10766_s13 + $0x10] sm:$0xff] %v6251_v17  ;;  %v6252_v47 = vmax.f32 %v6220_v41, 0.0  ;;  %v5943_v39 = vmul.f32 %v7656_v49, %v10726_v4  ;;  %v7662_v28 = vadd.f32 %v10589_v61, %v7585_v35  ;;  %v5790_v12 = vpop.f32.mrb[163].mxu1  ;;  %v6020_v59 = vunpack.c.l.bf16 %v8055_v55  ;;  %v8056_v41 = vld [vmem:[%s8202_s16 + $0x6c] sm:$0xff]  }
 0x494   : > { %6281 = vst [vmem:[%s10766_s13] sm:$0xff] %v6249_v8  ;;  %v6250_v1 = vmax.f32 %v6218_v26, 0.0  ;;  %v5941_v37 = vmul.f32 %v7659_v38, %v10726_v4  ;;  %v7665_v31 = vadd.f32 %v10577_v0, %v5790_v12  ;;  %v6021_v51 = vunpack.c.h.bf16 %v8055_v55 }
 0x495   : > { %6284 = vst [vmem:[%s10766_s13 + $0x18] sm:$0xff] %v6252_v47  ;;  %v5982_v52 = vadd.f32 %v10742_v43, %v5943_v39  ;;  %v5944_v27 = vmul.f32 %v7662_v28, %v10726_v4  ;;  %v6124_v21 = vsel %vm930_vm0, %v6121_v45, %v10692_v23  ;;  %v6029_v0 = vunpack.c.l.bf16 %v8056_v41 }
 0x496   : > { %6282 = vst [vmem:[%s10766_s13 + $0x8] sm:$0xff] %v6250_v1  ;;  %v5980_v61 = vadd.f32 %v10742_v43, %v5941_v37  ;;  %v5942_v17 = vmul.f32 %v7665_v31, %v10726_v4  ;;  %v6119_v8 = vsel %vm930_vm0, %v6116_v32, %v10690_v44  ;;  %v6030_v30 = vunpack.c.h.bf16 %v8056_v41 }
 0x497   : > { %v6223_v49 = vadd.f32 %v6122_v57, %v5982_v52  ;;  %v5983_v16 = vadd.f32 %v10742_v43, %v5944_v27  ;;  %v6132_v47 = vsel %vm930_vm0, %v6130_v25, %v6131_v29  ;;  %v6125_v39 = vrot.slane %v6020_v59, 1 }
 0x498   : > { %v6221_v26 = vadd.f32 %v6117_v7, %v5980_v61  ;;  %v5981_v38 = vadd.f32 %v10742_v43, %v5942_v17  ;;  %v7588_v35 = vpop.f32.mrb[164].mxu1  ;;  %v6126_v12 = vrot.slane %v6021_v51, 1  ;;  %v6140_v31 = vrot.slane %v6029_v0, 1  ;;  %v8057_v61 = vld [vmem:[%s8202_s16 + $0x60] sm:$0xff]  }
 0x499   : > { %v6255_v45 = vmax.f32 %v6223_v49, 0.0  ;;  %v6224_v23 = vadd.f32 %v6124_v21, %v5983_v16  ;;  %v7668_v28 = vadd.f32 %v10607_v6, %v7588_v35  ;;  %v5803_v57 = vpop.f32.mrb[165].mxu1  ;;  %v6141_v7 = vrot.slane %v6030_v30, 1 }
 0x49a   : > { %v6253_v1 = vmax.f32 %v6221_v26, 0.0  ;;  %v6222_v37 = vadd.f32 %v6119_v8, %v5981_v38  ;;  %v7671_v44 = vadd.f32 %v10595_v33, %v5803_v57  ;;  %v7589_v32 = vpop.f32.mrb[166].mxu1  ;;  %v6026_v33 = vunpack.c.l.bf16 %v8057_v61  ;;  %v8058_v8 = vld [vmem:[%s8202_s16 + $0x84] sm:$0xff]  }
 0x49b   : > { %6287 = vst [vmem:[%s10766_s13 + $0x30] sm:$0xff] %v6255_v45  ;;  %v6256_v55 = vmax.f32 %v6224_v23, 0.0  ;;  %v5947_v25 = vmul.f32 %v7668_v28, %v10726_v4  ;;  %v7674_v59 = vadd.f32 %v10613_v40, %v7589_v32  ;;  %v5806_v52 = vpop.f32.mrb[167].mxu1  ;;  %v6127_v17 = vsel %vm930_vm0, %v6125_v39, %v6126_v12 }
 0x49c   : > { %6285 = vst [vmem:[%s10766_s13 + $0x20] sm:$0xff] %v6253_v1  ;;  %v6254_v6 = vmax.f32 %v6222_v37, 0.0  ;;  %v5945_v27 = vmul.f32 %v7671_v44, %v10726_v4  ;;  %v7677_v51 = vadd.f32 %v10601_v63, %v5806_v52  ;;  %v6027_v0 = vunpack.c.h.bf16 %v8057_v61  ;;  %v8059_v61 = vld [vmem:[%s8202_s16 + $0x78] sm:$0xff]  }
 0x49d   : > { %6288 = vst [vmem:[%s10766_s13 + $0x38] sm:$0xff] %v6256_v55  ;;  %v5986_v21 = vadd.f32 %v10742_v43, %v5947_v25  ;;  %v5948_v41 = vmul.f32 %v7674_v59, %v10726_v4  ;;  %v6134_v49 = vsel %vm930_vm0, %v6131_v29, %v10707_v10  ;;  %v6035_v63 = vunpack.c.l.bf16 %v8058_v8 }
 0x49e   : > { %6286 = vst [vmem:[%s10766_s13 + $0x28] sm:$0xff] %v6254_v6  ;;  %v5984_v40 = vadd.f32 %v10742_v43, %v5945_v27  ;;  %v5946_v16 = vmul.f32 %v7677_v51, %v10726_v4  ;;  %v6129_v38 = vsel %vm930_vm0, %v6126_v12, %v10703_v2  ;;  %v6036_v35 = vunpack.c.h.bf16 %v8058_v8 }
 0x49f   : > { %v6227_v30 = vadd.f32 %v6132_v47, %v5986_v21  ;;  %v5987_v26 = vadd.f32 %v10742_v43, %v5948_v41  ;;  %v6142_v28 = vsel %vm930_vm0, %v6140_v31, %v6141_v7  ;;  %v6135_v57 = vrot.slane %v6026_v33, 1 }
 0x4a0   : > { %v6225_v39 = vadd.f32 %v6127_v17, %v5984_v40  ;;  %v5985_v45 = vadd.f32 %v10742_v43, %v5946_v16  ;;  %v7592_v23 = vpop.f32.mrb[168].mxu1  ;;  %v6136_v37 = vrot.slane %v6027_v0, 1  ;;  %v6150_v55 = vrot.slane %v6035_v63, 1 }
 0x4a1   : > { %v6259_v10 = vmax.f32 %v6227_v30, 0.0  ;;  %v6228_v29 = vadd.f32 %v6134_v49, %v5987_v26  ;;  %v7680_v1 = vadd.f32 %v10631_v42, %v7592_v23  ;;  %v5819_v47 = vpop.f32.mrb[169].mxu1  ;;  %v6151_v6 = vrot.slane %v6036_v35, 1  ;;  %v8060_v49 = vld [vmem:[%s8202_s16 + $0x9c] sm:$0xff]  }
 0x4a2   : > { %v6257_v44 = vmax.f32 %v6225_v39, 0.0  ;;  %v6226_v32 = vadd.f32 %v6129_v38, %v5985_v45  ;;  %v7683_v2 = vadd.f32 %v10619_v14, %v5819_v47  ;;  %v7593_v12 = vpop.f32.mrb[170].mxu1  ;;  %v6032_v14 = vunpack.c.l.bf16 %v8059_v61 }
 0x4a3   : > { %6291 = vst [vmem:[%s10766_s13 + $0x50] sm:$0xff] %v6259_v10  ;;  %v6260_v25 = vmax.f32 %v6228_v29, 0.0  ;;  %v5951_v31 = vmul.f32 %v7680_v1, %v10726_v4  ;;  %v7686_v59 = vadd.f32 %v10637_v11, %v7593_v12  ;;  %v5822_v52 = vpop.f32.mrb[171].mxu1  ;;  %v6137_v21 = vsel %vm930_vm0, %v6135_v57, %v6136_v37 }
 0x4a4   : > { %6289 = vst [vmem:[%s10766_s13 + $0x40] sm:$0xff] %v6257_v44  ;;  %v6258_v42 = vmax.f32 %v6226_v32, 0.0  ;;  %v5949_v27 = vmul.f32 %v7683_v2, %v10726_v4  ;;  %v7689_v51 = vadd.f32 %v10625_v58, %v5822_v52  ;;  %v6033_v41 = vunpack.c.h.bf16 %v8059_v61 }
 0x4a5   : > { %6292 = vst [vmem:[%s10766_s13 + $0x58] sm:$0xff] %v6260_v25  ;;  %v5990_v33 = vadd.f32 %v10742_v43, %v5951_v31  ;;  %v5952_v17 = vmul.f32 %v7686_v59, %v10726_v4  ;;  %v6144_v0 = vsel %vm930_vm0, %v6141_v7, %v10717_v5  ;;  %v6041_v58 = vunpack.c.l.bf16 %v8060_v49  ;;  %v8061_v31 = vld [vmem:[%s8202_s16 + $0x90] sm:$0xff]  }
 0x4a6   : > { %6290 = vst [vmem:[%s10766_s13 + $0x48] sm:$0xff] %v6258_v42  ;;  %v5988_v11 = vadd.f32 %v10742_v43, %v5949_v27  ;;  %v5950_v40 = vmul.f32 %v7689_v51, %v10726_v4  ;;  %v6139_v63 = vsel %vm930_vm0, %v6136_v37, %v10714_v46  ;;  %v6042_v30 = vunpack.c.h.bf16 %v8060_v49 }
 0x4a7   : > { %v6231_v16 = vadd.f32 %v6142_v28, %v5990_v33  ;;  %v5991_v8 = vadd.f32 %v10742_v43, %v5952_v17  ;;  %v6152_v39 = vsel %vm930_vm0, %v6150_v55, %v6151_v6  ;;  %v6145_v45 = vrot.slane %v6032_v14, 1  ;;  %v8062_v14 = vld [vmem:[%s8202_s16 + $0xb4] sm:$0xff]  }
 0x4a8   : > { %v6229_v26 = vadd.f32 %v6137_v21, %v5988_v11  ;;  %v5989_v38 = vadd.f32 %v10742_v43, %v5950_v40  ;;  %v7596_v35 = vpop.f32.mrb[172].mxu1  ;;  %v6146_v57 = vrot.slane %v6033_v41, 1  ;;  %v6160_v47 = vrot.slane %v6041_v58, 1 }
 0x4a9   : > { %v6263_v5 = vmax.f32 %v6231_v16, 0.0  ;;  %v6232_v7 = vadd.f32 %v6144_v0, %v5991_v8  ;;  %v7692_v23 = vadd.f32 %v10646_v20, %v7596_v35  ;;  %v5835_v28 = vpop.f32.mrb[173].mxu1  ;;  %v6161_v12 = vrot.slane %v6042_v30, 1 }
 0x4aa   : > { %v6261_v10 = vmax.f32 %v6229_v26, 0.0  ;;  %v6230_v29 = vadd.f32 %v6139_v63, %v5989_v38  ;;  %v7695_v46 = vadd.f32 %v10640_v54, %v5835_v28  ;;  %v7597_v1 = vpop.f32.mrb[174].mxu1  ;;  %v6038_v54 = vunpack.c.l.bf16 %v8061_v31 }
 0x4ab   : > { %6295 = vst [vmem:[%s10766_s13 + $0x70] sm:$0xff] %v6263_v5  ;;  %v6264_v37 = vmax.f32 %v6232_v7, 0.0  ;;  %v5955_v44 = vmul.f32 %v7692_v23, %v10726_v4  ;;  %v7698_v32 = vadd.f32 %v10649_v48, %v7597_v1  ;;  %v5838_v2 = vpop.f32.mrb[175].mxu1  ;;  %v6147_v52 = vsel %vm930_vm0, %v6145_v45, %v6146_v57 }
 0x4ac   : > { %6293 = vst [vmem:[%s10766_s13 + $0x60] sm:$0xff] %v6261_v10  ;;  %v6262_v20 = vmax.f32 %v6230_v29, 0.0  ;;  %v5953_v55 = vmul.f32 %v7695_v46, %v10726_v4  ;;  %v7701_v25 = vadd.f32 %v10643_v22, %v5838_v2  ;;  %v6039_v27 = vunpack.c.h.bf16 %v8061_v31  ;;  %v8063_v10 = vld [vmem:[%s8202_s16 + $0xa8] sm:$0xff]  }
 0x4ad   : > { %6296 = vst [vmem:[%s10766_s13 + $0x78] sm:$0xff] %v6264_v37  ;;  %v5994_v59 = vadd.f32 %v10742_v43, %v5955_v44  ;;  %v5956_v42 = vmul.f32 %v7698_v32, %v10726_v4  ;;  %v6154_v51 = vsel %vm930_vm0, %v6151_v6, %v10721_v62  ;;  %v6047_v22 = vunpack.c.l.bf16 %v8062_v14  ;;  %v10887_v2 = vld [vmem:[%s8408_s23 + $0x8] sm:$0x1] }
 0x4ae   : > { %6294 = vst [vmem:[%s10766_s13 + $0x68] sm:$0xff] %v6262_v20  ;;  %v5992_v48 = vadd.f32 %v10742_v43, %v5953_v55  ;;  %v5954_v61 = vmul.f32 %v7701_v25, %v10726_v4  ;;  %v6149_v17 = vsel %vm930_vm0, %v6146_v57, %v10719_v24  ;;  %v6048_v41 = vunpack.c.h.bf16 %v8062_v14 }
 0x4af   : > { %v6235_v33 = vadd.f32 %v6152_v39, %v5994_v59  ;;  %v5995_v21 = vadd.f32 %v10742_v43, %v5956_v42  ;;  %v6162_v49 = vsel %vm930_vm0, %v6160_v47, %v6161_v12  ;;  %v6155_v58 = vrot.slane %v6038_v54, 1 }
 0x4b0   : > { %v6233_v11 = vadd.f32 %v6147_v52, %v5992_v48  ;;  %v5993_v0 = vadd.f32 %v10742_v43, %v5954_v61  ;;  %v7600_v40 = vpop.f32.mrb[176].mxu1  ;;  %v6156_v63 = vrot.slane %v6039_v27, 1  ;;  %v6170_v35 = vrot.slane %v6047_v22, 1 }
 0x4b1   : > { %v6267_v62 = vmax.f32 %v6235_v33, 0.0  ;;  %v6236_v6 = vadd.f32 %v6154_v51, %v5995_v21  ;;  %v7704_v16 = vadd.f32 %v10658_v60, %v7600_v40  ;;  %v5851_v8 = vpop.f32.mrb[177].mxu1  ;;  %v6171_v23 = vrot.slane %v6048_v41, 1  ;;  %v8065_v33 = vld [vmem:[%s8408_s23 + $0xc] sm:$0xff]  }
 0x4b2   : > { %v6265_v30 = vmax.f32 %v6233_v11, 0.0  ;;  %v6234_v26 = vadd.f32 %v6149_v17, %v5993_v0  ;;  %v7707_v24 = vadd.f32 %v10652_v56, %v5851_v8  ;;  %v7601_v38 = vpop.f32.mrb[178].mxu1  ;;  %v6044_v56 = vunpack.c.l.bf16 %v8063_v10 }
 0x4b3   : > { %6299 = vst [vmem:[%s10766_s13 + $0x90] sm:$0xff] %v6267_v62  ;;  %v6268_v39 = vmax.f32 %v6236_v6, 0.0  ;;  %v5959_v45 = vmul.f32 %v7704_v16, %v10726_v4  ;;  %v7710_v5 = vadd.f32 %v10661_v9, %v7601_v38  ;;  %v5854_v7 = vpop.f32.mrb[179].mxu1  ;;  %v6157_v46 = vsel %vm930_vm0, %v6155_v58, %v6156_v63  ;;  %v8066_v58 = vld [vmem:[%s8408_s23] sm:$0xff]  }
 0x4b4   : > { %6297 = vst [vmem:[%s10766_s13 + $0x80] sm:$0xff] %v6265_v30  ;;  %v6266_v60 = vmax.f32 %v6234_v26, 0.0  ;;  %v5957_v28 = vmul.f32 %v7707_v24, %v10726_v4  ;;  %v7713_v57 = vadd.f32 %v10655_v34, %v5854_v7  ;;  %v6045_v47 = vunpack.c.h.bf16 %v8063_v10 }
 0x4b5   : > { %6300 = vst [vmem:[%s10766_s13 + $0x98] sm:$0xff] %v6268_v39  ;;  %v5998_v29 = vadd.f32 %v10742_v43, %v5959_v45  ;;  %v5960_v1 = vmul.f32 %v7710_v5, %v10726_v4  ;;  %v11153_v9 = vunpack.c.l.bf16 %v10736_v15  ;;  %v6164_v32 = vsel %vm930_vm0, %v6161_v12, %v10731_v13 }
 0x4b6   : > { %6298 = vst [vmem:[%s10766_s13 + $0x88] sm:$0xff] %v6266_v60  ;;  %v5996_v44 = vadd.f32 %v10742_v43, %v5957_v28  ;;  %v5958_v34 = vmul.f32 %v7713_v57, %v10726_v4  ;;  %v6052_v20 = vunpack.c.l.bf16 %v10887_v2  ;;  %v6159_v15 = vsel %vm930_vm0, %v6156_v63, %v10728_v50 }
 0x4b7   : > { %v6173_v37 = vrot.slane %v11153_v9, 1  ;;  %v6239_v55 = vadd.f32 %v6162_v49, %v5998_v29  ;;  %v5999_v25 = vadd.f32 %v10742_v43, %v5960_v1  ;;  %v6172_v13 = vsel %vm930_vm0, %v6170_v35, %v6171_v23 }
 0x4b8   : > { %v6237_v31 = vadd.f32 %v6157_v46, %v5996_v44  ;;  %v5997_v54 = vadd.f32 %v10742_v43, %v5958_v34  ;;  %v7604_v59 = vpop.f32.mrb[180].mxu1  ;;  %v6165_v12 = vrot.slane %v6044_v56, 1  ;;  %v6166_v51 = vrot.slane %v6045_v47, 1 }
 0x4b9   : > { %v6271_v52 = vmax.f32 %v6239_v55, 0.0  ;;  %v6240_v42 = vadd.f32 %v6164_v32, %v5999_v25  ;;  %v7716_v27 = vadd.f32 %v10670_v3, %v7604_v59  ;;  %v5867_v48 = vpop.f32.mrb[181].mxu1  ;;  %v6053_v21 = vunpack.c.l.bf16 %v8065_v33  ;;  %v11156_v25 = vld [vmem:[#allocation19_spill] sm:$0xff] }
 0x4ba   : > { %v6269_v61 = vmax.f32 %v6237_v31, 0.0  ;;  %v6238_v14 = vadd.f32 %v6159_v15, %v5997_v54  ;;  %v7719_v50 = vadd.f32 %v10664_v53, %v5867_v48  ;;  %v7605_v22 = vpop.f32.mrb[182].mxu1  ;;  %v6054_v0 = vunpack.c.h.bf16 %v8065_v33 }
 0x4bb   : > { %6303 = vst [vmem:[%s10766_s13 + $0xb0] sm:$0xff] %v6271_v52  ;;  %v6272_v17 = vmax.f32 %v6240_v42, 0.0  ;;  %v5963_v41 = vmul.f32 %v7716_v27, %v10726_v4  ;;  %v7722_v11 = vadd.f32 %v10673_v18, %v7605_v22  ;;  %v5870_v3 = vpop.f32.mrb[183].mxu1  ;;  %v6050_v62 = vunpack.c.l.bf16 %v8066_v58  ;;  %v8067_v18 = vld [vmem:[%s8408_s23 + $0x14] sm:$0x1] }
 0x4bc   : > { %6301 = vst [vmem:[%s10766_s13 + $0xa0] sm:$0xff] %v6269_v61  ;;  %v6270_v40 = vmax.f32 %v6238_v14, 0.0  ;;  %v5961_v49 = vmul.f32 %v7719_v50, %v10726_v4  ;;  %v7725_v53 = vadd.f32 %v10667_v36, %v5870_v3  ;;  %v6167_v16 = vsel %vm930_vm0, %v6165_v12, %v6166_v51  ;;  %v11157_v12 = vld [vmem:[#allocation8_spill] sm:$0xff] }
 0x4bd   : > { %6304 = vst [vmem:[%s10766_s13 + $0xb8] sm:$0xff] %v6272_v17  ;;  %v6002_v6 = vadd.f32 %v10742_v43, %v5963_v41  ;;  %v5964_v8 = vmul.f32 %v7722_v11, %v10726_v4  ;;  %v6051_v63 = vunpack.c.h.bf16 %v8066_v58  ;;  %v6055_v30 = vunpack.c.l.bf16 %v8067_v18 }
 0x4be   : > { %6302 = vst [vmem:[%s10766_s13 + $0xa8] sm:$0xff] %v6270_v40  ;;  %v6000_v26 = vadd.f32 %v10742_v43, %v5961_v49  ;;  %v6174_v24 = vsel %vm930_vm0, %v6171_v23, %v6173_v37  ;;  %v5962_v38 = vmul.f32 %v7725_v53, %v10726_v4  ;;  %v6169_v39 = vsel %vm930_vm0, %v6166_v51, %v10733_v19  ;;  %v11154_v23 = vld [vmem:[#allocation9_spill] sm:$0xff]  ;;  %v11155_v19 = vld [vmem:[#allocation7_spill] sm:$0xff] }
 0x4bf   : > { %v6243_v36 = vadd.f32 %v6172_v13, %v6002_v6  ;;  %v6003_v35 = vadd.f32 %v10742_v43, %v5964_v8  ;;  %v6180_v45 = vrot.slane %v6053_v21, 1  ;;  %v6181_v28 = vrot.slane %v6054_v0, 1 }
 0x4c0   : > { %v6241_v5 = vadd.f32 %v6167_v16, %v6000_v26  ;;  %v6001_v7 = vadd.f32 %v10742_v43, %v5962_v38  ;;  %v7608_v60 = vpop.f32.mrb[184].mxu1  ;;  %v6175_v57 = vrot.slane %v6050_v62, 1  ;;  %v6176_v1 = vrot.slane %v6051_v63, 1 }
 0x4c1   : > { %v6275_v10 = vmax.f32 %v6243_v36, 0.0  ;;  %v6244_v56 = vadd.f32 %v6174_v24, %v6003_v35  ;;  %v7728_v29 = vadd.f32 %v11154_v23, %v7608_v60  ;;  %v5883_v46 = vpop.f32.mrb[185].mxu1  ;;  %v6183_v47 = vrot.slane %v6055_v30, 1 }
 0x4c2   : > { %v6273_v9 = vmax.f32 %v6241_v5, 0.0  ;;  %v6242_v37 = vadd.f32 %v6169_v39, %v6001_v7  ;;  %v7731_v44 = vadd.f32 %v11155_v19, %v5883_v46  ;;  %v7609_v32 = vpop.f32.mrb[186].mxu1  ;;  %v6178_v34 = vrot.slane %v6052_v20, 1 }
 0x4c3   : > { %6307 = vst [vmem:[%s10766_s13 + $0xd0] sm:$0xff] %v6275_v10  ;;  %v6276_v2 = vmax.f32 %v6244_v56, 0.0  ;;  %v5967_v55 = vmul.f32 %v7728_v29, %v10726_v4  ;;  %v7734_v15 = vadd.f32 %v11156_v25, %v7609_v32  ;;  %v5886_v31 = vpop.f32.mrb[187].mxu1  ;;  %v6182_v59 = vsel %vm930_vm0, %v6180_v45, %v6181_v28 }
 0x4c4   : > { %6305 = vst [vmem:[%s10766_s13 + $0xc0] sm:$0xff] %v6273_v9  ;;  %v6274_v54 = vmax.f32 %v6242_v37, 0.0  ;;  %v5965_v13 = vmul.f32 %v7731_v44, %v10726_v4  ;;  %v7737_v52 = vadd.f32 %v11157_v12, %v5886_v31  ;;  %v6177_v20 = vsel %vm930_vm0, %v6175_v57, %v6176_v1 }
 0x4c5   : > { %6308 = vst [vmem:[%s10766_s13 + $0xd8] sm:$0xff] %v6276_v2  ;;  %v6006_v42 = vadd.f32 %v10742_v43, %v5967_v55  ;;  %v5968_v27 = vmul.f32 %v7734_v15, %v10726_v4  ;;  %v6184_v51 = vsel %vm930_vm0, %v6181_v28, %v6183_v47  ;;  %v6179_v22 = vsel %vm930_vm0, %v6176_v1, %v6178_v34 }
 0x4c6   : > { %6306 = vst [vmem:[%s10766_s13 + $0xc8] sm:$0xff] %v6274_v54  ;;  %v6004_v48 = vadd.f32 %v10742_v43, %v5965_v13  ;;  %v5966_v61 = vmul.f32 %v7737_v52, %v10726_v4 }
 0x4c7   : > { %v6247_v14 = vadd.f32 %v6182_v59, %v6006_v42  ;;  %v6007_v50 = vadd.f32 %v10742_v43, %v5968_v27 }
 0x4c8   : > { %v6245_v33 = vadd.f32 %v6177_v20, %v6004_v48  ;;  %v6005_v21 = vadd.f32 %v10742_v43, %v5966_v61 }
 0x4c9   : > { %v6279_v17 = vmax.f32 %v6247_v14, 0.0  ;;  %v6248_v41 = vadd.f32 %v6184_v51, %v6007_v50 }
 0x4ca   : > { %v6277_v11 = vmax.f32 %v6245_v33, 0.0  ;;  %v6246_v3 = vadd.f32 %v6179_v22, %v6005_v21 }
 0x4cb   : > { %6311 = vst [vmem:[%s10766_s13 + $0xf0] sm:$0xff] %v6279_v17  ;;  %v6280_v0 = vmax.f32 %v6248_v41, 0.0 }
 0x4cc   : > { %6309 = vst [vmem:[%s10766_s13 + $0xe0] sm:$0xff] %v6277_v11  ;;  %v6278_v40 = vmax.f32 %v6246_v3, 0.0 }
 0x4cd   : > { %6312 = vst [vmem:[%s10766_s13 + $0xf8] sm:$0xff] %v6280_v0 }
 0x4ce   : > { %6310 = vst [vmem:[%s10766_s13 + $0xe8] sm:$0xff] %v6278_v40 }
 0x4cf PF: > { %s18_s29 = sadd.s32 1, %s8090_s29   ;;  %s11158_s27 = smov %s8086_s28 }
 0x4d0   : > { %p15_p5 = scmp.ge.s32.totalorder %s18_s29, 4   ;;  %s11159_s28 = smov %s11161_s30 }
 0x4d2   :  { %17 = sbr.rel (!%p15_p5) target bundleno = 2 (0x2), region = 94 }

</bundles_post_ra>
